<compile_context>
chip_gen: v7x
topology: tpu7x:2x2x1
jax: 0.10.0
libtpu: 0.0.40
codegen_flags: <defaults>
</compile_context>

<pallas_src>
import jax
import jax.numpy as jnp
from jax import lax
from jax.experimental import pallas as pl
from jax.experimental.pallas import tpu as pltpu

# Hyperparameters taken from the PyTorch module
CNN_OUTPUT_DIM = 512
RNN_HIDDEN_DIM = 256
RNN_EMBED_DIM = 128
VOCAB_SIZE = 10
NUM_LAYERS = 1
MAX_SEQ_LENGTH = 6

VOCAB_PAD = 128      # lane-dense padded vocab width
NEG = -1e30          # padded-lane logit bias (never wins the argmax)


# ----------------------------- Pallas kernel --------------------------------

def _caption_kernel(feat_ref, x0g_ref, projw_ref, projb_ref,
                    whh_ref, b_ref, embg_ref, fcw_ref, fcb_ref, out_ref):
    """Whole caption decode in one invocation.

    Inputs (weights already bf16, gate-space embedding table precomputed):
      feat_ref  (B, F)    bf16   CNN features
      x0g_ref   (B, 4H)   f32    step-0 x-gate contribution (emb[tok0] @ W_ih)
      projw_ref (F, H)    bf16   feature_projection weight
      projb_ref (1, H)    f32    feature_projection bias
      whh_ref   (H, 4H)   bf16   LSTM hidden->gates weight
      b_ref     (1, 4H)   f32    LSTM bias (b_ih + b_hh)
      embg_ref  (Vp, 4H)  bf16   embedding @ W_ih table (vocab padded to 128)
      fcw_ref   (H, Vp)   bf16   fc weight, vocab padded to 128 lanes
      fcb_ref   (1, Vp)   f32    fc bias, padded lanes = -1e30
      out_ref   (Tm1, B, Vp) f32 logits per decode step
    """
    B = feat_ref.shape[0]
    H = whh_ref.shape[0]
    Vp = fcw_ref.shape[1]
    Tm1 = out_ref.shape[0]
    bf16 = jnp.bfloat16

    # ---- prologue (loop-invariant) ----
    # fused feature_projection -> h0   (bf16 operands, f32 accumulation)
    h = (jnp.dot(feat_ref[...], projw_ref[...],
                 preferred_element_type=jnp.float32) + projb_ref[...])
    c = jnp.zeros((B, H), jnp.float32)

    whh = whh_ref[...]                                          # (H, 4H) bf16
    embg = embg_ref[...]                                        # (Vp, 4H) bf16
    fcw = fcw_ref[...]                                          # (H, Vp) bf16
    bias = jnp.broadcast_to(b_ref[...], (B, 4 * H))             # hoisted, f32
    fcb = jnp.broadcast_to(fcb_ref[...], (B, Vp))               # hoisted, f32
    vocab_iota = lax.broadcasted_iota(jnp.int32, (B, Vp), 1)    # hoisted

    def lstm_cell(gates, c_prev):
        i_g = jax.nn.sigmoid(gates[:, 0 * H:1 * H])
        f_g = jax.nn.sigmoid(gates[:, 1 * H:2 * H])
        g_g = jnp.tanh(gates[:, 2 * H:3 * H])
        o_g = jax.nn.sigmoid(gates[:, 3 * H:4 * H])
        c_new = f_g * c_prev + i_g * g_g
        h_new = o_g * jnp.tanh(c_new)
        return h_new, c_new

    # ---- step 0: teacher-provided first token (x-gates precomputed) ----
    hgate0 = jnp.dot(h.astype(bf16), whh, preferred_element_type=jnp.float32)
    h, c = lstm_cell(x0g_ref[...] + hgate0 + bias, c)
    logits = jnp.dot(h.astype(bf16), fcw,
                     preferred_element_type=jnp.float32) + fcb
    out_ref[0] = logits

    # ---- steps 1..Tm1-1: greedy feedback (argmax -> one-hot -> gates) ----
    def body(t, carry):
        h_p, c_p, prev_logits = carry
        # Big weight push (K=256) issued first: independent of fc/argmax, so
        # it hides under the argmax / one-hot latency instead of waiting.
        hgate = jnp.dot(h_p.astype(bf16), whh,
                        preferred_element_type=jnp.float32)
        # Greedy argmax with first-index tie-break, then one-hot.
        row_max = jnp.max(prev_logits, axis=-1, keepdims=True)
        first_max = jnp.min(
            jnp.where(prev_logits == row_max, vocab_iota, Vp),
            axis=-1, keepdims=True)
        onehot = (vocab_iota == first_max).astype(bf16)               # (B, Vp)
        xgate = jnp.dot(onehot, embg, preferred_element_type=jnp.float32)
        h_n, c_n = lstm_cell(xgate + hgate + bias, c_p)
        new_logits = jnp.dot(h_n.astype(bf16), fcw,
                             preferred_element_type=jnp.float32) + fcb
        out_ref[t] = new_logits
        return (h_n, c_n, new_logits)

    lax.fori_loop(1, Tm1, body, (h, c, logits), unroll=True)


# ------------------------------- wrapper -------------------------------------

def rnn_forward(features, captions, params):
    """Pallas implementation of RNN.forward(features, captions, tf_ratio=0.0)."""
    Tm1 = captions.shape[1] - 1
    H, E, V, Vp = RNN_HIDDEN_DIM, RNN_EMBED_DIM, VOCAB_SIZE, VOCAB_PAD
    B = features.shape[0]
    bf16 = jnp.bfloat16

    # bf16 weight casts (MXU-native); accumulation stays f32 inside the kernel
    projw = params["proj_w"].astype(bf16)                             # (F, H)
    whh = params["w_hh"].astype(bf16)                                 # (H, 4H)

    # Precompute gate-space embedding table OUTSIDE the kernel:
    #   one_hot(token) @ emb @ W_ih  ==  row select of this table.
    emb_pad = jnp.zeros((Vp, E), jnp.float32).at[:V].set(params["emb"])
    emb_gates = jnp.dot(emb_pad.astype(bf16), params["w_ih"].astype(bf16),
                        preferred_element_type=jnp.float32).astype(bf16)  # (Vp, 4H)

    # lane-dense padding of vocab-sized fc tensors (layout plumbing only)
    fcw_pad = (jnp.zeros((H, Vp), jnp.float32)
               .at[:, :V].set(params["fc_w"]).astype(bf16))
    fcb_pad = jnp.full((1, Vp), NEG, jnp.float32).at[:, :V].set(params["fc_b"])

    # step-0 teacher token: its x-gate contribution is a tiny gather (JAX glue)
    x0_gates = emb_gates[captions[:, 0]].astype(jnp.float32)          # (B, 4H)

    vmem_spec = pl.BlockSpec(memory_space=pltpu.MemorySpace.VMEM)
    out = pl.pallas_call(
        _caption_kernel,
        out_shape=jax.ShapeDtypeStruct((Tm1, B, Vp), jnp.float32),
        in_specs=[vmem_spec] * 9,
        out_specs=vmem_spec,
    )(features.astype(bf16), x0_gates,
      projw, params["proj_b"].reshape(1, H),
      whh, params["b"], emb_gates, fcw_pad, fcb_pad)

    # drop padded vocab lanes, reorder to (B, T-1, V) like PyTorch
    return jnp.transpose(out[:, :, :V], (1, 0, 2))


# ------------------------------ reference ------------------------------------

def rnn_reference(features, captions, params):
    """Pure-JAX reference mirroring the kernel's bf16-MXU / f32-accumulate math."""
    H, E, V, Vp = RNN_HIDDEN_DIM, RNN_EMBED_DIM, VOCAB_SIZE, VOCAB_PAD
    bf16 = jnp.bfloat16

    projw = params["proj_w"].astype(bf16)
    whh = params["w_hh"].astype(bf16)
    fcw = params["fc_w"].astype(bf16)
    emb_pad = jnp.zeros((Vp, E), jnp.float32).at[:V].set(params["emb"])
    emb_gates = jnp.dot(emb_pad.astype(bf16), params["w_ih"].astype(bf16),
                        preferred_element_type=jnp.float32).astype(bf16)

    h = (jnp.dot(features.astype(bf16), projw,
                 preferred_element_type=jnp.float32) + params["proj_b"])
    c = jnp.zeros_like(h)
    outs = []
    Tm1 = captions.shape[1] - 1
    tok = captions[:, 0]
    for t in range(Tm1):
        if t > 0:
            tok = jnp.argmax(outs[-1], axis=-1)
        xg = emb_gates[tok].astype(jnp.float32)
        gates = (xg
                 + jnp.dot(h.astype(bf16), whh,
                           preferred_element_type=jnp.float32)
                 + params["b"][0])
        i = jax.nn.sigmoid(gates[:, :H])
        f = jax.nn.sigmoid(gates[:, H:2 * H])
        g = jnp.tanh(gates[:, 2 * H:3 * H])
        o = jax.nn.sigmoid(gates[:, 3 * H:4 * H])
        c = f * c + i * g
        h = o * jnp.tanh(c)
        outs.append(jnp.dot(h.astype(bf16), fcw,
                            preferred_element_type=jnp.float32)
                    + params["fc_b"][0])
    return jnp.stack(outs, axis=1)


# -------------------------------- main ----------------------------------------

def init_params(key):
    ks = jax.random.split(key, 8)
    s = 0.05
    H, E, V, F = RNN_HIDDEN_DIM, RNN_EMBED_DIM, VOCAB_SIZE, CNN_OUTPUT_DIM
    return {
        "proj_w": jax.random.normal(ks[0], (F, H), jnp.float32) * s,
        "proj_b": jax.random.normal(ks[1], (H,), jnp.float32) * s,
        "w_ih":   jax.random.normal(ks[2], (E, 4 * H), jnp.float32) * s,
        "w_hh":   jax.random.normal(ks[3], (H, 4 * H), jnp.float32) * s,
        "b":      (jax.random.normal(ks[4], (4 * H,), jnp.float32) * s).reshape(1, 4 * H),
        "emb":    jax.random.normal(ks[5], (V, E), jnp.float32) * s,
        "fc_w":   jax.random.normal(ks[6], (H, V), jnp.float32) * s,
        "fc_b":   (jax.random.normal(ks[7], (V,), jnp.float32) * s).reshape(1, V),
    }


if __name__ == "__main__":
    key = jax.random.PRNGKey(0)
    k_par, k_feat, k_cap = jax.random.split(key, 3)

    B = 8
    T = MAX_SEQ_LENGTH  # 6  -> T-1 = 5 decode steps

    params = init_params(k_par)
    features = jax.random.normal(k_feat, (B, CNN_OUTPUT_DIM), jnp.float32)
    captions = jax.random.randint(k_cap, (B, T), 0, VOCAB_SIZE, jnp.int32)

    fwd = jax.jit(rnn_forward)
    out = jax.block_until_ready(fwd(features, captions, params))
    assert out.shape == (B, T - 1, VOCAB_SIZE), out.shape

    ref = rnn_reference(features, captions, params)
    # bf16 MXU operands (f32 accumulation) in both kernel and reference.
    assert jnp.allclose(out, ref, atol=2e-2, rtol=2e-2), float(jnp.max(jnp.abs(out - ref)))

    print("KERNEL_OK")
</pallas_src>

<mosaic_0001>
module attributes {stable_mosaic.version = 11 : i64} {
  func.func @_caption_kernel(%arg0: memref<8x512xbf16, #tpu.memory_space<vmem>>, %arg1: memref<8x1024xf32, #tpu.memory_space<vmem>>, %arg2: memref<512x256xbf16, #tpu.memory_space<vmem>>, %arg3: memref<1x256xf32, #tpu.memory_space<vmem>>, %arg4: memref<256x1024xbf16, #tpu.memory_space<vmem>>, %arg5: memref<1x1024xf32, #tpu.memory_space<vmem>>, %arg6: memref<128x1024xbf16, #tpu.memory_space<vmem>>, %arg7: memref<256x128xbf16, #tpu.memory_space<vmem>>, %arg8: memref<1x128xf32, #tpu.memory_space<vmem>>, %arg9: memref<5x8x128xf32, #tpu.memory_space<vmem>>) attributes {dimension_semantics = [], scalar_prefetch = 0 : i64, scratch_operands = 0 : i64, tpu.core_type = #tpu.core_type<tc>} {
    %c0 = arith.constant 0 : index
    %c0_0 = arith.constant 0 : index
    %0 = vector.load %arg0[%c0, %c0_0] : memref<8x512xbf16, #tpu.memory_space<vmem>>, vector<8x512xbf16>
    %c0_1 = arith.constant 0 : index
    %c0_2 = arith.constant 0 : index
    %1 = vector.load %arg2[%c0_1, %c0_2] : memref<512x256xbf16, #tpu.memory_space<vmem>>, vector<512x256xbf16>
    %cst = arith.constant dense<0.000000e+00> : vector<8x256xf32>
    %2 = tpu.matmul %0, %1, %cst {dimension_numbers = #tpu.dot_dimension_numbers<[1], [0], [0], [1], [0, 0, 1, 1], [], []>} : vector<8x512xbf16>, vector<512x256xbf16>, vector<8x256xf32> -> vector<8x256xf32>
    %c0_3 = arith.constant 0 : index
    %c0_4 = arith.constant 0 : index
    %3 = vector.load %arg3[%c0_3, %c0_4] : memref<1x256xf32, #tpu.memory_space<vmem>>, vector<1x256xf32>
    %4 = vector.broadcast %3 : vector<1x256xf32> to vector<8x256xf32>
    %5 = arith.addf %2, %4 : vector<8x256xf32>
    %cst_5 = arith.constant 0.000000e+00 : f32
    %6 = vector.broadcast %cst_5 : f32 to vector<8x256xf32>
    %c0_6 = arith.constant 0 : index
    %c0_7 = arith.constant 0 : index
    %7 = vector.load %arg4[%c0_6, %c0_7] : memref<256x1024xbf16, #tpu.memory_space<vmem>>, vector<256x1024xbf16>
    %c0_8 = arith.constant 0 : index
    %c0_9 = arith.constant 0 : index
    %8 = vector.load %arg6[%c0_8, %c0_9] : memref<128x1024xbf16, #tpu.memory_space<vmem>>, vector<128x1024xbf16>
    %c0_10 = arith.constant 0 : index
    %c0_11 = arith.constant 0 : index
    %9 = vector.load %arg7[%c0_10, %c0_11] : memref<256x128xbf16, #tpu.memory_space<vmem>>, vector<256x128xbf16>
    %c0_12 = arith.constant 0 : index
    %c0_13 = arith.constant 0 : index
    %10 = vector.load %arg5[%c0_12, %c0_13] : memref<1x1024xf32, #tpu.memory_space<vmem>>, vector<1x1024xf32>
    %11 = vector.shape_cast %10 : vector<1x1024xf32> to vector<1x1024xf32>
    %12 = vector.broadcast %11 : vector<1x1024xf32> to vector<8x1024xf32>
    %c0_14 = arith.constant 0 : index
    %c0_15 = arith.constant 0 : index
    %13 = vector.load %arg8[%c0_14, %c0_15] : memref<1x128xf32, #tpu.memory_space<vmem>>, vector<1x128xf32>
    %14 = vector.shape_cast %13 : vector<1x128xf32> to vector<1x128xf32>
    %15 = vector.broadcast %14 : vector<1x128xf32> to vector<8x128xf32>
    %16 = tpu.iota {dimensions = array<i32: 1>} : vector<8x128xi32>
    %17 = arith.truncf %5 : vector<8x256xf32> to vector<8x256xbf16>
    %cst_16 = arith.constant dense<0.000000e+00> : vector<8x1024xf32>
    %18 = tpu.matmul %17, %7, %cst_16 {dimension_numbers = #tpu.dot_dimension_numbers<[1], [0], [0], [1], [0, 0, 1, 1], [], []>} : vector<8x256xbf16>, vector<256x1024xbf16>, vector<8x1024xf32> -> vector<8x1024xf32>
    %c0_17 = arith.constant 0 : index
    %c0_18 = arith.constant 0 : index
    %19 = vector.load %arg1[%c0_17, %c0_18] : memref<8x1024xf32, #tpu.memory_space<vmem>>, vector<8x1024xf32>
    %20 = arith.addf %19, %18 : vector<8x1024xf32>
    %21 = arith.addf %20, %12 : vector<8x1024xf32>
    %22 = vector.extract_strided_slice %21 {offsets = [0, 0], sizes = [8, 256], strides = [1, 1]} : vector<8x1024xf32> to vector<8x256xf32>
    %23 = arith.negf %22 : vector<8x256xf32>
    %24 = math.exp %23 : vector<8x256xf32>
    %cst_19 = arith.constant 1.000000e+00 : f32
    %25 = vector.broadcast %cst_19 : f32 to vector<8x256xf32>
    %26 = arith.addf %25, %24 : vector<8x256xf32>
    %27 = arith.divf %25, %26 : vector<8x256xf32>
    %28 = vector.extract_strided_slice %21 {offsets = [0, 256], sizes = [8, 256], strides = [1, 1]} : vector<8x1024xf32> to vector<8x256xf32>
    %29 = arith.negf %28 : vector<8x256xf32>
    %30 = math.exp %29 : vector<8x256xf32>
    %cst_20 = arith.constant 1.000000e+00 : f32
    %31 = vector.broadcast %cst_20 : f32 to vector<8x256xf32>
    %32 = arith.addf %31, %30 : vector<8x256xf32>
    %33 = arith.divf %31, %32 : vector<8x256xf32>
    %34 = vector.extract_strided_slice %21 {offsets = [0, 512], sizes = [8, 256], strides = [1, 1]} : vector<8x1024xf32> to vector<8x256xf32>
    %35 = math.tanh %34 : vector<8x256xf32>
    %36 = vector.extract_strided_slice %21 {offsets = [0, 768], sizes = [8, 256], strides = [1, 1]} : vector<8x1024xf32> to vector<8x256xf32>
    %37 = arith.negf %36 : vector<8x256xf32>
    %38 = math.exp %37 : vector<8x256xf32>
    %cst_21 = arith.constant 1.000000e+00 : f32
    %39 = vector.broadcast %cst_21 : f32 to vector<8x256xf32>
    %40 = arith.addf %39, %38 : vector<8x256xf32>
    %41 = arith.divf %39, %40 : vector<8x256xf32>
    %42 = arith.mulf %33, %6 : vector<8x256xf32>
    %43 = arith.mulf %27, %35 : vector<8x256xf32>
    %44 = arith.addf %42, %43 : vector<8x256xf32>
    %45 = math.tanh %44 : vector<8x256xf32>
    %46 = arith.mulf %41, %45 : vector<8x256xf32>
    %47 = arith.truncf %46 : vector<8x256xf32> to vector<8x256xbf16>
    %cst_22 = arith.constant dense<0.000000e+00> : vector<8x128xf32>
    %48 = tpu.matmul %47, %9, %cst_22 {dimension_numbers = #tpu.dot_dimension_numbers<[1], [0], [0], [1], [0, 0, 1, 1], [], []>} : vector<8x256xbf16>, vector<256x128xbf16>, vector<8x128xf32> -> vector<8x128xf32>
    %49 = arith.addf %48, %15 : vector<8x128xf32>
    %c0_23 = arith.constant 0 : index
    %c0_24 = arith.constant 0 : index
    %c0_25 = arith.constant 0 : index
    %50 = vector.load %arg9[%c0_23, %c0_24, %c0_25] : memref<5x8x128xf32, #tpu.memory_space<vmem>>, vector<1x8x128xf32>
    %51 = vector.shape_cast %50 : vector<1x8x128xf32> to vector<8x128xf32>
    %52 = vector.shape_cast %49 : vector<8x128xf32> to vector<1x8x128xf32>
    tpu.vector_store %arg9[%c0_23, %c0_24, %c0_25], %52 {strides = array<i32>} : memref<5x8x128xf32, #tpu.memory_space<vmem>>, vector<1x8x128xf32>,
    %c1_i32 = arith.constant 1 : i32
    %53 = arith.truncf %46 : vector<8x256xf32> to vector<8x256xbf16>
    %cst_26 = arith.constant dense<0.000000e+00> : vector<8x1024xf32>
    %54 = tpu.matmul %53, %7, %cst_26 {dimension_numbers = #tpu.dot_dimension_numbers<[1], [0], [0], [1], [0, 0, 1, 1], [], []>} : vector<8x256xbf16>, vector<256x1024xbf16>, vector<8x1024xf32> -> vector<8x1024xf32>
    %cst_27 = arith.constant dense<0xFF800000> : vector<8xf32>
    %55 = vector.multi_reduction <maximumf>, %49, %cst_27 [1] : vector<8x128xf32> to vector<8xf32>
    %56 = vector.shape_cast %55 : vector<8xf32> to vector<8x1xf32>
    %57 = vector.broadcast %56 : vector<8x1xf32> to vector<8x128xf32>
    %58 = arith.cmpf oeq, %49, %57 : vector<8x128xf32>
    %c128_i32 = arith.constant 128 : i32
    %59 = vector.broadcast %c128_i32 : i32 to vector<8x128xi32>
    %60 = arith.select %58, %16, %59 : vector<8x128xi1>, vector<8x128xi32>
    %cst_28 = arith.constant dense<2147483647> : vector<8xi32>
    %61 = vector.multi_reduction <minsi>, %60, %cst_28 [1] : vector<8x128xi32> to vector<8xi32>
    %62 = vector.shape_cast %61 : vector<8xi32> to vector<8x1xi32>
    %63 = vector.broadcast %62 : vector<8x1xi32> to vector<8x128xi32>
    %64 = arith.cmpi eq, %16, %63 : vector<8x128xi32>
    %65 = arith.extui %64 : vector<8x128xi1> to vector<8x128xi32>
    %66 = arith.sitofp %65 : vector<8x128xi32> to vector<8x128xf32>
    %67 = arith.truncf %66 : vector<8x128xf32> to vector<8x128xbf16>
    %cst_29 = arith.constant dense<0.000000e+00> : vector<8x1024xf32>
    %68 = tpu.matmul %67, %8, %cst_29 {dimension_numbers = #tpu.dot_dimension_numbers<[1], [0], [0], [1], [0, 0, 1, 1], [], []>} : vector<8x128xbf16>, vector<128x1024xbf16>, vector<8x1024xf32> -> vector<8x1024xf32>
    %69 = arith.addf %68, %54 : vector<8x1024xf32>
    %70 = arith.addf %69, %12 : vector<8x1024xf32>
    %71 = vector.extract_strided_slice %70 {offsets = [0, 0], sizes = [8, 256], strides = [1, 1]} : vector<8x1024xf32> to vector<8x256xf32>
    %72 = arith.negf %71 : vector<8x256xf32>
    %73 = math.exp %72 : vector<8x256xf32>
    %cst_30 = arith.constant 1.000000e+00 : f32
    %74 = vector.broadcast %cst_30 : f32 to vector<8x256xf32>
    %75 = arith.addf %74, %73 : vector<8x256xf32>
    %76 = arith.divf %74, %75 : vector<8x256xf32>
    %77 = vector.extract_strided_slice %70 {offsets = [0, 256], sizes = [8, 256], strides = [1, 1]} : vector<8x1024xf32> to vector<8x256xf32>
    %78 = arith.negf %77 : vector<8x256xf32>
    %79 = math.exp %78 : vector<8x256xf32>
    %cst_31 = arith.constant 1.000000e+00 : f32
    %80 = vector.broadcast %cst_31 : f32 to vector<8x256xf32>
    %81 = arith.addf %80, %79 : vector<8x256xf32>
    %82 = arith.divf %80, %81 : vector<8x256xf32>
    %83 = vector.extract_strided_slice %70 {offsets = [0, 512], sizes = [8, 256], strides = [1, 1]} : vector<8x1024xf32> to vector<8x256xf32>
    %84 = math.tanh %83 : vector<8x256xf32>
    %85 = vector.extract_strided_slice %70 {offsets = [0, 768], sizes = [8, 256], strides = [1, 1]} : vector<8x1024xf32> to vector<8x256xf32>
    %86 = arith.negf %85 : vector<8x256xf32>
    %87 = math.exp %86 : vector<8x256xf32>
    %cst_32 = arith.constant 1.000000e+00 : f32
    %88 = vector.broadcast %cst_32 : f32 to vector<8x256xf32>
    %89 = arith.addf %88, %87 : vector<8x256xf32>
    %90 = arith.divf %88, %89 : vector<8x256xf32>
    %91 = arith.mulf %82, %44 : vector<8x256xf32>
    %92 = arith.mulf %76, %84 : vector<8x256xf32>
    %93 = arith.addf %91, %92 : vector<8x256xf32>
    %94 = math.tanh %93 : vector<8x256xf32>
    %95 = arith.mulf %90, %94 : vector<8x256xf32>
    %96 = arith.truncf %95 : vector<8x256xf32> to vector<8x256xbf16>
    %cst_33 = arith.constant dense<0.000000e+00> : vector<8x128xf32>
    %97 = tpu.matmul %96, %9, %cst_33 {dimension_numbers = #tpu.dot_dimension_numbers<[1], [0], [0], [1], [0, 0, 1, 1], [], []>} : vector<8x256xbf16>, vector<256x128xbf16>, vector<8x128xf32> -> vector<8x128xf32>
    %98 = arith.addf %97, %15 : vector<8x128xf32>
    %99 = arith.index_cast %c1_i32 : i32 to index
    %c0_34 = arith.constant 0 : index
    %c0_35 = arith.constant 0 : index
    %100 = vector.load %arg9[%99, %c0_34, %c0_35] : memref<5x8x128xf32, #tpu.memory_space<vmem>>, vector<1x8x128xf32>
    %101 = vector.shape_cast %100 : vector<1x8x128xf32> to vector<8x128xf32>
    %102 = vector.shape_cast %98 : vector<8x128xf32> to vector<1x8x128xf32>
    tpu.vector_store %arg9[%99, %c0_34, %c0_35], %102 {strides = array<i32>} : memref<5x8x128xf32, #tpu.memory_space<vmem>>, vector<1x8x128xf32>,
    %c2_i32 = arith.constant 2 : i32
    %103 = arith.truncf %95 : vector<8x256xf32> to vector<8x256xbf16>
    %cst_36 = arith.constant dense<0.000000e+00> : vector<8x1024xf32>
    %104 = tpu.matmul %103, %7, %cst_36 {dimension_numbers = #tpu.dot_dimension_numbers<[1], [0], [0], [1], [0, 0, 1, 1], [], []>} : vector<8x256xbf16>, vector<256x1024xbf16>, vector<8x1024xf32> -> vector<8x1024xf32>
    %cst_37 = arith.constant dense<0xFF800000> : vector<8xf32>
    %105 = vector.multi_reduction <maximumf>, %98, %cst_37 [1] : vector<8x128xf32> to vector<8xf32>
    %106 = vector.shape_cast %105 : vector<8xf32> to vector<8x1xf32>
    %107 = vector.broadcast %106 : vector<8x1xf32> to vector<8x128xf32>
    %108 = arith.cmpf oeq, %98, %107 : vector<8x128xf32>
    %c128_i32_38 = arith.constant 128 : i32
    %109 = vector.broadcast %c128_i32_38 : i32 to vector<8x128xi32>
    %110 = arith.select %108, %16, %109 : vector<8x128xi1>, vector<8x128xi32>
    %cst_39 = arith.constant dense<2147483647> : vector<8xi32>
    %111 = vector.multi_reduction <minsi>, %110, %cst_39 [1] : vector<8x128xi32> to vector<8xi32>
    %112 = vector.shape_cast %111 : vector<8xi32> to vector<8x1xi32>
    %113 = vector.broadcast %112 : vector<8x1xi32> to vector<8x128xi32>
    %114 = arith.cmpi eq, %16, %113 : vector<8x128xi32>
    %115 = arith.extui %114 : vector<8x128xi1> to vector<8x128xi32>
    %116 = arith.sitofp %115 : vector<8x128xi32> to vector<8x128xf32>
    %117 = arith.truncf %116 : vector<8x128xf32> to vector<8x128xbf16>
    %cst_40 = arith.constant dense<0.000000e+00> : vector<8x1024xf32>
    %118 = tpu.matmul %117, %8, %cst_40 {dimension_numbers = #tpu.dot_dimension_numbers<[1], [0], [0], [1], [0, 0, 1, 1], [], []>} : vector<8x128xbf16>, vector<128x1024xbf16>, vector<8x1024xf32> -> vector<8x1024xf32>
    %119 = arith.addf %118, %104 : vector<8x1024xf32>
    %120 = arith.addf %119, %12 : vector<8x1024xf32>
    %121 = vector.extract_strided_slice %120 {offsets = [0, 0], sizes = [8, 256], strides = [1, 1]} : vector<8x1024xf32> to vector<8x256xf32>
    %122 = arith.negf %121 : vector<8x256xf32>
    %123 = math.exp %122 : vector<8x256xf32>
    %cst_41 = arith.constant 1.000000e+00 : f32
    %124 = vector.broadcast %cst_41 : f32 to vector<8x256xf32>
    %125 = arith.addf %124, %123 : vector<8x256xf32>
    %126 = arith.divf %124, %125 : vector<8x256xf32>
    %127 = vector.extract_strided_slice %120 {offsets = [0, 256], sizes = [8, 256], strides = [1, 1]} : vector<8x1024xf32> to vector<8x256xf32>
    %128 = arith.negf %127 : vector<8x256xf32>
    %129 = math.exp %128 : vector<8x256xf32>
    %cst_42 = arith.constant 1.000000e+00 : f32
    %130 = vector.broadcast %cst_42 : f32 to vector<8x256xf32>
    %131 = arith.addf %130, %129 : vector<8x256xf32>
    %132 = arith.divf %130, %131 : vector<8x256xf32>
    %133 = vector.extract_strided_slice %120 {offsets = [0, 512], sizes = [8, 256], strides = [1, 1]} : vector<8x1024xf32> to vector<8x256xf32>
    %134 = math.tanh %133 : vector<8x256xf32>
    %135 = vector.extract_strided_slice %120 {offsets = [0, 768], sizes = [8, 256], strides = [1, 1]} : vector<8x1024xf32> to vector<8x256xf32>
    %136 = arith.negf %135 : vector<8x256xf32>
    %137 = math.exp %136 : vector<8x256xf32>
    %cst_43 = arith.constant 1.000000e+00 : f32
    %138 = vector.broadcast %cst_43 : f32 to vector<8x256xf32>
    %139 = arith.addf %138, %137 : vector<8x256xf32>
    %140 = arith.divf %138, %139 : vector<8x256xf32>
    %141 = arith.mulf %132, %93 : vector<8x256xf32>
    %142 = arith.mulf %126, %134 : vector<8x256xf32>
    %143 = arith.addf %141, %142 : vector<8x256xf32>
    %144 = math.tanh %143 : vector<8x256xf32>
    %145 = arith.mulf %140, %144 : vector<8x256xf32>
    %146 = arith.truncf %145 : vector<8x256xf32> to vector<8x256xbf16>
    %cst_44 = arith.constant dense<0.000000e+00> : vector<8x128xf32>
    %147 = tpu.matmul %146, %9, %cst_44 {dimension_numbers = #tpu.dot_dimension_numbers<[1], [0], [0], [1], [0, 0, 1, 1], [], []>} : vector<8x256xbf16>, vector<256x128xbf16>, vector<8x128xf32> -> vector<8x128xf32>
    %148 = arith.addf %147, %15 : vector<8x128xf32>
    %149 = arith.index_cast %c2_i32 : i32 to index
    %c0_45 = arith.constant 0 : index
    %c0_46 = arith.constant 0 : index
    %150 = vector.load %arg9[%149, %c0_45, %c0_46] : memref<5x8x128xf32, #tpu.memory_space<vmem>>, vector<1x8x128xf32>
    %151 = vector.shape_cast %150 : vector<1x8x128xf32> to vector<8x128xf32>
    %152 = vector.shape_cast %148 : vector<8x128xf32> to vector<1x8x128xf32>
    tpu.vector_store %arg9[%149, %c0_45, %c0_46], %152 {strides = array<i32>} : memref<5x8x128xf32, #tpu.memory_space<vmem>>, vector<1x8x128xf32>,
    %c3_i32 = arith.constant 3 : i32
    %153 = arith.truncf %145 : vector<8x256xf32> to vector<8x256xbf16>
    %cst_47 = arith.constant dense<0.000000e+00> : vector<8x1024xf32>
    %154 = tpu.matmul %153, %7, %cst_47 {dimension_numbers = #tpu.dot_dimension_numbers<[1], [0], [0], [1], [0, 0, 1, 1], [], []>} : vector<8x256xbf16>, vector<256x1024xbf16>, vector<8x1024xf32> -> vector<8x1024xf32>
    %cst_48 = arith.constant dense<0xFF800000> : vector<8xf32>
    %155 = vector.multi_reduction <maximumf>, %148, %cst_48 [1] : vector<8x128xf32> to vector<8xf32>
    %156 = vector.shape_cast %155 : vector<8xf32> to vector<8x1xf32>
    %157 = vector.broadcast %156 : vector<8x1xf32> to vector<8x128xf32>
    %158 = arith.cmpf oeq, %148, %157 : vector<8x128xf32>
    %c128_i32_49 = arith.constant 128 : i32
    %159 = vector.broadcast %c128_i32_49 : i32 to vector<8x128xi32>
    %160 = arith.select %158, %16, %159 : vector<8x128xi1>, vector<8x128xi32>
    %cst_50 = arith.constant dense<2147483647> : vector<8xi32>
    %161 = vector.multi_reduction <minsi>, %160, %cst_50 [1] : vector<8x128xi32> to vector<8xi32>
    %162 = vector.shape_cast %161 : vector<8xi32> to vector<8x1xi32>
    %163 = vector.broadcast %162 : vector<8x1xi32> to vector<8x128xi32>
    %164 = arith.cmpi eq, %16, %163 : vector<8x128xi32>
    %165 = arith.extui %164 : vector<8x128xi1> to vector<8x128xi32>
    %166 = arith.sitofp %165 : vector<8x128xi32> to vector<8x128xf32>
    %167 = arith.truncf %166 : vector<8x128xf32> to vector<8x128xbf16>
    %cst_51 = arith.constant dense<0.000000e+00> : vector<8x1024xf32>
    %168 = tpu.matmul %167, %8, %cst_51 {dimension_numbers = #tpu.dot_dimension_numbers<[1], [0], [0], [1], [0, 0, 1, 1], [], []>} : vector<8x128xbf16>, vector<128x1024xbf16>, vector<8x1024xf32> -> vector<8x1024xf32>
    %169 = arith.addf %168, %154 : vector<8x1024xf32>
    %170 = arith.addf %169, %12 : vector<8x1024xf32>
    %171 = vector.extract_strided_slice %170 {offsets = [0, 0], sizes = [8, 256], strides = [1, 1]} : vector<8x1024xf32> to vector<8x256xf32>
    %172 = arith.negf %171 : vector<8x256xf32>
    %173 = math.exp %172 : vector<8x256xf32>
    %cst_52 = arith.constant 1.000000e+00 : f32
    %174 = vector.broadcast %cst_52 : f32 to vector<8x256xf32>
    %175 = arith.addf %174, %173 : vector<8x256xf32>
    %176 = arith.divf %174, %175 : vector<8x256xf32>
    %177 = vector.extract_strided_slice %170 {offsets = [0, 256], sizes = [8, 256], strides = [1, 1]} : vector<8x1024xf32> to vector<8x256xf32>
    %178 = arith.negf %177 : vector<8x256xf32>
    %179 = math.exp %178 : vector<8x256xf32>
    %cst_53 = arith.constant 1.000000e+00 : f32
    %180 = vector.broadcast %cst_53 : f32 to vector<8x256xf32>
    %181 = arith.addf %180, %179 : vector<8x256xf32>
    %182 = arith.divf %180, %181 : vector<8x256xf32>
    %183 = vector.extract_strided_slice %170 {offsets = [0, 512], sizes = [8, 256], strides = [1, 1]} : vector<8x1024xf32> to vector<8x256xf32>
    %184 = math.tanh %183 : vector<8x256xf32>
    %185 = vector.extract_strided_slice %170 {offsets = [0, 768], sizes = [8, 256], strides = [1, 1]} : vector<8x1024xf32> to vector<8x256xf32>
    %186 = arith.negf %185 : vector<8x256xf32>
    %187 = math.exp %186 : vector<8x256xf32>
    %cst_54 = arith.constant 1.000000e+00 : f32
    %188 = vector.broadcast %cst_54 : f32 to vector<8x256xf32>
    %189 = arith.addf %188, %187 : vector<8x256xf32>
    %190 = arith.divf %188, %189 : vector<8x256xf32>
    %191 = arith.mulf %182, %143 : vector<8x256xf32>
    %192 = arith.mulf %176, %184 : vector<8x256xf32>
    %193 = arith.addf %191, %192 : vector<8x256xf32>
    %194 = math.tanh %193 : vector<8x256xf32>
    %195 = arith.mulf %190, %194 : vector<8x256xf32>
    %196 = arith.truncf %195 : vector<8x256xf32> to vector<8x256xbf16>
    %cst_55 = arith.constant dense<0.000000e+00> : vector<8x128xf32>
    %197 = tpu.matmul %196, %9, %cst_55 {dimension_numbers = #tpu.dot_dimension_numbers<[1], [0], [0], [1], [0, 0, 1, 1], [], []>} : vector<8x256xbf16>, vector<256x128xbf16>, vector<8x128xf32> -> vector<8x128xf32>
    %198 = arith.addf %197, %15 : vector<8x128xf32>
    %199 = arith.index_cast %c3_i32 : i32 to index
    %c0_56 = arith.constant 0 : index
    %c0_57 = arith.constant 0 : index
    %200 = vector.load %arg9[%199, %c0_56, %c0_57] : memref<5x8x128xf32, #tpu.memory_space<vmem>>, vector<1x8x128xf32>
    %201 = vector.shape_cast %200 : vector<1x8x128xf32> to vector<8x128xf32>
    %202 = vector.shape_cast %198 : vector<8x128xf32> to vector<1x8x128xf32>
    tpu.vector_store %arg9[%199, %c0_56, %c0_57], %202 {strides = array<i32>} : memref<5x8x128xf32, #tpu.memory_space<vmem>>, vector<1x8x128xf32>,
    %c4_i32 = arith.constant 4 : i32
    %203 = arith.truncf %195 : vector<8x256xf32> to vector<8x256xbf16>
    %cst_58 = arith.constant dense<0.000000e+00> : vector<8x1024xf32>
    %204 = tpu.matmul %203, %7, %cst_58 {dimension_numbers = #tpu.dot_dimension_numbers<[1], [0], [0], [1], [0, 0, 1, 1], [], []>} : vector<8x256xbf16>, vector<256x1024xbf16>, vector<8x1024xf32> -> vector<8x1024xf32>
    %cst_59 = arith.constant dense<0xFF800000> : vector<8xf32>
    %205 = vector.multi_reduction <maximumf>, %198, %cst_59 [1] : vector<8x128xf32> to vector<8xf32>
    %206 = vector.shape_cast %205 : vector<8xf32> to vector<8x1xf32>
    %207 = vector.broadcast %206 : vector<8x1xf32> to vector<8x128xf32>
    %208 = arith.cmpf oeq, %198, %207 : vector<8x128xf32>
    %c128_i32_60 = arith.constant 128 : i32
    %209 = vector.broadcast %c128_i32_60 : i32 to vector<8x128xi32>
    %210 = arith.select %208, %16, %209 : vector<8x128xi1>, vector<8x128xi32>
    %cst_61 = arith.constant dense<2147483647> : vector<8xi32>
    %211 = vector.multi_reduction <minsi>, %210, %cst_61 [1] : vector<8x128xi32> to vector<8xi32>
    %212 = vector.shape_cast %211 : vector<8xi32> to vector<8x1xi32>
    %213 = vector.broadcast %212 : vector<8x1xi32> to vector<8x128xi32>
    %214 = arith.cmpi eq, %16, %213 : vector<8x128xi32>
    %215 = arith.extui %214 : vector<8x128xi1> to vector<8x128xi32>
    %216 = arith.sitofp %215 : vector<8x128xi32> to vector<8x128xf32>
    %217 = arith.truncf %216 : vector<8x128xf32> to vector<8x128xbf16>
    %cst_62 = arith.constant dense<0.000000e+00> : vector<8x1024xf32>
    %218 = tpu.matmul %217, %8, %cst_62 {dimension_numbers = #tpu.dot_dimension_numbers<[1], [0], [0], [1], [0, 0, 1, 1], [], []>} : vector<8x128xbf16>, vector<128x1024xbf16>, vector<8x1024xf32> -> vector<8x1024xf32>
    %219 = arith.addf %218, %204 : vector<8x1024xf32>
    %220 = arith.addf %219, %12 : vector<8x1024xf32>
    %221 = vector.extract_strided_slice %220 {offsets = [0, 0], sizes = [8, 256], strides = [1, 1]} : vector<8x1024xf32> to vector<8x256xf32>
    %222 = arith.negf %221 : vector<8x256xf32>
    %223 = math.exp %222 : vector<8x256xf32>
    %cst_63 = arith.constant 1.000000e+00 : f32
    %224 = vector.broadcast %cst_63 : f32 to vector<8x256xf32>
    %225 = arith.addf %224, %223 : vector<8x256xf32>
    %226 = arith.divf %224, %225 : vector<8x256xf32>
    %227 = vector.extract_strided_slice %220 {offsets = [0, 256], sizes = [8, 256], strides = [1, 1]} : vector<8x1024xf32> to vector<8x256xf32>
    %228 = arith.negf %227 : vector<8x256xf32>
    %229 = math.exp %228 : vector<8x256xf32>
    %cst_64 = arith.constant 1.000000e+00 : f32
    %230 = vector.broadcast %cst_64 : f32 to vector<8x256xf32>
    %231 = arith.addf %230, %229 : vector<8x256xf32>
    %232 = arith.divf %230, %231 : vector<8x256xf32>
    %233 = vector.extract_strided_slice %220 {offsets = [0, 512], sizes = [8, 256], strides = [1, 1]} : vector<8x1024xf32> to vector<8x256xf32>
    %234 = math.tanh %233 : vector<8x256xf32>
    %235 = vector.extract_strided_slice %220 {offsets = [0, 768], sizes = [8, 256], strides = [1, 1]} : vector<8x1024xf32> to vector<8x256xf32>
    %236 = arith.negf %235 : vector<8x256xf32>
    %237 = math.exp %236 : vector<8x256xf32>
    %cst_65 = arith.constant 1.000000e+00 : f32
    %238 = vector.broadcast %cst_65 : f32 to vector<8x256xf32>
    %239 = arith.addf %238, %237 : vector<8x256xf32>
    %240 = arith.divf %238, %239 : vector<8x256xf32>
    %241 = arith.mulf %232, %193 : vector<8x256xf32>
    %242 = arith.mulf %226, %234 : vector<8x256xf32>
    %243 = arith.addf %241, %242 : vector<8x256xf32>
    %244 = math.tanh %243 : vector<8x256xf32>
    %245 = arith.mulf %240, %244 : vector<8x256xf32>
    %246 = arith.truncf %245 : vector<8x256xf32> to vector<8x256xbf16>
    %cst_66 = arith.constant dense<0.000000e+00> : vector<8x128xf32>
    %247 = tpu.matmul %246, %9, %cst_66 {dimension_numbers = #tpu.dot_dimension_numbers<[1], [0], [0], [1], [0, 0, 1, 1], [], []>} : vector<8x256xbf16>, vector<256x128xbf16>, vector<8x128xf32> -> vector<8x128xf32>
    %248 = arith.addf %247, %15 : vector<8x128xf32>
    %249 = arith.index_cast %c4_i32 : i32 to index
    %c0_67 = arith.constant 0 : index
    %c0_68 = arith.constant 0 : index
    %250 = vector.load %arg9[%249, %c0_67, %c0_68] : memref<5x8x128xf32, #tpu.memory_space<vmem>>, vector<1x8x128xf32>
    %251 = vector.shape_cast %250 : vector<1x8x128xf32> to vector<8x128xf32>
    %252 = vector.shape_cast %248 : vector<8x128xf32> to vector<1x8x128xf32>
    tpu.vector_store %arg9[%249, %c0_67, %c0_68], %252 {strides = array<i32>} : memref<5x8x128xf32, #tpu.memory_space<vmem>>, vector<1x8x128xf32>,
    %c4_i32_69 = arith.constant 4 : i32
    return
  }
}

</mosaic_0001>

<bundles_post_ra>
// kernel: rnn_forward.1
= control target key start
LH: loop header
LB: loop body
LE: loop exit
PB: predicated region body
PF: predicated region fallthrough
CT: control target
= control target key end

     0   :  { %s7550_s2 = inlined_call_operand.vmem [shape: bf16[512,256], index: 2, kind: input, shape index: {}]   ;;  %s7551_s0 = inlined_call_operand.vmem [shape: bf16[8,512], index: 0, kind: input, shape index: {}]   ;;  %s7552_s4 = inlined_call_operand.vmem [shape: bf16[256,1024], index: 4, kind: input, shape index: {}]   ;;  %s7553_s3 = inlined_call_operand.vmem [shape: f32[1,256], index: 3, kind: input, shape index: {}]   ;;  %s7554_s5 = inlined_call_operand.vmem [shape: f32[1,1024], index: 5, kind: input, shape index: {}]   ;;  %s7555_s1 = inlined_call_operand.vmem [shape: f32[8,1024], index: 1, kind: input, shape index: {}]   ;;  %s7556_s7 = inlined_call_operand.vmem [shape: bf16[256,128], index: 7, kind: input, shape index: {}]   ;;  %s7557_s8 = inlined_call_operand.vmem [shape: f32[1,128], index: 8, kind: input, shape index: {}]   ;;  %s7558_s9 = inlined_call_operand.vmem [shape: f32[5,8,128], index: 9, kind: output, shape index: {}]   ;;  %s7559_s6 = inlined_call_operand.vmem [shape: bf16[128,1024], index: 6, kind: input, shape index: {}]  }
   0x1   :  { %v4408_v0 = vld [vmem:[%s7550_s2 + $0x4] ss:$8 sps:$4 sm:$0xff]   ;;  %v4410_v1 = vld [vmem:[%s7550_s2] ss:$8 sps:$4 sm:$0xff]   ;;  %v4411_v2 = vld [vmem:[%s7550_s2 + $0x14] ss:$8 sps:$4 sm:$0xff]  }
   0x2   :  { %445 = vmatprep.subr.bf16.mxu0 %v4408_v0  ;;  %v4413_v3 = vld [vmem:[%s7550_s2 + $0x10] ss:$8 sps:$4 sm:$0xff]   ;;  %v4414_v4 = vld [vmem:[%s7550_s2 + $0x24] ss:$8 sps:$4 sm:$0xff]   ;;  %v4416_v5 = vld [vmem:[%s7550_s2 + $0x20] ss:$8 sps:$4 sm:$0xff]  }
   0x3   :  { %446 = vmatpush1.bf16.msra.mxu0 %v4410_v1  ;;  %v4417_v6 = vld [vmem:[%s7550_s2 + $0x34] ss:$8 sps:$4 sm:$0xff]   ;;  %v4419_v7 = vld [vmem:[%s7550_s2 + $0x30] ss:$8 sps:$4 sm:$0xff]   ;;  %v4420_v8 = vld [vmem:[%s7550_s2 + $0x44] ss:$8 sps:$4 sm:$0xff]  }
   0x4   :  { %447 = vmatprep.subr.bf16.mxu0 %v4411_v2  ;;  %v4422_v9 = vld [vmem:[%s7550_s2 + $0x40] ss:$8 sps:$4 sm:$0xff]   ;;  %v4423_v10 = vld [vmem:[%s7550_s2 + $0x54] ss:$8 sps:$4 sm:$0xff]   ;;  %v4425_v11 = vld [vmem:[%s7550_s2 + $0x50] ss:$8 sps:$4 sm:$0xff]  }
   0x5   :  { %v4426_v12 = vld [vmem:[%s7550_s2 + $0x64] ss:$8 sps:$4 sm:$0xff]   ;;  %v4428_v15 = vld [vmem:[%s7550_s2 + $0x60] ss:$8 sps:$4 sm:$0xff]   ;;  %v4429_v16 = vld [vmem:[%s7550_s2 + $0x74] ss:$8 sps:$4 sm:$0xff]  }
   0x6   :  { %v4812_v13 = vld [vmem:[%s7551_s0] sm:$0xff]  ;;  %v4431_v17 = vld [vmem:[%s7550_s2 + $0x70] ss:$8 sps:$4 sm:$0xff]   ;;  %v4435_v20 = vld [vmem:[%s7550_s2 + $0x94] ss:$8 sps:$4 sm:$0xff]  }
   0x7   :  { %448 = vmatpush1.bf16.msra.mxu0 %v4413_v3  ;;  %v3944_v14 = vcombine.high %v4812_v13, %v4812_v13  ;;  %v4432_v18 = vld [vmem:[%s7550_s2 + $0x84] ss:$8 sps:$4 sm:$0xff]   ;;  %v4434_v19 = vld [vmem:[%s7550_s2 + $0x80] ss:$8 sps:$4 sm:$0xff]   ;;  %v4437_v21 = vld [vmem:[%s7550_s2 + $0x90] ss:$8 sps:$4 sm:$0xff]   ;;  %v3943_v59 = vcombine.low %v4812_v13, %v4812_v13 }
   0x8   :  { %449 = vmatprep.subr.bf16.mxu0 %v4414_v4  ;;  %v4438_v22 = vld [vmem:[%s7550_s2 + $0xa4] ss:$8 sps:$4 sm:$0xff]   ;;  %v4440_v23 = vld [vmem:[%s7550_s2 + $0xa0] ss:$8 sps:$4 sm:$0xff]   ;;  %v4441_v24 = vld [vmem:[%s7550_s2 + $0xb4] ss:$8 sps:$4 sm:$0xff]  }
   0x9   :  { %477 = vmatprep.mubr.bf16.mxu0 %v3944_v14  ;;  %v4443_v25 = vld [vmem:[%s7550_s2 + $0xb0] ss:$8 sps:$4 sm:$0xff]   ;;  %v527_v26 = vld [vmem:[%s7552_s4] sm:$0xff]  ;;  %v4447_v38 = vld [vmem:[%s7550_s2 + $0xd4] ss:$8 sps:$4 sm:$0xff]  }
   0xa   :  { %v531_v27 = vld [vmem:[%s7552_s4 + $0x20] sm:$0xff]  ;;  %v4449_v42 = vld [vmem:[%s7550_s2 + $0xd0] ss:$8 sps:$4 sm:$0xff]   ;;  %v4453_v50 = vld [vmem:[%s7550_s2 + $0xf4] ss:$8 sps:$4 sm:$0xff]  }
   0xb   :  { %450 = vmatpush1.bf16.msra.mxu0 %v4416_v5  ;;  %v4444_v28 = vld [vmem:[%s7550_s2 + $0xc4] ss:$8 sps:$4 sm:$0xff]   ;;  %v4858_v29 = vcombine.high %v527_v26, %v531_v27  ;;  %v4860_v30 = vcombine.low %v527_v26, %v531_v27  ;;  %v4446_v36 = vld [vmem:[%s7550_s2 + $0xc0] ss:$8 sps:$4 sm:$0xff]   ;;  %v4455_v54 = vld [vmem:[%s7550_s2 + $0xf0] ss:$8 sps:$4 sm:$0xff]  }
   0xc   :  { %451 = vmatprep.subr.bf16.mxu0 %v4417_v6  ;;  %v535_v31 = vld [vmem:[%s7552_s4 + $0x40] sm:$0xff]  ;;  %v4940_v56 = vld [vmem:[%s7551_s0 + $0x8] sm:$0xff]  ;;  %v4464_v0 = vld [vmem:[%s7550_s2 + $0x114] ss:$8 sps:$4 sm:$0xff]  }
   0xd   :  { %7961 = vst [vmem:[#allocation2_spill] sm:$0xff] %v4858_v29  ;;  %7962 = vst [vmem:[#allocation3_spill] sm:$0xff] %v4860_v30  ;;  %v539_v32 = vld [vmem:[%s7552_s4 + $0x60] sm:$0xff]  ;;  %1444 = vmatprep.subr.bf16.mxu1 %v4858_v29  ;;  %v3946_v63 = vcombine.high %v4940_v56, %v4940_v56  ;;  %v4462_v5 = vld [vmem:[%s7550_s2 + $0x110] ss:$8 sps:$4 sm:$0xff]  }
   0xe   :  { %v4869_v33 = vcombine.high %v535_v31, %v539_v32  ;;  %v543_v34 = vld [vmem:[%s7552_s4 + $0x80] sm:$0xff]  ;;  %1445 = vmatpush1.bf16.msra.mxu1 %v4860_v30  ;;  %v4881_v37 = vcombine.low %v535_v31, %v539_v32  ;;  %v4474_v31 = vld [vmem:[%s7550_s2 + $0x150] ss:$8 sps:$4 sm:$0xff]  }
   0xf   :  { %452 = vmatpush1.bf16.msra.mxu0 %v4419_v7  ;;  %v547_v35 = vld [vmem:[%s7552_s4 + $0xa0] sm:$0xff] }
  0x10   :  { %453 = vmatprep.subr.bf16.mxu0 %v4420_v8  ;;  %7963 = vst [vmem:[#allocation4_spill] sm:$0xff] %v4869_v33  ;;  %7964 = vst [vmem:[#allocation5_spill] sm:$0xff] %v4881_v37  ;;  %1446 = vmatprep.subr.bf16.mxu1 %v4869_v33  ;;  %v4887_v39 = vcombine.high %v543_v34, %v547_v35  ;;  %v551_v40 = vld [vmem:[%s7552_s4 + $0xc0] sm:$0xff]  ;;  %v4899_v43 = vcombine.low %v543_v34, %v547_v35 }
  0x11   :  { %v555_v41 = vld [vmem:[%s7552_s4 + $0xe0] sm:$0xff] }
  0x12   :  { %7965 = vst [vmem:[#allocation6_spill] sm:$0xff] %v4887_v39  ;;  %1447 = vmatpush1.bf16.msra.mxu1 %v4881_v37  ;;  %7966 = vst [vmem:[#allocation7_spill] sm:$0xff] %v4899_v43  ;;  %v4450_v44 = vld [vmem:[%s7550_s2 + $0xe4] ss:$8 sps:$4 sm:$0xff]   ;;  %v4905_v45 = vcombine.high %v551_v40, %v555_v41  ;;  %v4452_v48 = vld [vmem:[%s7550_s2 + $0xe0] ss:$8 sps:$4 sm:$0xff]   ;;  %v4917_v49 = vcombine.low %v551_v40, %v555_v41 }
  0x13   :  { %454 = vmatpush1.bf16.msra.mxu0 %v4422_v9  ;;  %1448 = vmatprep.subr.bf16.mxu1 %v4887_v39  ;;  %v559_v46 = vld [vmem:[%s7552_s4 + $0x100] sm:$0xff]  ;;  %v4482_v41 = vld [vmem:[%s7550_s2 + $0x174] ss:$8 sps:$4 sm:$0xff]  }
  0x14   :  { %455 = vmatprep.subr.bf16.mxu0 %v4423_v10  ;;  %7967 = vst [vmem:[#allocation8_spill] sm:$0xff] %v4905_v45  ;;  %v563_v47 = vld [vmem:[%s7552_s4 + $0x120] sm:$0xff]  ;;  %7968 = vst [vmem:[#allocation9_spill] sm:$0xff] %v4917_v49 }
  0x15   :  { %v4923_v51 = vcombine.high %v559_v46, %v563_v47  ;;  %v567_v52 = vld [vmem:[%s7552_s4 + $0x140] sm:$0xff]  ;;  %v4935_v55 = vcombine.low %v559_v46, %v563_v47 }
  0x16   :  { %1449 = vmatpush1.bf16.msra.mxu1 %v4899_v43  ;;  %v571_v53 = vld [vmem:[%s7552_s4 + $0x160] sm:$0xff] }
  0x17   :  { %456 = vmatpush1.bf16.msra.mxu0 %v4425_v11  ;;  %1450 = vmatprep.subr.bf16.mxu1 %v4905_v45  ;;  %7969 = vst [vmem:[#allocation10_spill] sm:$0xff] %v4923_v51  ;;  %7970 = vst [vmem:[#allocation11_spill] sm:$0xff] %v4935_v55  ;;  %v4461_v57 = vld [vmem:[%s7550_s2 + $0x104] ss:$8 sps:$4 sm:$0xff]   ;;  %v4946_v58 = vcombine.high %v567_v52, %v571_v53  ;;  %v4459_v62 = vld [vmem:[%s7550_s2 + $0x100] ss:$8 sps:$4 sm:$0xff]   ;;  %v4966_v1 = vcombine.low %v567_v52, %v571_v53 }
  0x18   :  { %457 = vmatprep.subr.bf16.mxu0 %v4426_v12  ;;  %v575_v60 = vld [vmem:[%s7552_s4 + $0x180] sm:$0xff]  ;;  %v4470_v12 = vld [vmem:[%s7550_s2 + $0x134] ss:$8 sps:$4 sm:$0xff]  }
  0x19   :  { %7971 = vst [vmem:[#allocation12_spill] sm:$0xff] %v4946_v58  ;;  %v579_v61 = vld [vmem:[%s7552_s4 + $0x1a0] sm:$0xff]  ;;  %7972 = vst [vmem:[#allocation13_spill] sm:$0xff] %v4966_v1 }
  0x1a   :  { %1451 = vmatpush1.bf16.msra.mxu1 %v4917_v49  ;;  %v4968_v2 = vcombine.high %v575_v60, %v579_v61  ;;  %v583_v3 = vld [vmem:[%s7552_s4 + $0x1c0] sm:$0xff]  ;;  %v4983_v7 = vcombine.low %v575_v60, %v579_v61  ;;  %v4488_v60 = vld [vmem:[%s7550_s2 + $0x194] ss:$8 sps:$4 sm:$0xff]  }
  0x1b   :  { %458 = vmatpush1.bf16.msra.mxu0 %v4428_v15  ;;  %1452 = vmatprep.subr.bf16.mxu1 %v4923_v51  ;;  %v587_v4 = vld [vmem:[%s7552_s4 + $0x1e0] sm:$0xff] }
  0x1c   :  { %459 = vmatprep.subr.bf16.mxu0 %v4429_v16  ;;  %7973 = vst [vmem:[#allocation14_spill] sm:$0xff] %v4968_v2  ;;  %v4467_v6 = vld [vmem:[%s7550_s2 + $0x124] ss:$8 sps:$4 sm:$0xff]   ;;  %7974 = vst [vmem:[#allocation15_spill] sm:$0xff] %v4983_v7  ;;  %v4986_v8 = vcombine.high %v583_v3, %v587_v4  ;;  %v4465_v11 = vld [vmem:[%s7550_s2 + $0x120] ss:$8 sps:$4 sm:$0xff]   ;;  %v5001_v13 = vcombine.low %v583_v3, %v587_v4 }
  0x1d   :  { %v591_v9 = vld [vmem:[%s7552_s4 + $0x200] sm:$0xff] }
  0x1e   :  { %1453 = vmatpush1.bf16.msra.mxu1 %v4935_v55  ;;  %7975 = vst [vmem:[#allocation16_spill] sm:$0xff] %v4986_v8  ;;  %v595_v10 = vld [vmem:[%s7552_s4 + $0x220] sm:$0xff]  ;;  %7976 = vst [vmem:[#allocation17_spill] sm:$0xff] %v5001_v13 }
  0x1f   :  { %460 = vmatpush1.bf16.msra.mxu0 %v4431_v17  ;;  %1454 = vmatprep.subr.bf16.mxu1 %v4946_v58  ;;  %v5004_v14 = vcombine.high %v591_v9, %v595_v10  ;;  %v599_v15 = vld [vmem:[%s7552_s4 + $0x240] sm:$0xff]  ;;  %v4468_v17 = vld [vmem:[%s7550_s2 + $0x130] ss:$8 sps:$4 sm:$0xff]  }
  0x20   :  { %461 = vmatprep.subr.bf16.mxu0 %v4432_v18  ;;  %v603_v16 = vld [vmem:[%s7552_s4 + $0x260] sm:$0xff] }
  0x21   :  { %7977 = vst [vmem:[#allocation18_spill] sm:$0xff] %v5004_v14  ;;  %v4473_v18 = vld [vmem:[%s7550_s2 + $0x144] ss:$8 sps:$4 sm:$0xff]   ;;  %v4477_v40 = vld [vmem:[%s7550_s2 + $0x160] ss:$8 sps:$4 sm:$0xff]  }
  0x22   :  { %1455 = vmatpush1.bf16.msra.mxu1 %v4966_v1  ;;  %v615_v27 = vld [vmem:[%s7552_s4 + $0x2c0] sm:$0xff] }
  0x23   :  { %462 = vmatpush1.bf16.msra.mxu0 %v4434_v19  ;;  %1456 = vmatprep.subr.bf16.mxu1 %v4968_v2  ;;  %v5019_v19 = vcombine.low %v591_v9, %v595_v10  ;;  %v4479_v32 = vld [vmem:[%s7550_s2 + $0x164] ss:$8 sps:$4 sm:$0xff]   ;;  %v4489_v4 = vld [vmem:[%s7550_s2 + $0x1a0] ss:$8 sps:$4 sm:$0xff]  }
  0x24   :  { %463 = vmatprep.subr.bf16.mxu0 %v4435_v20  ;;  %v5022_v20 = vcombine.high %v599_v15, %v603_v16  ;;  %v631_v46 = vld [vmem:[%s7552_s4 + $0x340] sm:$0xff] }
  0x25   :  { %7978 = vst [vmem:[#allocation19_spill] sm:$0xff] %v5019_v19  ;;  %v635_v47 = vld [vmem:[%s7552_s4 + $0x360] sm:$0xff] }
  0x26   :  { %1457 = vmatpush1.bf16.msra.mxu1 %v4983_v7  ;;  %7979 = vst [vmem:[#allocation20_spill] sm:$0xff] %v5022_v20  ;;  %v5094_v53 = vcombine.high %v631_v46, %v635_v47  ;;  %v5109_v61 = vcombine.low %v631_v46, %v635_v47  ;;  %v4497_v9 = vld [vmem:[%s7550_s2 + $0x1c4] ss:$8 sps:$4 sm:$0xff]   ;;  %v4495_v10 = vld [vmem:[%s7550_s2 + $0x1c0] ss:$8 sps:$4 sm:$0xff]   ;;  %v557_v46 = vld [vmem:[%s7552_s4 + $0xf0] sm:$0xff] }
  0x27   :  { %464 = vmatpush1.bf16.msra.mxu0 %v4437_v21  ;;  %1458 = vmatprep.subr.bf16.mxu1 %v4986_v8  ;;  %v607_v21 = vld [vmem:[%s7552_s4 + $0x280] sm:$0xff] }
  0x28   :  { %465 = vmatprep.subr.bf16.mxu0 %v4438_v22  ;;  %v611_v22 = vld [vmem:[%s7552_s4 + $0x2a0] sm:$0xff]  ;;  %7987 = vst [vmem:[#allocation28_spill] sm:$0xff] %v5094_v53  ;;  %7988 = vst [vmem:[#allocation29_spill] sm:$0xff] %v5109_v61 }
  0x29   :  { %v5040_v26 = vcombine.high %v607_v21, %v611_v22  ;;  %v5055_v34 = vcombine.low %v607_v21, %v611_v22  ;;  %v533_v21 = vld [vmem:[%s7552_s4 + $0x30] sm:$0xff] }
  0x2a   :  { %1459 = vmatpush1.bf16.msra.mxu1 %v5001_v13  ;;  %v4504_v22 = vld [vmem:[%s7550_s2 + $0x1f0] ss:$8 sps:$4 sm:$0xff]  }
  0x2b   :  { %466 = vmatpush1.bf16.msra.mxu0 %v4440_v23  ;;  %1460 = vmatprep.subr.bf16.mxu1 %v5004_v14  ;;  %v4471_v23 = vld [vmem:[%s7550_s2 + $0x140] ss:$8 sps:$4 sm:$0xff]   ;;  %7981 = vst [vmem:[#allocation22_spill] sm:$0xff] %v5040_v26  ;;  %7982 = vst [vmem:[#allocation23_spill] sm:$0xff] %v5055_v34 }
  0x2c   :  { %467 = vmatprep.subr.bf16.mxu0 %v4441_v24  ;;  %v4476_v24 = vld [vmem:[%s7550_s2 + $0x154] ss:$8 sps:$4 sm:$0xff]  }
  0x2e   :  { %1461 = vmatpush1.bf16.msra.mxu1 %v5019_v19 }
  0x2f   :  { %468 = vmatpush1.bf16.msra.mxu0 %v4443_v25  ;;  %v5037_v25 = vcombine.low %v599_v15, %v603_v16  ;;  %1462 = vmatprep.subr.bf16.mxu1 %v5022_v20  ;;  %v4503_v15 = vld [vmem:[%s7550_s2 + $0x1e4] ss:$8 sps:$4 sm:$0xff]   ;;  %v4501_v16 = vld [vmem:[%s7550_s2 + $0x1e0] ss:$8 sps:$4 sm:$0xff]  }
  0x30   :  { %469 = vmatprep.subr.bf16.mxu0 %v4444_v28  ;;  %v619_v28 = vld [vmem:[%s7552_s4 + $0x2e0] sm:$0xff] }
  0x31   :  { %7980 = vst [vmem:[#allocation21_spill] sm:$0xff] %v5037_v25  ;;  %v5058_v35 = vcombine.high %v615_v27, %v619_v28 }
  0x32   :  { %1463 = vmatpush1.bf16.msra.mxu1 %v5037_v25 }
  0x33   :  { %470 = vmatpush1.bf16.msra.mxu0 %v4446_v36  ;;  %1464 = vmatprep.subr.bf16.mxu1 %v5040_v26  ;;  %7983 = vst [vmem:[#allocation24_spill] sm:$0xff] %v5058_v35  ;;  %v623_v36 = vld [vmem:[%s7552_s4 + $0x300] sm:$0xff] }
  0x34   :  { %471 = vmatprep.subr.bf16.mxu0 %v4447_v38  ;;  %v627_v38 = vld [vmem:[%s7552_s4 + $0x320] sm:$0xff] }
  0x35   :  { %v5091_v52 = vcombine.low %v623_v36, %v627_v38 }
  0x36   :  { %1465 = vmatpush1.bf16.msra.mxu1 %v5055_v34 }
  0x37   :  { %472 = vmatpush1.bf16.msra.mxu0 %v4449_v42  ;;  %v5073_v42 = vcombine.low %v615_v27, %v619_v28  ;;  %1466 = vmatprep.subr.bf16.mxu1 %v5058_v35  ;;  %7986 = vst [vmem:[#allocation27_spill] sm:$0xff] %v5091_v52  ;;  %v541_v27 = vld [vmem:[%s7552_s4 + $0x70] sm:$0xff]  ;;  %v3945_v28 = vcombine.low %v4940_v56, %v4940_v56 }
  0x38   :  { %473 = vmatprep.subr.bf16.mxu0 %v4450_v44  ;;  %v5076_v44 = vcombine.high %v623_v36, %v627_v38  ;;  %v545_v36 = vld [vmem:[%s7552_s4 + $0x90] sm:$0xff] }
  0x39   :  { %7984 = vst [vmem:[#allocation25_spill] sm:$0xff] %v5073_v42  ;;  %v549_v38 = vld [vmem:[%s7552_s4 + $0xb0] sm:$0xff] }
  0x3a   :  { %7985 = vst [vmem:[#allocation26_spill] sm:$0xff] %v5076_v44  ;;  %1467 = vmatpush1.bf16.msra.mxu1 %v5073_v42  ;;  %v5189_v56 = vcombine.high %v545_v36, %v549_v38  ;;  %v5198_v47 = vcombine.low %v545_v36, %v549_v38  ;;  %v609_v38 = vld [vmem:[%s7552_s4 + $0x290] sm:$0xff] }
  0x3b   :  { %474 = vmatpush1.bf16.msra.mxu0 %v4452_v48  ;;  %v4480_v48 = vld [vmem:[%s7550_s2 + $0x170] ss:$8 sps:$4 sm:$0xff]   ;;  %1468 = vmatprep.subr.bf16.mxu1 %v5076_v44 }
  0x3c   :  { %475 = vmatprep.subr.bf16.mxu0 %v4453_v50  ;;  %v4485_v50 = vld [vmem:[%s7550_s2 + $0x184] ss:$8 sps:$4 sm:$0xff]  }
  0x3e   :  { %1469 = vmatpush1.bf16.msra.mxu1 %v5091_v52 }
  0x3f   :  { %476 = vmatpush1.bf16.msra.mxu0 %v4455_v54  ;;  %v639_v54 = vld [vmem:[%s7552_s4 + $0x380] sm:$0xff]  ;;  %1470 = vmatprep.subr.bf16.mxu1 %v5094_v53 }
  0x40   :  { %486 = vmatprep.subr.bf16.mxu0 %v4461_v57  ;;  %v643_v57 = vld [vmem:[%s7552_s4 + $0x3a0] sm:$0xff] }
  0x41   :  { %v5121_v3 = vcombine.low %v639_v54, %v643_v57 }
  0x42   :  { %478 = vmatmul.mubr.bf16.vlgmr.msra.gmra.mrb[0].mxu0 %v3943_v59  ;;  %v4483_v59 = vld [vmem:[%s7550_s2 + $0x180] ss:$8 sps:$4 sm:$0xff]   ;;  %1471 = vmatpush1.bf16.msra.mxu1 %v5109_v61 }
  0x43   :  { %487 = vmatpush1.bf16.msra.mxu0 %v4459_v62  ;;  %518 = vmatprep.mubr.bf16.mxu0 %v3946_v63  ;;  %v5112_v62 = vcombine.high %v639_v54, %v643_v57  ;;  %v4486_v63 = vld [vmem:[%s7550_s2 + $0x190] ss:$8 sps:$4 sm:$0xff]   ;;  %7990 = vst [vmem:[#allocation31_spill] sm:$0xff] %v5121_v3 }
  0x44   :  { %488 = vmatprep.subr.bf16.mxu0 %v4464_v0  ;;  %v4491_v0 = vld [vmem:[%s7550_s2 + $0x1a4] ss:$8 sps:$4 sm:$0xff]   ;;  %v565_v54 = vld [vmem:[%s7552_s4 + $0x130] sm:$0xff] }
  0x45   :  { %7989 = vst [vmem:[#allocation30_spill] sm:$0xff] %v5112_v62  ;;  %1472 = vmatprep.subr.bf16.mxu1 %v5112_v62 }
  0x46   :  { %1473 = vmatpush1.bf16.msra.mxu1 %v5121_v3 }
  0x47   :  { %489 = vmatpush1.bf16.msra.mxu0 %v4462_v5  ;;  %v4494_v5 = vld [vmem:[%s7550_s2 + $0x1b4] ss:$8 sps:$4 sm:$0xff]  }
  0x48   :  { %490 = vmatprep.subr.bf16.mxu0 %v4467_v6  ;;  %v4492_v6 = vld [vmem:[%s7550_s2 + $0x1b0] ss:$8 sps:$4 sm:$0xff]  }
  0x4b   :  { %491 = vmatpush1.bf16.msra.mxu0 %v4465_v11  ;;  %v4500_v11 = vld [vmem:[%s7550_s2 + $0x1d4] ss:$8 sps:$4 sm:$0xff]  }
  0x4c   :  { %492 = vmatprep.subr.bf16.mxu0 %v4470_v12  ;;  %v4498_v12 = vld [vmem:[%s7550_s2 + $0x1d0] ss:$8 sps:$4 sm:$0xff]  }
  0x4f   :  { %493 = vmatpush1.bf16.msra.mxu0 %v4468_v17  ;;  %v4506_v17 = vld [vmem:[%s7550_s2 + $0x1f4] ss:$8 sps:$4 sm:$0xff]  }
  0x50   :  { %494 = vmatprep.subr.bf16.mxu0 %v4473_v18  ;;  %v529_v18 = vld [vmem:[%s7552_s4 + $0x10] sm:$0xff] }
  0x53   :  { %495 = vmatpush1.bf16.msra.mxu0 %v4471_v23  ;;  %v5164_v23 = vcombine.high %v529_v18, %v533_v21 }
  0x54   :  { %496 = vmatprep.subr.bf16.mxu0 %v4476_v24  ;;  %v537_v24 = vld [vmem:[%s7552_s4 + $0x50] sm:$0xff] }
  0x55   :  { %7991 = vst [vmem:[#allocation32_spill] sm:$0xff] %v5164_v23 }
  0x57   :  { %497 = vmatpush1.bf16.msra.mxu0 %v4474_v31  ;;  %v5174_v31 = vcombine.low %v529_v18, %v533_v21  ;;  %v597_v18 = vld [vmem:[%s7552_s4 + $0x230] sm:$0xff] }
  0x58   :  { %498 = vmatprep.subr.bf16.mxu0 %v4479_v32  ;;  %v5177_v32 = vcombine.high %v537_v24, %v541_v27 }
  0x5b   :  { %499 = vmatpush1.bf16.msra.mxu0 %v4477_v40  ;;  %v5186_v40 = vcombine.low %v537_v24, %v541_v27  ;;  %v601_v24 = vld [vmem:[%s7552_s4 + $0x250] sm:$0xff] }
  0x5c   :  { %500 = vmatprep.subr.bf16.mxu0 %v4482_v41  ;;  %v553_v41 = vld [vmem:[%s7552_s4 + $0xd0] sm:$0xff] }
  0x5d   :  { %v5210_v57 = vcombine.low %v553_v41, %v557_v46  ;;  %v605_v27 = vld [vmem:[%s7552_s4 + $0x270] sm:$0xff] }
  0x5e   :  { %v5273_v36 = vcombine.high %v601_v24, %v605_v27 }
  0x5f   :  { %501 = vmatpush1.bf16.msra.mxu0 %v4480_v48  ;;  %v5201_v48 = vcombine.high %v553_v41, %v557_v46  ;;  %7993 = vst [vmem:[#allocation34_spill] sm:$0xff] %v5210_v57  ;;  %v613_v41 = vld [vmem:[%s7552_s4 + $0x2b0] sm:$0xff]  ;;  %v5282_v46 = vcombine.low %v601_v24, %v605_v27 }
  0x60   :  { %502 = vmatprep.subr.bf16.mxu0 %v4485_v50  ;;  %v561_v50 = vld [vmem:[%s7552_s4 + $0x110] sm:$0xff]  ;;  %8004 = vst [vmem:[#allocation45_spill] sm:$0xff] %v5273_v36 }
  0x61   :  { %7992 = vst [vmem:[#allocation33_spill] sm:$0xff] %v5201_v48  ;;  %8005 = vst [vmem:[#allocation46_spill] sm:$0xff] %v5282_v46  ;;  %v637_v24 = vld [vmem:[%s7552_s4 + $0x370] sm:$0xff] }
  0x63   :  { %503 = vmatpush1.bf16.msra.mxu0 %v4483_v59  ;;  %v5213_v59 = vcombine.high %v561_v50, %v565_v54 }
  0x64   :  { %504 = vmatprep.subr.bf16.mxu0 %v4488_v60  ;;  %v569_v60 = vld [vmem:[%s7552_s4 + $0x150] sm:$0xff] }
  0x65   :  { %7994 = vst [vmem:[#allocation35_spill] sm:$0xff] %v5213_v59 }
  0x67   :  { %505 = vmatpush1.bf16.msra.mxu0 %v4486_v63  ;;  %v573_v63 = vld [vmem:[%s7552_s4 + $0x170] sm:$0xff] }
  0x68   :  { %506 = vmatprep.subr.bf16.mxu0 %v4491_v0  ;;  %v5222_v0 = vcombine.low %v561_v50, %v565_v54  ;;  %v5285_v50 = vcombine.high %v609_v38, %v613_v41  ;;  %v617_v54 = vld [vmem:[%s7552_s4 + $0x2d0] sm:$0xff] }
  0x6a   :  { %7995 = vst [vmem:[#allocation36_spill] sm:$0xff] %v5222_v0  ;;  %8006 = vst [vmem:[#allocation47_spill] sm:$0xff] %v5285_v50 }
  0x6b   :  { %507 = vmatpush1.bf16.msra.mxu0 %v4489_v4  ;;  %v5225_v4 = vcombine.high %v569_v60, %v573_v63 }
  0x6c   :  { %508 = vmatprep.subr.bf16.mxu0 %v4494_v5  ;;  %v577_v5 = vld [vmem:[%s7552_s4 + $0x190] sm:$0xff] }
  0x6d   :  { %7996 = vst [vmem:[#allocation37_spill] sm:$0xff] %v5225_v4 }
  0x6f   :  { %509 = vmatpush1.bf16.msra.mxu0 %v4492_v6  ;;  %v581_v6 = vld [vmem:[%s7552_s4 + $0x1b0] sm:$0xff] }
  0x70   :  { %510 = vmatprep.subr.bf16.mxu0 %v4497_v9  ;;  %v5234_v9 = vcombine.low %v569_v60, %v573_v63  ;;  %v621_v60 = vld [vmem:[%s7552_s4 + $0x2f0] sm:$0xff]  ;;  %v5294_v63 = vcombine.low %v609_v38, %v613_v41 }
  0x71   :  { %v641_v41 = vld [vmem:[%s7552_s4 + $0x390] sm:$0xff] }
  0x72   :  { %7997 = vst [vmem:[#allocation38_spill] sm:$0xff] %v5234_v9  ;;  %8007 = vst [vmem:[#allocation48_spill] sm:$0xff] %v5294_v63 }
  0x73   :  { %511 = vmatpush1.bf16.msra.mxu0 %v4495_v10  ;;  %v5237_v10 = vcombine.high %v577_v5, %v581_v6 }
  0x74   :  { %512 = vmatprep.subr.bf16.mxu0 %v4500_v11  ;;  %v585_v11 = vld [vmem:[%s7552_s4 + $0x1d0] sm:$0xff] }
  0x75   :  { %7998 = vst [vmem:[#allocation39_spill] sm:$0xff] %v5237_v10 }
  0x77   :  { %513 = vmatpush1.bf16.msra.mxu0 %v4498_v12  ;;  %v589_v12 = vld [vmem:[%s7552_s4 + $0x1f0] sm:$0xff] }
  0x78   :  { %514 = vmatprep.subr.bf16.mxu0 %v4503_v15  ;;  %v5246_v15 = vcombine.low %v577_v5, %v581_v6  ;;  %v5258_v21 = vcombine.low %v585_v11, %v589_v12  ;;  %v5297_v5 = vcombine.high %v617_v54, %v621_v60  ;;  %v625_v6 = vld [vmem:[%s7552_s4 + $0x310] sm:$0xff] }
  0x7a   :  { %7999 = vst [vmem:[#allocation40_spill] sm:$0xff] %v5246_v15  ;;  %8001 = vst [vmem:[#allocation42_spill] sm:$0xff] %v5258_v21 }
  0x7b   :  { %515 = vmatpush1.bf16.msra.mxu0 %v4501_v16  ;;  %v5249_v16 = vcombine.high %v585_v11, %v589_v12  ;;  %8008 = vst [vmem:[#allocation49_spill] sm:$0xff] %v5297_v5  ;;  %v629_v11 = vld [vmem:[%s7552_s4 + $0x330] sm:$0xff]  ;;  %v5306_v12 = vcombine.low %v617_v54, %v621_v60 }
  0x7c   :  { %516 = vmatprep.subr.bf16.mxu0 %v4506_v17  ;;  %v593_v17 = vld [vmem:[%s7552_s4 + $0x210] sm:$0xff]  ;;  %v5318_v27 = vcombine.low %v625_v6, %v629_v11 }
  0x7d   :  { %8000 = vst [vmem:[#allocation41_spill] sm:$0xff] %v5249_v16  ;;  %8009 = vst [vmem:[#allocation50_spill] sm:$0xff] %v5306_v12  ;;  %v645_v54 = vld [vmem:[%s7552_s4 + $0x3b0] sm:$0xff] }
  0x7e   :  { %8011 = vst [vmem:[#allocation52_spill] sm:$0xff] %v5318_v27 }
  0x7f   :  { %517 = vmatpush1.bf16.msra.mxu0 %v4504_v22  ;;  %v5261_v22 = vcombine.high %v593_v17, %v597_v18 }
  0x80   :  { %1526 = vmatprep.subr.bf16.mxu0 %v5164_v23 }
  0x81   :  { %8002 = vst [vmem:[#allocation43_spill] sm:$0xff] %v5261_v22 }
  0x82   :  { %519 = vmatmul.mubr.bf16.vlgmr.msra.gmra.mrb[0].mxu0 %v3945_v28  ;;  %v5270_v28 = vcombine.low %v593_v17, %v597_v18  ;;  %v5309_v17 = vcombine.high %v625_v6, %v629_v11  ;;  %v633_v18 = vld [vmem:[%s7552_s4 + $0x350] sm:$0xff]  ;;  %v5333_v6 = vcombine.high %v641_v41, %v645_v54  ;;  %v5337_v11 = vcombine.low %v641_v41, %v645_v54 }
  0x83   :  { %1527 = vmatpush1.bf16.msra.mxu0 %v5174_v31  ;;  %v5321_v38 = vcombine.high %v633_v18, %v637_v24  ;;  %v5330_v60 = vcombine.low %v633_v18, %v637_v24  ;;  %v649_v24 = vld [vmem:[%s7552_s4 + $0x3d0] sm:$0xff] }
  0x84   :  { %1528 = vmatprep.subr.bf16.mxu0 %v5177_v32  ;;  %8003 = vst [vmem:[#allocation44_spill] sm:$0xff] %v5270_v28  ;;  %8010 = vst [vmem:[#allocation51_spill] sm:$0xff] %v5309_v17  ;;  %v653_v41 = vld [vmem:[%s7552_s4 + $0x3f0] sm:$0xff] }
  0x85   :  { %8012 = vst [vmem:[#allocation53_spill] sm:$0xff] %v5321_v38  ;;  %8013 = vst [vmem:[#allocation54_spill] sm:$0xff] %v5330_v60 }
  0x86   :  { %8014 = vst [vmem:[#allocation55_spill] sm:$0xff] %v5333_v6  ;;  %8015 = vst [vmem:[#allocation56_spill] sm:$0xff] %v5337_v11 }
  0x87   :  { %1529 = vmatpush1.bf16.msra.mxu0 %v5186_v40 }
  0x88   :  { %1530 = vmatprep.subr.bf16.mxu0 %v5189_v56 }
  0x8b   :  { %1531 = vmatpush1.bf16.msra.mxu0 %v5198_v47 }
  0x8c   :  { %1532 = vmatprep.subr.bf16.mxu0 %v5201_v48 }
  0x8f   :  { %1533 = vmatpush1.bf16.msra.mxu0 %v5210_v57 }
  0x90   :  { %1534 = vmatprep.subr.bf16.mxu0 %v5213_v59 }
  0x93   :  { %1535 = vmatpush1.bf16.msra.mxu0 %v5222_v0 }
  0x94   :  { %1536 = vmatprep.subr.bf16.mxu0 %v5225_v4  ;;  %v588_v4 = vld [vmem:[%s7552_s4 + $0x1e8] sm:$0xff] }
  0x97   :  { %1537 = vmatpush1.bf16.msra.mxu0 %v5234_v9 }
  0x98   :  { %1538 = vmatprep.subr.bf16.mxu0 %v5237_v10  ;;  %v580_v10 = vld [vmem:[%s7552_s4 + $0x1a8] sm:$0xff] }
  0x9b   :  { %1539 = vmatpush1.bf16.msra.mxu0 %v5246_v15 }
  0x9c   :  { %1540 = vmatprep.subr.bf16.mxu0 %v5249_v16 }
  0x9f   :  { %1541 = vmatpush1.bf16.msra.mxu0 %v5258_v21 }
  0xa0   :  { %1542 = vmatprep.subr.bf16.mxu0 %v5261_v22 }
  0xa3   :  { %1543 = vmatpush1.bf16.msra.mxu0 %v5270_v28  ;;  %v540_v28 = vld [vmem:[%s7552_s4 + $0x68] sm:$0xff] }
  0xa4   :  { %1544 = vmatprep.subr.bf16.mxu0 %v5273_v36  ;;  %v536_v36 = vld [vmem:[%s7552_s4 + $0x48] sm:$0xff] }
  0xa5   :  { %v5397_v16 = vcombine.high %v536_v36, %v540_v28 }
  0xa7   :  { %1545 = vmatpush1.bf16.msra.mxu0 %v5282_v46 }
  0xa8   :  { %1546 = vmatprep.subr.bf16.mxu0 %v5285_v50 }
  0xab   :  { %1547 = vmatpush1.bf16.msra.mxu0 %v5294_v63 }
  0xac   :  { %1548 = vmatprep.subr.bf16.mxu0 %v5297_v5 }
  0xaf   :  { %1549 = vmatpush1.bf16.msra.mxu0 %v5306_v12  ;;  %v99_v12 = vld [vmem:[%s7553_s3] sm:$0x3] }
  0xb0   :  { %1550 = vmatprep.subr.bf16.mxu0 %v5309_v17  ;;  %v647_v17 = vld [vmem:[%s7552_s4 + $0x3c0] sm:$0xff] }
  0xb3   :  { %1551 = vmatpush1.bf16.msra.mxu0 %v5318_v27  ;;  %v651_v27 = vld [vmem:[%s7552_s4 + $0x3e0] sm:$0xff] }
  0xb4   :  { %1552 = vmatprep.subr.bf16.mxu0 %v5321_v38  ;;  %v5346_v18 = vcombine.high %v647_v17, %v651_v27  ;;  %v5354_v54 = vcombine.low %v647_v17, %v651_v27  ;;  %v532_v38 = vld [vmem:[%s7552_s4 + $0x28] sm:$0xff] }
  0xb6   :  { %8016 = vst [vmem:[#allocation57_spill] sm:$0xff] %v5346_v18  ;;  %8017 = vst [vmem:[#allocation58_spill] sm:$0xff] %v5354_v54  ;;  %1474 = vmatprep.subr.bf16.mxu1 %v5346_v18 }
  0xb7   :  { %1553 = vmatpush1.bf16.msra.mxu0 %v5330_v60  ;;  %v5359_v60 = vcombine.low %v649_v24, %v653_v41  ;;  %1475 = vmatpush1.bf16.msra.mxu1 %v5354_v54 }
  0xb8   :  { %1554 = vmatprep.subr.bf16.mxu0 %v5333_v6  ;;  %v5356_v6 = vcombine.high %v649_v24, %v653_v41  ;;  %v7586_v24 = vlaneseq }
  0xb9   :  { %8019 = vst [vmem:[#allocation60_spill] sm:$0xff] %v5359_v60 }
  0xba   :  { %8018 = vst [vmem:[#allocation59_spill] sm:$0xff] %v5356_v6  ;;  %v5376_v41 = vshrl.u32 %v7586_v24, 7 }
  0xbb   :  { %1555 = vmatpush1.bf16.msra.mxu0 %v5337_v11  ;;  %v528_v11 = vld [vmem:[%s7552_s4 + $0x8] sm:$0xff] }
  0xbc   :  { %1556 = vmatprep.subr.bf16.mxu0 %v5356_v6  ;;  %v5370_v17 = vcombine.high %v528_v11, %v532_v38  ;;  %v5372_v27 = vcombine.low %v528_v11, %v532_v38  ;;  %v7595_v6 = vsub.s32 0, %v5376_v41  ;;  %v7598_v5 = vsub.s32 1, %v5376_v41 }
  0xbe   :  { %8020 = vst [vmem:[#allocation61_spill] sm:$0xff] %v5370_v17  ;;  %1485 = vmatprep.subr.bf16.mxu1 %v5370_v17  ;;  %v108_v38 = vrot.slane %v99_v12, %v7598_v5  ;;  %v572_v5 = vld [vmem:[%s7552_s4 + $0x168] sm:$0xff] }
  0xbf   :  { %1557 = vmatpush1.bf16.msra.mxu0 %v5359_v60  ;;  %v104_v60 = vrot.slane %v99_v12, %v7595_v6  ;;  %v548_v12 = vld [vmem:[%s7552_s4 + $0xa8] sm:$0xff] }
 0x155   :  { %v520_v11 = vpop.f32.mrb[0].mxu0 }
 0x156   :  { %v4400_v63 = vadd.f32 %v520_v11, %v104_v60  ;;  %v522_v50 = vpop.f32.mrb[1].mxu0  ;;  %v556_v60 = vld [vmem:[%s7552_s4 + $0xe8] sm:$0xff] }
 0x157   :  { %v4401_v46 = vadd.f32 %v522_v50, %v108_v38  ;;  %v524_v24 = vpop.f32.mrb[2].mxu0  ;;  %v544_v50 = vld [vmem:[%s7552_s4 + $0x88] sm:$0xff] }
 0x158   :  { %v525_v22 = vpop.f32.mrb[3].mxu0  ;;  %v5395_v6 = vpack.c.bf16 %v4400_v63, %v4400_v63  ;;  %v552_v63 = vld [vmem:[%s7552_s4 + $0xc8] sm:$0xff]  ;;  %v5423_v24 = vcombine.low %v544_v50, %v548_v12 }
 0x159   :  { %v5393_v21 = vpack.c.bf16 %v4401_v46, %v4401_v46  ;;  %v5411_v22 = vcombine.low %v536_v36, %v540_v28  ;;  %v5414_v46 = vcombine.high %v544_v50, %v548_v12  ;;  %v5426_v28 = vcombine.high %v552_v63, %v556_v60  ;;  %v560_v36 = vld [vmem:[%s7552_s4 + $0x108] sm:$0xff] }
 0x15a   :  { %v564_v38 = vld [vmem:[%s7552_s4 + $0x128] sm:$0xff]  ;;  %v5435_v11 = vcombine.low %v552_v63, %v556_v60 }
 0x15b   :  { %1476 = vmatprep.mubr.bf16.mxu1 %v5393_v21  ;;  %1558 = vmatprep.mubr.bf16.mxu0 %v5393_v21  ;;  %v5438_v50 = vcombine.high %v560_v36, %v564_v38  ;;  %v568_v12 = vld [vmem:[%s7552_s4 + $0x148] sm:$0xff]  ;;  %v5447_v15 = vcombine.low %v560_v36, %v564_v38 }
 0x15c   :  { %1477 = vmatmul.mubr.bf16.vlgmr.msra.gmra.mrb[0].mxu1 %v5395_v6  ;;  %1559 = vmatmul.mubr.bf16.vlgmr.msra.gmra.mrb[4].mxu0 %v5395_v6  ;;  %8021 = vst [vmem:[#allocation62_spill] sm:$0xff] %v5435_v11  ;;  %v5450_v63 = vcombine.high %v568_v12, %v572_v5  ;;  %v576_v60 = vld [vmem:[%s7552_s4 + $0x188] sm:$0xff]  ;;  %v5459_v9 = vcombine.low %v568_v12, %v572_v5 }
 0x15d   :  { %1486 = vmatpush1.bf16.msra.mxu1 %v5372_v27  ;;  %1517 = vmatprep.mubr.bf16.mxu1 %v5393_v21  ;;  %8022 = vst [vmem:[#allocation63_spill] sm:$0xff] %v5438_v50  ;;  %8023 = vst [vmem:[#allocation64_spill] sm:$0xff] %v5447_v15  ;;  %v5462_v36 = vcombine.high %v576_v60, %v580_v10  ;;  %v584_v38 = vld [vmem:[%s7552_s4 + $0x1c8] sm:$0xff]  ;;  %v5471_v0 = vcombine.low %v576_v60, %v580_v10 }
 0x15e   :  { %1487 = vmatprep.subr.bf16.mxu1 %v5397_v16  ;;  %8024 = vst [vmem:[#allocation65_spill] sm:$0xff] %v5450_v63  ;;  %8025 = vst [vmem:[#allocation66_spill] sm:$0xff] %v5459_v9  ;;  %v5474_v5 = vcombine.high %v584_v38, %v588_v4  ;;  %v592_v12 = vld [vmem:[%s7552_s4 + $0x208] sm:$0xff] }
 0x15f   :  { %8026 = vst [vmem:[#allocation67_spill] sm:$0xff] %v5462_v36  ;;  %8027 = vst [vmem:[#allocation68_spill] sm:$0xff] %v5471_v0  ;;  %v600_v60 = vld [vmem:[%s7552_s4 + $0x248] sm:$0xff] }
 0x160   :  { %8028 = vst [vmem:[#allocation69_spill] sm:$0xff] %v5474_v5 }
 0x161   :  { %1488 = vmatpush1.bf16.msra.mxu1 %v5411_v22 }
 0x162   :  { %1489 = vmatprep.subr.bf16.mxu1 %v5414_v46 }
 0x165   :  { %1490 = vmatpush1.bf16.msra.mxu1 %v5423_v24 }
 0x166   :  { %1491 = vmatprep.subr.bf16.mxu1 %v5426_v28 }
 0x169   :  { %1492 = vmatpush1.bf16.msra.mxu1 %v5435_v11 }
 0x16a   :  { %1493 = vmatprep.subr.bf16.mxu1 %v5438_v50 }
 0x16d   :  { %1494 = vmatpush1.bf16.msra.mxu1 %v5447_v15  ;;  %v5483_v15 = vcombine.low %v584_v38, %v588_v4  ;;  %v608_v38 = vld [vmem:[%s7552_s4 + $0x288] sm:$0xff] }
 0x16e   :  { %1495 = vmatprep.subr.bf16.mxu1 %v5450_v63  ;;  %v596_v63 = vld [vmem:[%s7552_s4 + $0x228] sm:$0xff] }
 0x16f   :  { %8029 = vst [vmem:[#allocation70_spill] sm:$0xff] %v5483_v15  ;;  %v5486_v10 = vcombine.high %v592_v12, %v596_v63 }
 0x171   :  { %1496 = vmatpush1.bf16.msra.mxu1 %v5459_v9  ;;  %8030 = vst [vmem:[#allocation71_spill] sm:$0xff] %v5486_v10  ;;  %v5495_v9 = vcombine.low %v592_v12, %v596_v63  ;;  %v616_v12 = vld [vmem:[%s7552_s4 + $0x2c8] sm:$0xff] }
 0x172   :  { %1497 = vmatprep.subr.bf16.mxu1 %v5462_v36  ;;  %v604_v36 = vld [vmem:[%s7552_s4 + $0x268] sm:$0xff] }
 0x173   :  { %8031 = vst [vmem:[#allocation72_spill] sm:$0xff] %v5495_v9  ;;  %v5498_v4 = vcombine.high %v600_v60, %v604_v36 }
 0x175   :  { %1498 = vmatpush1.bf16.msra.mxu1 %v5471_v0  ;;  %8032 = vst [vmem:[#allocation73_spill] sm:$0xff] %v5498_v4  ;;  %v5507_v0 = vcombine.low %v600_v60, %v604_v36  ;;  %v624_v60 = vld [vmem:[%s7552_s4 + $0x308] sm:$0xff] }
 0x176   :  { %1499 = vmatprep.subr.bf16.mxu1 %v5474_v5  ;;  %v612_v5 = vld [vmem:[%s7552_s4 + $0x2a8] sm:$0xff] }
 0x177   :  { %8033 = vst [vmem:[#allocation74_spill] sm:$0xff] %v5507_v0  ;;  %v5510_v63 = vcombine.high %v608_v38, %v612_v5 }
 0x179   :  { %1500 = vmatpush1.bf16.msra.mxu1 %v5483_v15  ;;  %8034 = vst [vmem:[#allocation75_spill] sm:$0xff] %v5510_v63  ;;  %v5519_v15 = vcombine.low %v608_v38, %v612_v5  ;;  %v632_v38 = vld [vmem:[%s7552_s4 + $0x348] sm:$0xff] }
 0x17a   :  { %1501 = vmatprep.subr.bf16.mxu1 %v5486_v10  ;;  %v620_v10 = vld [vmem:[%s7552_s4 + $0x2e8] sm:$0xff] }
 0x17b   :  { %8035 = vst [vmem:[#allocation76_spill] sm:$0xff] %v5519_v15  ;;  %v5522_v36 = vcombine.high %v616_v12, %v620_v10 }
 0x17d   :  { %1502 = vmatpush1.bf16.msra.mxu1 %v5495_v9  ;;  %8036 = vst [vmem:[#allocation77_spill] sm:$0xff] %v5522_v36  ;;  %v5531_v9 = vcombine.low %v616_v12, %v620_v10  ;;  %v640_v12 = vld [vmem:[%s7552_s4 + $0x388] sm:$0xff] }
 0x17e   :  { %1503 = vmatprep.subr.bf16.mxu1 %v5498_v4  ;;  %v628_v4 = vld [vmem:[%s7552_s4 + $0x328] sm:$0xff] }
 0x17f   :  { %8037 = vst [vmem:[#allocation78_spill] sm:$0xff] %v5531_v9  ;;  %v5534_v5 = vcombine.high %v624_v60, %v628_v4 }
 0x181   :  { %1504 = vmatpush1.bf16.msra.mxu1 %v5507_v0  ;;  %8038 = vst [vmem:[#allocation79_spill] sm:$0xff] %v5534_v5  ;;  %v5543_v0 = vcombine.low %v624_v60, %v628_v4  ;;  %v648_v60 = vld [vmem:[%s7552_s4 + $0x3c8] sm:$0xff] }
 0x182   :  { %1505 = vmatprep.subr.bf16.mxu1 %v5510_v63  ;;  %v636_v63 = vld [vmem:[%s7552_s4 + $0x368] sm:$0xff] }
 0x183   :  { %8039 = vst [vmem:[#allocation80_spill] sm:$0xff] %v5543_v0  ;;  %v5546_v10 = vcombine.high %v632_v38, %v636_v63 }
 0x185   :  { %1506 = vmatpush1.bf16.msra.mxu1 %v5519_v15  ;;  %8040 = vst [vmem:[#allocation81_spill] sm:$0xff] %v5546_v10  ;;  %v5555_v15 = vcombine.low %v632_v38, %v636_v63  ;;  %v530_v38 = vld [vmem:[%s7552_s4 + $0x18] sm:$0xff] }
 0x186   :  { %1507 = vmatprep.subr.bf16.mxu1 %v5522_v36  ;;  %v644_v36 = vld [vmem:[%s7552_s4 + $0x3a8] sm:$0xff] }
 0x187   :  { %8041 = vst [vmem:[#allocation82_spill] sm:$0xff] %v5555_v15  ;;  %v5558_v4 = vcombine.high %v640_v12, %v644_v36 }
 0x189   :  { %1508 = vmatpush1.bf16.msra.mxu1 %v5531_v9  ;;  %8042 = vst [vmem:[#allocation83_spill] sm:$0xff] %v5558_v4  ;;  %v5567_v9 = vcombine.low %v640_v12, %v644_v36  ;;  %v538_v12 = vld [vmem:[%s7552_s4 + $0x58] sm:$0xff] }
 0x18a   :  { %1509 = vmatprep.subr.bf16.mxu1 %v5534_v5  ;;  %v652_v5 = vld [vmem:[%s7552_s4 + $0x3e8] sm:$0xff] }
 0x18b   :  { %8043 = vst [vmem:[#allocation84_spill] sm:$0xff] %v5567_v9  ;;  %v5570_v63 = vcombine.high %v648_v60, %v652_v5 }
 0x18d   :  { %1510 = vmatpush1.bf16.msra.mxu1 %v5543_v0  ;;  %8044 = vst [vmem:[#allocation85_spill] sm:$0xff] %v5570_v63  ;;  %v5579_v0 = vcombine.low %v648_v60, %v652_v5  ;;  %v546_v60 = vld [vmem:[%s7552_s4 + $0x98] sm:$0xff] }
 0x18e   :  { %1511 = vmatprep.subr.bf16.mxu1 %v5546_v10  ;;  %v534_v10 = vld [vmem:[%s7552_s4 + $0x38] sm:$0xff] }
 0x18f   :  { %8045 = vst [vmem:[#allocation86_spill] sm:$0xff] %v5579_v0  ;;  %v5582_v36 = vcombine.high %v530_v38, %v534_v10 }
 0x191   :  { %1512 = vmatpush1.bf16.msra.mxu1 %v5555_v15  ;;  %8046 = vst [vmem:[#allocation87_spill] sm:$0xff] %v5582_v36  ;;  %v5591_v15 = vcombine.low %v530_v38, %v534_v10 }
 0x192   :  { %1513 = vmatprep.subr.bf16.mxu1 %v5558_v4  ;;  %v542_v4 = vld [vmem:[%s7552_s4 + $0x78] sm:$0xff] }
 0x193   :  { %8047 = vst [vmem:[#allocation88_spill] sm:$0xff] %v5591_v15  ;;  %v5594_v5 = vcombine.high %v538_v12, %v542_v4  ;;  %v5605_v10 = vcombine.low %v538_v12, %v542_v4  ;;  %v562_v4 = vld [vmem:[%s7552_s4 + $0x118] sm:$0xff] }
 0x194   :  { %v566_v12 = vld [vmem:[%s7552_s4 + $0x138] sm:$0xff] }
 0x195   :  { %1514 = vmatpush1.bf16.msra.mxu1 %v5567_v9  ;;  %8048 = vst [vmem:[#allocation89_spill] sm:$0xff] %v5594_v5  ;;  %8049 = vst [vmem:[#allocation90_spill] sm:$0xff] %v5605_v10 }
 0x196   :  { %1515 = vmatprep.subr.bf16.mxu1 %v5570_v63  ;;  %v550_v63 = vld [vmem:[%s7552_s4 + $0xb8] sm:$0xff] }
 0x197   :  { %v5608_v38 = vcombine.high %v546_v60, %v550_v63  ;;  %v5617_v9 = vcombine.low %v546_v60, %v550_v63  ;;  %v5632_v63 = vcombine.high %v562_v4, %v566_v12  ;;  %v570_v60 = vld [vmem:[%s7552_s4 + $0x158] sm:$0xff] }
 0x199   :  { %1516 = vmatpush1.bf16.msra.mxu1 %v5579_v0  ;;  %8050 = vst [vmem:[#allocation91_spill] sm:$0xff] %v5608_v38  ;;  %v558_v0 = vld [vmem:[%s7552_s4 + $0xf8] sm:$0xff]  ;;  %8051 = vst [vmem:[#allocation92_spill] sm:$0xff] %v5617_v9 }
 0x19a   :  { %1567 = vmatprep.subr.bf16.mxu1 %v5582_v36  ;;  %v554_v36 = vld [vmem:[%s7552_s4 + $0xd8] sm:$0xff]  ;;  %8054 = vst [vmem:[#allocation95_spill] sm:$0xff] %v5632_v63 }
 0x19c   :  { %1518 = vmatmul.mubr.bf16.vlgmr.msra.gmra.mrb[4].mxu1 %v5395_v6 }
 0x19d   :  { %1568 = vmatpush1.bf16.msra.mxu1 %v5591_v15  ;;  %1599 = vmatprep.mubr.bf16.mxu1 %v5393_v21  ;;  %v5620_v21 = vcombine.high %v554_v36, %v558_v0 }
 0x19e   :  { %1569 = vmatprep.subr.bf16.mxu1 %v5594_v5  ;;  %v5629_v5 = vcombine.low %v554_v36, %v558_v0  ;;  %v578_v36 = vld [vmem:[%s7552_s4 + $0x198] sm:$0xff] }
 0x19f   :  { %8052 = vst [vmem:[#allocation93_spill] sm:$0xff] %v5620_v21 }
 0x1a0   :  { %8053 = vst [vmem:[#allocation94_spill] sm:$0xff] %v5629_v5 }
 0x1a1   :  { %1570 = vmatpush1.bf16.msra.mxu1 %v5605_v10  ;;  %v5641_v10 = vcombine.low %v562_v4, %v566_v12  ;;  %v586_v12 = vld [vmem:[%s7552_s4 + $0x1d8] sm:$0xff] }
 0x1a2   :  { %1571 = vmatprep.subr.bf16.mxu1 %v5608_v38  ;;  %v574_v38 = vld [vmem:[%s7552_s4 + $0x178] sm:$0xff] }
 0x1a3   :  { %8055 = vst [vmem:[#allocation96_spill] sm:$0xff] %v5641_v10  ;;  %v5644_v0 = vcombine.high %v570_v60, %v574_v38 }
 0x1a5   :  { %1572 = vmatpush1.bf16.msra.mxu1 %v5617_v9  ;;  %8056 = vst [vmem:[#allocation97_spill] sm:$0xff] %v5644_v0  ;;  %v5653_v9 = vcombine.low %v570_v60, %v574_v38  ;;  %v594_v60 = vld [vmem:[%s7552_s4 + $0x218] sm:$0xff] }
 0x1a6   :  { %1573 = vmatprep.subr.bf16.mxu1 %v5620_v21  ;;  %v582_v21 = vld [vmem:[%s7552_s4 + $0x1b8] sm:$0xff] }
 0x1a7   :  { %8057 = vst [vmem:[#allocation98_spill] sm:$0xff] %v5653_v9  ;;  %v5656_v4 = vcombine.high %v578_v36, %v582_v21 }
 0x1a9   :  { %1574 = vmatpush1.bf16.msra.mxu1 %v5629_v5  ;;  %8058 = vst [vmem:[#allocation99_spill] sm:$0xff] %v5656_v4  ;;  %v5665_v5 = vcombine.low %v578_v36, %v582_v21  ;;  %v602_v36 = vld [vmem:[%s7552_s4 + $0x258] sm:$0xff] }
 0x1aa   :  { %1575 = vmatprep.subr.bf16.mxu1 %v5632_v63  ;;  %v590_v63 = vld [vmem:[%s7552_s4 + $0x1f8] sm:$0xff] }
 0x1ab   :  { %8059 = vst [vmem:[#allocation100_spill] sm:$0xff] %v5665_v5  ;;  %v5668_v38 = vcombine.high %v586_v12, %v590_v63 }
 0x1ad   :  { %1576 = vmatpush1.bf16.msra.mxu1 %v5641_v10  ;;  %8060 = vst [vmem:[#allocation101_spill] sm:$0xff] %v5668_v38  ;;  %v5677_v10 = vcombine.low %v586_v12, %v590_v63  ;;  %v610_v12 = vld [vmem:[%s7552_s4 + $0x298] sm:$0xff] }
 0x1ae   :  { %1577 = vmatprep.subr.bf16.mxu1 %v5644_v0  ;;  %v598_v0 = vld [vmem:[%s7552_s4 + $0x238] sm:$0xff] }
 0x1af   :  { %8061 = vst [vmem:[#allocation102_spill] sm:$0xff] %v5677_v10  ;;  %v5680_v21 = vcombine.high %v594_v60, %v598_v0 }
 0x1b1   :  { %1578 = vmatpush1.bf16.msra.mxu1 %v5653_v9  ;;  %8062 = vst [vmem:[#allocation103_spill] sm:$0xff] %v5680_v21  ;;  %v5689_v9 = vcombine.low %v594_v60, %v598_v0  ;;  %v618_v60 = vld [vmem:[%s7552_s4 + $0x2d8] sm:$0xff] }
 0x1b2   :  { %1579 = vmatprep.subr.bf16.mxu1 %v5656_v4  ;;  %v606_v4 = vld [vmem:[%s7552_s4 + $0x278] sm:$0xff] }
 0x1b3   :  { %8063 = vst [vmem:[#allocation104_spill] sm:$0xff] %v5689_v9  ;;  %v5692_v63 = vcombine.high %v602_v36, %v606_v4 }
 0x1b5   :  { %1580 = vmatpush1.bf16.msra.mxu1 %v5665_v5  ;;  %8064 = vst [vmem:[#allocation105_spill] sm:$0xff] %v5692_v63  ;;  %v5701_v5 = vcombine.low %v602_v36, %v606_v4  ;;  %v626_v36 = vld [vmem:[%s7552_s4 + $0x318] sm:$0xff] }
 0x1b6   :  { %1581 = vmatprep.subr.bf16.mxu1 %v5668_v38  ;;  %v614_v38 = vld [vmem:[%s7552_s4 + $0x2b8] sm:$0xff] }
 0x1b7   :  { %8065 = vst [vmem:[#allocation106_spill] sm:$0xff] %v5701_v5  ;;  %v5704_v0 = vcombine.high %v610_v12, %v614_v38 }
 0x1b9   :  { %1582 = vmatpush1.bf16.msra.mxu1 %v5677_v10  ;;  %8066 = vst [vmem:[#allocation107_spill] sm:$0xff] %v5704_v0  ;;  %v5713_v10 = vcombine.low %v610_v12, %v614_v38  ;;  %v634_v12 = vld [vmem:[%s7552_s4 + $0x358] sm:$0xff] }
 0x1ba   :  { %1583 = vmatprep.subr.bf16.mxu1 %v5680_v21  ;;  %v622_v21 = vld [vmem:[%s7552_s4 + $0x2f8] sm:$0xff] }
 0x1bb   :  { %8067 = vst [vmem:[#allocation108_spill] sm:$0xff] %v5713_v10  ;;  %v5716_v4 = vcombine.high %v618_v60, %v622_v21 }
 0x1bd   :  { %1584 = vmatpush1.bf16.msra.mxu1 %v5689_v9  ;;  %8068 = vst [vmem:[#allocation109_spill] sm:$0xff] %v5716_v4  ;;  %v5725_v9 = vcombine.low %v618_v60, %v622_v21  ;;  %v642_v60 = vld [vmem:[%s7552_s4 + $0x398] sm:$0xff] }
 0x1be   :  { %1585 = vmatprep.subr.bf16.mxu1 %v5692_v63  ;;  %v630_v63 = vld [vmem:[%s7552_s4 + $0x338] sm:$0xff] }
 0x1bf   :  { %8069 = vst [vmem:[#allocation110_spill] sm:$0xff] %v5725_v9  ;;  %v5728_v38 = vcombine.high %v626_v36, %v630_v63 }
 0x1c1   :  { %1586 = vmatpush1.bf16.msra.mxu1 %v5701_v5  ;;  %8070 = vst [vmem:[#allocation111_spill] sm:$0xff] %v5728_v38  ;;  %v5737_v5 = vcombine.low %v626_v36, %v630_v63  ;;  %v650_v36 = vld [vmem:[%s7552_s4 + $0x3d8] sm:$0xff] }
 0x1c2   :  { %1587 = vmatprep.subr.bf16.mxu1 %v5704_v0  ;;  %v638_v0 = vld [vmem:[%s7552_s4 + $0x378] sm:$0xff] }
 0x1c3   :  { %8071 = vst [vmem:[#allocation112_spill] sm:$0xff] %v5737_v5  ;;  %v5740_v21 = vcombine.high %v634_v12, %v638_v0 }
 0x1c5   :  { %1588 = vmatpush1.bf16.msra.mxu1 %v5713_v10  ;;  %8072 = vst [vmem:[#allocation113_spill] sm:$0xff] %v5740_v21  ;;  %v5749_v10 = vcombine.low %v634_v12, %v638_v0 }
 0x1c6   :  { %1589 = vmatprep.subr.bf16.mxu1 %v5716_v4  ;;  %v646_v4 = vld [vmem:[%s7552_s4 + $0x3b8] sm:$0xff] }
 0x1c7   :  { %8073 = vst [vmem:[#allocation114_spill] sm:$0xff] %v5749_v10  ;;  %v5752_v63 = vcombine.high %v642_v60, %v646_v4 }
 0x1c9   :  { %1590 = vmatpush1.bf16.msra.mxu1 %v5725_v9  ;;  %8074 = vst [vmem:[#allocation115_spill] sm:$0xff] %v5752_v63  ;;  %v5761_v9 = vcombine.low %v642_v60, %v646_v4  ;;  %v1608_v4 = vld [vmem:[%s7555_s1] sm:$0xff] }
 0x1ca   :  { %1591 = vmatprep.subr.bf16.mxu1 %v5728_v38  ;;  %v654_v38 = vld [vmem:[%s7552_s4 + $0x3f8] sm:$0xff] }
 0x1cb   :  { %8075 = vst [vmem:[#allocation116_spill] sm:$0xff] %v5761_v9  ;;  %v5764_v0 = vcombine.high %v650_v36, %v654_v38  ;;  %v5767_v12 = vcombine.low %v650_v36, %v654_v38  ;;  %v8078_v38 = vsub.s32 0, %v5376_v41  ;;  %v1609_v36 = vld [vmem:[%s7555_s1 + $0x8] sm:$0xff] }
 0x1cd   :  { %1592 = vmatpush1.bf16.msra.mxu1 %v5737_v5  ;;  %8076 = vst [vmem:[#allocation117_spill] sm:$0xff] %v5764_v0  ;;  %8077 = vst [vmem:[#allocation118_spill] sm:$0xff] %v5767_v12 }
 0x1ce   :  { %1593 = vmatprep.subr.bf16.mxu1 %v5740_v21 }
 0x1d1   :  { %1594 = vmatpush1.bf16.msra.mxu1 %v5749_v10 }
 0x1d2   :  { %1595 = vmatprep.subr.bf16.mxu1 %v5752_v63 }
 0x1d5   :  { %1596 = vmatpush1.bf16.msra.mxu1 %v5761_v9 }
 0x1d6   :  { %1597 = vmatprep.subr.bf16.mxu1 %v5764_v0 }
 0x1d9   :  { %1598 = vmatpush1.bf16.msra.mxu1 %v5767_v12 }
 0x1da   :  { %1819 = vmatprep.subr.bf16.mxu1 %v4858_v29 }
 0x1dc   :  { %1600 = vmatmul.mubr.bf16.vlgmr.msra.gmra.mrb[8].mxu1 %v5395_v6  ;;  %v5808_v6 = vld [vmem:[%s7554_s5] sm:$0xff] }
 0x1dd   :  { %1820 = vmatpush1.bf16.msra.mxu1 %v4860_v30  ;;  %v5816_v60 = vrot.slane %v5808_v6, %v8078_v38 }
 0x1de   :  { %1821 = vmatprep.subr.bf16.mxu1 %v4869_v33 }
 0x1df   :  { %8079 = vst [vmem:[#allocation119_spill] sm:$0xff] %v5816_v60 }
 0x1e1   :  { %1822 = vmatpush1.bf16.msra.mxu1 %v4881_v37 }
 0x1e2   :  { %1823 = vmatprep.subr.bf16.mxu1 %v4887_v39 }
 0x1e5   :  { %1824 = vmatpush1.bf16.msra.mxu1 %v4899_v43 }
 0x1e6   :  { %1825 = vmatprep.subr.bf16.mxu1 %v4905_v45 }
 0x1e9   :  { %1826 = vmatpush1.bf16.msra.mxu1 %v4917_v49 }
 0x1ea   :  { %1827 = vmatprep.subr.bf16.mxu1 %v4923_v51 }
 0x1ed   :  { %1828 = vmatpush1.bf16.msra.mxu1 %v4935_v55 }
 0x1ee   :  { %1829 = vmatprep.subr.bf16.mxu1 %v4946_v58 }
 0x1f1   :  { %1830 = vmatpush1.bf16.msra.mxu1 %v4966_v1 }
 0x1f2   :  { %1831 = vmatprep.subr.bf16.mxu1 %v4968_v2 }
 0x1f5   :  { %1832 = vmatpush1.bf16.msra.mxu1 %v4983_v7  ;;  %v767_v7 = vsub.s32 3, %v5376_v41 }
 0x1f6   :  { %1833 = vmatprep.subr.bf16.mxu1 %v4986_v8  ;;  %v763_v8 = vsub.s32 2, %v5376_v41 }
 0x1f9   :  { %1834 = vmatpush1.bf16.msra.mxu1 %v5001_v13 }
 0x1fa   :  { %1835 = vmatprep.subr.bf16.mxu1 %v5004_v14 }
 0x1fd   :  { %1836 = vmatpush1.bf16.msra.mxu1 %v5019_v19 }
 0x1fe   :  { %1837 = vmatprep.subr.bf16.mxu1 %v5022_v20  ;;  %v5936_v20 = vld [vmem:[%s7556_s7 + $0x38] sm:$0xff]  }
 0x1ff   :  { %8091 = vst [vmem:[#allocation130_spill] sm:$0xff] %v5936_v20 }
 0x201   :  { %1838 = vmatpush1.bf16.msra.mxu1 %v5037_v25  ;;  %v5831_v25 = vld [vmem:[%s7556_s7 + $0x40] sm:$0xff]  }
 0x202   :  { %1839 = vmatprep.subr.bf16.mxu1 %v5040_v26  ;;  %4290 = vmatprep.subr.bf16.mxu0 %v5831_v25 }
 0x205   :  { %1840 = vmatpush1.bf16.msra.mxu1 %v5055_v34 }
 0x206   :  { %1841 = vmatprep.subr.bf16.mxu1 %v5058_v35 }
 0x209   :  { %1842 = vmatpush1.bf16.msra.mxu1 %v5073_v42 }
 0x20a   :  { %1843 = vmatprep.subr.bf16.mxu1 %v5076_v44 }
 0x20d   :  { %1844 = vmatpush1.bf16.msra.mxu1 %v5091_v52 }
 0x20e   :  { %1845 = vmatprep.subr.bf16.mxu1 %v5094_v53 }
 0x211   :  { %1846 = vmatpush1.bf16.msra.mxu1 %v5109_v61  ;;  %v771_v61 = vsub.s32 4, %v5376_v41 }
 0x212   :  { %1847 = vmatprep.subr.bf16.mxu1 %v5112_v62 }
 0x215   :  { %1848 = vmatpush1.bf16.msra.mxu1 %v5121_v3 }
 0x216   :  { %1849 = vmatprep.subr.bf16.mxu1 %v5346_v18 }
 0x219   :  { %1850 = vmatpush1.bf16.msra.mxu1 %v5354_v54 }
 0x21a   :  { %1901 = vmatprep.subr.bf16.mxu1 %v5164_v23  ;;  %v8080_v23 = vsub.s32 1, %v5376_v41 }
 0x21c   :  { %v5824_v54 = vrot.slane %v5808_v6, %v8080_v23  ;;  %v5836_v23 = vld [vmem:[%s7556_s7] sm:$0xff]  }
 0x21d   :  { %4291 = vmatpush3.bf16.msra.mxu0 %v5836_v23 }
 0x21e   :  { %8081 = vst [vmem:[#allocation120_spill] sm:$0xff] %v5824_v54 }
 0x22f   :  { %v1478_v18 = vpop.f32.mrb[0].mxu1  ;;  %v1560_v3 = vpop.f32.mrb[4].mxu0 }
 0x230   :  { %v1616_v62 = vadd.f32 %v1608_v4, %v1478_v18  ;;  %v1480_v53 = vpop.f32.mrb[1].mxu1  ;;  %v1562_v52 = vpop.f32.mrb[5].mxu0 }
 0x231   :  { %v1617_v44 = vadd.f32 %v1609_v36, %v1480_v53  ;;  %v1482_v42 = vpop.f32.mrb[2].mxu1  ;;  %v1564_v38 = vpop.f32.mrb[6].mxu0  ;;  %v5850_v53 = vld [vmem:[%s7556_s7 + $0x48] sm:$0xff]  }
 0x232   :  { %v1624_v35 = vadd.f32 %v1616_v62, %v5816_v60  ;;  %v1483_v34 = vpop.f32.mrb[3].mxu1  ;;  %v1565_v26 = vpop.f32.mrb[7].mxu0  ;;  %v1612_v42 = vld [vmem:[%s7555_s1 + $0x20] sm:$0xff]  ;;  %4292 = vmatprep.subr.bf16.mxu0 %v5850_v53  ;;  %v5860_v62 = vrot.slane %v5808_v6, %v771_v61  ;;  %v5866_v38 = vld [vmem:[%s7556_s7 + $0x50] sm:$0xff]  }
 0x233   :  { %v1625_v18 = vadd.f32 %v1617_v44, %v5824_v54  ;;  %v1613_v34 = vld [vmem:[%s7555_s1 + $0x28] sm:$0xff]  ;;  %v1620_v36 = vadd.f32 %v1612_v42, %v1560_v3  ;;  %v5882_v3 = vld [vmem:[%s7556_s7 + $0x58] sm:$0xff]  }
 0x234   :  { %v4140_v4 = vmul.f32 -1.442695, %v1624_v35  ;;  %v775_v35 = vsub.s32 5, %v5376_v41  ;;  %v5856_v44 = vld [vmem:[%s7556_s7 + $0x8] sm:$0xff]   ;;  %8082 = vst [vmem:[#allocation121_spill] sm:$0xff] %v5860_v62 }
 0x235   :  { %v4141_v26 = vmul.f32 -1.442695, %v1625_v18  ;;  %4293 = vmatpush3.bf16.msra.mxu0 %v5856_v44  ;;  %v1628_v61 = vadd.f32 %v1620_v36, %v5860_v62  ;;  %v5895_v36 = vld [vmem:[%s7556_s7 + $0x60] sm:$0xff]  }
 0x236   :  { %4524 = vpow2.f32 %v4140_v4  ;;  %v5869_v18 = vrot.slane %v5808_v6, %v775_v35  ;;  %v1621_v4 = vadd.f32 %v1613_v34, %v1562_v52  ;;  %4294 = vmatprep.subr.bf16.mxu0 %v5866_v38  ;;  %v5888_v52 = vld [vmem:[%s7556_s7 + $0x18] sm:$0xff]   ;;  %8084 = vst [vmem:[#allocation123_spill] sm:$0xff] %v5895_v36 }
 0x237   :  { %4526 = vpow2.f32 %v4141_v26  ;;  %v5874_v26 = vld [vmem:[%s7556_s7 + $0x10] sm:$0xff]  }
 0x238   :  { %8083 = vst [vmem:[#allocation122_spill] sm:$0xff] %v5869_v18  ;;  %v1629_v42 = vadd.f32 %v1621_v4, %v5869_v18  ;;  %4528 = vtanh.f32 %v1628_v61  ;;  %v5900_v4 = vld [vmem:[%s7556_s7 + $0x20] sm:$0xff]   ;;  %v5906_v61 = vld [vmem:[%s7556_s7 + $0x68] sm:$0xff]  }
 0x239   :  { %4295 = vmatpush3.bf16.msra.mxu0 %v5874_v26  ;;  %8085 = vst [vmem:[#allocation124_spill] sm:$0xff] %v5900_v4  ;;  %8086 = vst [vmem:[#allocation125_spill] sm:$0xff] %v5906_v61 }
 0x23a   :  { %4296 = vmatprep.subr.bf16.mxu0 %v5882_v3  ;;  %4530 = vtanh.f32 %v1629_v42  ;;  %v5912_v42 = vld [vmem:[%s7556_s7 + $0x28] sm:$0xff]  }
 0x23b   :  { %8087 = vst [vmem:[#allocation126_spill] sm:$0xff] %v5912_v42 }
 0x23d   :  { %4297 = vmatpush3.bf16.msra.mxu0 %v5888_v52 }
 0x23e   :  { %4298 = vmatprep.subr.bf16.mxu0 %v5895_v36 }
 0x240   :  { %v4525_v34 = vpop.eup %4524 }
 0x241   :  { %v4527_v35 = vpop.eup %4526  ;;  %v1638_v54 = vadd.f32 1.0, %v4525_v34  ;;  %4299 = vmatpush3.bf16.msra.mxu0 %v5900_v4  ;;  %v5930_v34 = vld [vmem:[%s7556_s7 + $0x78] sm:$0xff]  }
 0x242   :  { %v1639_v62 = vadd.f32 1.0, %v4527_v35  ;;  %4300 = vmatprep.subr.bf16.mxu0 %v5906_v61  ;;  %8090 = vst [vmem:[#allocation129_spill] sm:$0xff] %v5930_v34  ;;  %v4529_v35 = vpop.eup %4528 }
 0x243   :  { %4532 = vrcp.f32 %v1638_v54  ;;  %v5918_v54 = vld [vmem:[%s7556_s7 + $0x70] sm:$0xff]  }
 0x244   :  { %4534 = vrcp.f32 %v1639_v62  ;;  %8088 = vst [vmem:[#allocation127_spill] sm:$0xff] %v5918_v54  ;;  %v5924_v62 = vld [vmem:[%s7556_s7 + $0x30] sm:$0xff]   ;;  %v4531_v18 = vpop.eup %4530 }
 0x245   :  { %4301 = vmatpush3.bf16.msra.mxu0 %v5912_v42  ;;  %8089 = vst [vmem:[#allocation128_spill] sm:$0xff] %v5924_v62 }
 0x246   :  { %4302 = vmatprep.subr.bf16.mxu0 %v5918_v54  ;;  %v5947_v54 = vrot.slane %v5808_v6, %v763_v8 }
 0x249   :  { %4303 = vmatpush3.bf16.msra.mxu0 %v5924_v62  ;;  %v1610_v62 = vld [vmem:[%s7555_s1 + $0x10] sm:$0xff] }
 0x24a   :  { %4304 = vmatprep.subr.bf16.mxu0 %v5930_v34 }
 0x24d   :  { %v4533_v60 = vpop.eup %4532  ;;  %4305 = vmatpush3.bf16.msra.mxu0 %v5936_v20 }
 0x24e   :  { %v4535_v19 = vpop.eup %4534  ;;  %v1672_v14 = vmul.f32 %v4533_v60, %v4529_v35  ;;  %1860 = vmatprep.subr.bf16.mxu0 %v5370_v17  ;;  %v1611_v60 = vld [vmem:[%s7555_s1 + $0x18] sm:$0xff] }
 0x24f   :  { %v1673_v13 = vmul.f32 %v4535_v19, %v4531_v18  ;;  %v5953_v18 = vrot.slane %v5808_v6, %v767_v7 }
 0x26f   :  { %v1519_v19 = vpop.f32.mrb[4].mxu1 }
 0x270   :  { %v1618_v35 = vadd.f32 %v1610_v62, %v1519_v19  ;;  %v1521_v17 = vpop.f32.mrb[5].mxu1 }
 0x271   :  { %v1619_v20 = vadd.f32 %v1611_v60, %v1521_v17  ;;  %v1523_v34 = vpop.f32.mrb[6].mxu1 }
 0x272   :  { %v1626_v2 = vadd.f32 %v1618_v35, %v5947_v54  ;;  %v1524_v42 = vpop.f32.mrb[7].mxu1 }
 0x273   :  { %v1627_v1 = vadd.f32 %v1619_v20, %v5953_v18  ;;  %v779_v20 = vsub.s32 6, %v5376_v41 }
 0x274   :  { %v4142_v61 = vmul.f32 -1.442695, %v1626_v2  ;;  %v1614_v2 = vld [vmem:[%s7555_s1 + $0x30] sm:$0xff] }
 0x275   :  { %v4143_v8 = vmul.f32 -1.442695, %v1627_v1  ;;  %v783_v1 = vsub.s32 7, %v5376_v41 }
 0x276   :  { %4536 = vpow2.f32 %v4142_v61 }
 0x277   :  { %4538 = vpow2.f32 %v4143_v8 }
 0x280   :  { %v4537_v58 = vpop.eup %4536 }
 0x281   :  { %v4539_v4 = vpop.eup %4538  ;;  %v1650_v55 = vadd.f32 1.0, %v4537_v58  ;;  %v5967_v58 = vrot.slane %v5808_v6, %v779_v20 }
 0x282   :  { %v1651_v36 = vadd.f32 1.0, %v4539_v4 }
 0x283   :  { %4540 = vrcp.f32 %v1650_v55  ;;  %v1615_v55 = vld [vmem:[%s7555_s1 + $0x38] sm:$0xff] }
 0x284   :  { %4542 = vrcp.f32 %v1651_v36 }
 0x28d   :  { %v4541_v7 = vpop.eup %4540 }
 0x28e   :  { %v4543_v62 = vpop.eup %4542  ;;  %v1670_v19 = vmul.f32 0.0, %v4541_v7 }
 0x28f   :  { %v1671_v17 = vmul.f32 0.0, %v4543_v62 }
 0x290   :  { %v5957_v34 = vadd.f32 %v1672_v14, %v1670_v19  ;;  %v5973_v14 = vrot.slane %v5808_v6, %v783_v1 }
 0x291   :  { %v5959_v60 = vadd.f32 %v1673_v13, %v1671_v17 }
 0x2af   :  { %v1601_v36 = vpop.f32.mrb[8].mxu1 }
 0x2b0   :  { %v1622_v13 = vadd.f32 %v1614_v2, %v1601_v36  ;;  %v1603_v4 = vpop.f32.mrb[9].mxu1 }
 0x2b1   :  { %v1623_v61 = vadd.f32 %v1615_v55, %v1603_v4  ;;  %v1605_v42 = vpop.f32.mrb[10].mxu1 }
 0x2b2   :  { %v1630_v41 = vadd.f32 %v1622_v13, %v5967_v58  ;;  %v1606_v35 = vpop.f32.mrb[11].mxu1 }
 0x2b3   :  { %v1631_v8 = vadd.f32 %v1623_v61, %v5973_v14  ;;  %v8093_v35 = vld [vmem:[#allocation36_spill] sm:$0xff] }
 0x2b4   :  { %v4144_v7 = vmul.f32 -1.442695, %v1630_v41  ;;  %v8092_v41 = vld [vmem:[#allocation64_spill] sm:$0xff] }
 0x2b5   :  { %v4145_v62 = vmul.f32 -1.442695, %v1631_v8  ;;  %v8094_v8 = vld [vmem:[#allocation65_spill] sm:$0xff] }
 0x2b6   :  { %4544 = vpow2.f32 %v4144_v7  ;;  %v8095_v7 = vld [vmem:[#allocation37_spill] sm:$0xff] }
 0x2b7   :  { %4546 = vpow2.f32 %v4145_v62  ;;  %v8096_v62 = vld [vmem:[#allocation66_spill] sm:$0xff] }
 0x2b8   :  { %4548 = vtanh.f32 %v5957_v34 }
 0x2b9   :  { %4550 = vtanh.f32 %v5959_v60 }
 0x2c0   :  { %v4545_v19 = vpop.eup %4544 }
 0x2c1   :  { %v4547_v17 = vpop.eup %4546  ;;  %v1664_v20 = vadd.f32 1.0, %v4545_v19  ;;  %v8097_v19 = vld [vmem:[#allocation38_spill] sm:$0xff] }
 0x2c2   :  { %v1665_v6 = vadd.f32 1.0, %v4547_v17  ;;  %v4549_v1 = vpop.eup %4548  ;;  %v8098_v17 = vld [vmem:[#allocation67_spill] sm:$0xff] }
 0x2c3   :  { %4552 = vrcp.f32 %v1664_v20  ;;  %v4551_v2 = vpop.eup %4550  ;;  %v8099_v20 = vld [vmem:[#allocation39_spill] sm:$0xff] }
 0x2c4   :  { %4554 = vrcp.f32 %v1665_v6  ;;  %v8100_v6 = vld [vmem:[#allocation68_spill] sm:$0xff] }
 0x2cd   :  { %v4553_v55 = vpop.eup %4552 }
 0x2ce   :  { %v4555_v36 = vpop.eup %4554  ;;  %v1678_v13 = vmul.f32 %v4553_v55, %v4549_v1  ;;  %v8101_v1 = vld [vmem:[#allocation40_spill] sm:$0xff]  ;;  %v8103_v55 = vld [vmem:[#allocation41_spill] sm:$0xff] }
 0x2cf   :  { %v1679_v4 = vmul.f32 %v4555_v36, %v4551_v2  ;;  %v8102_v2 = vld [vmem:[#allocation69_spill] sm:$0xff]  ;;  %v8104_v36 = vld [vmem:[#allocation70_spill] sm:$0xff] }
 0x2d0   :  { %v5981_v42 = vpack.c.bf16 %v1678_v13, %v1678_v13  ;;  %v8105_v13 = vld [vmem:[#allocation42_spill] sm:$0xff] }
 0x2d1   :  { %v5979_v61 = vpack.c.bf16 %v1679_v4, %v1679_v4  ;;  %v8106_v4 = vld [vmem:[#allocation71_spill] sm:$0xff] }
 0x2d3   :  { %1810 = vmatprep.mubr.bf16.mxu0 %v5979_v61  ;;  %1851 = vmatprep.mubr.bf16.mxu1 %v5979_v61 }
 0x2d4   :  { %1811 = vmatmul.mubr.bf16.vlgmr.msra.gmra.mrb[8].mxu0 %v5981_v42  ;;  %1852 = vmatmul.mubr.bf16.vlgmr.msra.gmra.mrb[12].mxu1 %v5981_v42 }
 0x2d5   :  { %1861 = vmatpush1.bf16.msra.mxu0 %v5372_v27  ;;  %1902 = vmatpush1.bf16.msra.mxu1 %v5174_v31 }
 0x2d6   :  { %1892 = vmatprep.mubr.bf16.mxu0 %v5979_v61  ;;  %1933 = vmatprep.mubr.bf16.mxu1 %v5979_v61 }
 0x2d7   :  { %1862 = vmatprep.subr.bf16.mxu0 %v5397_v16  ;;  %1903 = vmatprep.subr.bf16.mxu1 %v5177_v32 }
 0x2d9   :  { %1863 = vmatpush1.bf16.msra.mxu0 %v5411_v22  ;;  %1904 = vmatpush1.bf16.msra.mxu1 %v5186_v40 }
 0x2da   :  { %1864 = vmatprep.subr.bf16.mxu0 %v5414_v46  ;;  %1905 = vmatprep.subr.bf16.mxu1 %v5189_v56 }
 0x2dd   :  { %1865 = vmatpush1.bf16.msra.mxu0 %v5423_v24  ;;  %1906 = vmatpush1.bf16.msra.mxu1 %v5198_v47 }
 0x2de   :  { %1866 = vmatprep.subr.bf16.mxu0 %v5426_v28  ;;  %1907 = vmatprep.subr.bf16.mxu1 %v5201_v48 }
 0x2e1   :  { %1867 = vmatpush1.bf16.msra.mxu0 %v5435_v11  ;;  %1908 = vmatpush1.bf16.msra.mxu1 %v5210_v57 }
 0x2e2   :  { %1868 = vmatprep.subr.bf16.mxu0 %v5438_v50  ;;  %1909 = vmatprep.subr.bf16.mxu1 %v5213_v59 }
 0x2e5   :  { %1869 = vmatpush1.bf16.msra.mxu0 %v8092_v41  ;;  %1910 = vmatpush1.bf16.msra.mxu1 %v8093_v35  ;;  %v676_v41 = vld [vmem:[%s7559_s6 + $0xa8] sm:$0xff] }
 0x2e6   :  { %1870 = vmatprep.subr.bf16.mxu0 %v8094_v8  ;;  %1911 = vmatprep.subr.bf16.mxu1 %v8095_v7  ;;  %v664_v8 = vld [vmem:[%s7559_s6 + $0x48] sm:$0xff] }
 0x2e9   :  { %1871 = vmatpush1.bf16.msra.mxu0 %v8096_v62  ;;  %1912 = vmatpush1.bf16.msra.mxu1 %v8097_v19  ;;  %v8107_v62 = vld [vmem:[#allocation43_spill] sm:$0xff]  ;;  %v8108_v19 = vld [vmem:[#allocation72_spill] sm:$0xff] }
 0x2ea   :  { %1872 = vmatprep.subr.bf16.mxu0 %v8098_v17  ;;  %1913 = vmatprep.subr.bf16.mxu1 %v8099_v20  ;;  %v8109_v17 = vld [vmem:[#allocation44_spill] sm:$0xff]  ;;  %v8110_v20 = vld [vmem:[#allocation73_spill] sm:$0xff] }
 0x2ed   :  { %1873 = vmatpush1.bf16.msra.mxu0 %v8100_v6  ;;  %1914 = vmatpush1.bf16.msra.mxu1 %v8101_v1  ;;  %v8111_v6 = vld [vmem:[#allocation45_spill] sm:$0xff]  ;;  %v8112_v1 = vld [vmem:[#allocation74_spill] sm:$0xff] }
 0x2ee   :  { %1874 = vmatprep.subr.bf16.mxu0 %v8102_v2  ;;  %1915 = vmatprep.subr.bf16.mxu1 %v8103_v55  ;;  %v8113_v2 = vld [vmem:[#allocation46_spill] sm:$0xff]  ;;  %v8114_v55 = vld [vmem:[#allocation75_spill] sm:$0xff] }
 0x2f1   :  { %1875 = vmatpush1.bf16.msra.mxu0 %v8104_v36  ;;  %1916 = vmatpush1.bf16.msra.mxu1 %v8105_v13  ;;  %v8115_v36 = vld [vmem:[#allocation47_spill] sm:$0xff]  ;;  %v8116_v13 = vld [vmem:[#allocation76_spill] sm:$0xff] }
 0x2f2   :  { %1876 = vmatprep.subr.bf16.mxu0 %v8106_v4  ;;  %1917 = vmatprep.subr.bf16.mxu1 %v8107_v62  ;;  %v8117_v4 = vld [vmem:[#allocation48_spill] sm:$0xff]  ;;  %v8118_v62 = vld [vmem:[#allocation77_spill] sm:$0xff] }
 0x2f5   :  { %1877 = vmatpush1.bf16.msra.mxu0 %v8108_v19  ;;  %1918 = vmatpush1.bf16.msra.mxu1 %v8109_v17  ;;  %v8119_v19 = vld [vmem:[#allocation49_spill] sm:$0xff]  ;;  %v8120_v17 = vld [vmem:[#allocation78_spill] sm:$0xff] }
 0x2f6   :  { %1878 = vmatprep.subr.bf16.mxu0 %v8110_v20  ;;  %1919 = vmatprep.subr.bf16.mxu1 %v8111_v6  ;;  %v8121_v20 = vld [vmem:[#allocation50_spill] sm:$0xff]  ;;  %v8122_v6 = vld [vmem:[#allocation79_spill] sm:$0xff] }
 0x2f9   :  { %1879 = vmatpush1.bf16.msra.mxu0 %v8112_v1  ;;  %1920 = vmatpush1.bf16.msra.mxu1 %v8113_v2  ;;  %v8123_v1 = vld [vmem:[#allocation51_spill] sm:$0xff]  ;;  %v8124_v2 = vld [vmem:[#allocation80_spill] sm:$0xff] }
 0x2fa   :  { %1880 = vmatprep.subr.bf16.mxu0 %v8114_v55  ;;  %1921 = vmatprep.subr.bf16.mxu1 %v8115_v36  ;;  %v8125_v55 = vld [vmem:[#allocation52_spill] sm:$0xff]  ;;  %v8126_v36 = vld [vmem:[#allocation81_spill] sm:$0xff] }
 0x2fd   :  { %1881 = vmatpush1.bf16.msra.mxu0 %v8116_v13  ;;  %1922 = vmatpush1.bf16.msra.mxu1 %v8117_v4  ;;  %v8127_v13 = vld [vmem:[#allocation53_spill] sm:$0xff]  ;;  %v8128_v4 = vld [vmem:[#allocation82_spill] sm:$0xff] }
 0x2fe   :  { %1882 = vmatprep.subr.bf16.mxu0 %v8118_v62  ;;  %1923 = vmatprep.subr.bf16.mxu1 %v8119_v19  ;;  %v8129_v62 = vld [vmem:[#allocation54_spill] sm:$0xff]  ;;  %v8130_v19 = vld [vmem:[#allocation83_spill] sm:$0xff] }
 0x301   :  { %1883 = vmatpush1.bf16.msra.mxu0 %v8120_v17  ;;  %1924 = vmatpush1.bf16.msra.mxu1 %v8121_v20  ;;  %v8131_v17 = vld [vmem:[#allocation55_spill] sm:$0xff]  ;;  %v8132_v20 = vld [vmem:[#allocation84_spill] sm:$0xff] }
 0x302   :  { %1884 = vmatprep.subr.bf16.mxu0 %v8122_v6  ;;  %1925 = vmatprep.subr.bf16.mxu1 %v8123_v1  ;;  %v8133_v6 = vld [vmem:[#allocation56_spill] sm:$0xff]  ;;  %v8134_v1 = vld [vmem:[#allocation85_spill] sm:$0xff] }
 0x305   :  { %1885 = vmatpush1.bf16.msra.mxu0 %v8124_v2  ;;  %1926 = vmatpush1.bf16.msra.mxu1 %v8125_v55  ;;  %v8135_v2 = vld [vmem:[#allocation59_spill] sm:$0xff]  ;;  %v8136_v55 = vld [vmem:[#allocation86_spill] sm:$0xff] }
 0x306   :  { %1886 = vmatprep.subr.bf16.mxu0 %v8126_v36  ;;  %1927 = vmatprep.subr.bf16.mxu1 %v8127_v13  ;;  %v8137_v36 = vld [vmem:[#allocation60_spill] sm:$0xff]  ;;  %v8138_v13 = vld [vmem:[#allocation87_spill] sm:$0xff] }
 0x309   :  { %1887 = vmatpush1.bf16.msra.mxu0 %v8128_v4  ;;  %1928 = vmatpush1.bf16.msra.mxu1 %v8129_v62 }
 0x30a   :  { %1888 = vmatprep.subr.bf16.mxu0 %v8130_v19  ;;  %1929 = vmatprep.subr.bf16.mxu1 %v8131_v17  ;;  %v8146_v17 = vld [vmem:[#allocation96_spill] sm:$0xff]  ;;  %v8147_v19 = vld [vmem:[#allocation97_spill] sm:$0xff] }
 0x30d   :  { %1889 = vmatpush1.bf16.msra.mxu0 %v8132_v20  ;;  %1930 = vmatpush1.bf16.msra.mxu1 %v8133_v6  ;;  %v8139_v20 = vld [vmem:[#allocation89_spill] sm:$0xff]  ;;  %v8140_v6 = vld [vmem:[#allocation90_spill] sm:$0xff] }
 0x30e   :  { %1890 = vmatprep.subr.bf16.mxu0 %v8134_v1  ;;  %1931 = vmatprep.subr.bf16.mxu1 %v8135_v2  ;;  %v8141_v1 = vld [vmem:[#allocation91_spill] sm:$0xff]  ;;  %v8142_v2 = vld [vmem:[#allocation92_spill] sm:$0xff] }
 0x311   :  { %1891 = vmatpush1.bf16.msra.mxu0 %v8136_v55  ;;  %1932 = vmatpush1.bf16.msra.mxu1 %v8137_v36  ;;  %v8143_v55 = vld [vmem:[#allocation93_spill] sm:$0xff]  ;;  %v8144_v36 = vld [vmem:[#allocation94_spill] sm:$0xff] }
 0x312   :  { %1942 = vmatprep.subr.bf16.mxu0 %v8138_v13  ;;  %v8145_v13 = vld [vmem:[#allocation95_spill] sm:$0xff] }
 0x314   :  { %1893 = vmatmul.mubr.bf16.vlgmr.msra.gmra.mrb[12].mxu0 %v5981_v42  ;;  %1934 = vmatmul.mubr.bf16.vlgmr.msra.gmra.mrb[16].mxu1 %v5981_v42 }
 0x315   :  { %1943 = vmatpush1.bf16.msra.mxu0 %v5591_v15  ;;  %1974 = vmatprep.mubr.bf16.mxu0 %v5979_v61  ;;  %v8148_v15 = vld [vmem:[#allocation98_spill] sm:$0xff]  ;;  %v8149_v61 = vld [vmem:[#allocation99_spill] sm:$0xff] }
 0x316   :  { %1944 = vmatprep.subr.bf16.mxu0 %v8139_v20  ;;  %v8150_v20 = vld [vmem:[#allocation100_spill] sm:$0xff] }
 0x319   :  { %1945 = vmatpush1.bf16.msra.mxu0 %v8140_v6  ;;  %v8151_v6 = vld [vmem:[#allocation101_spill] sm:$0xff] }
 0x31a   :  { %1946 = vmatprep.subr.bf16.mxu0 %v8141_v1  ;;  %v8152_v1 = vld [vmem:[#allocation102_spill] sm:$0xff] }
 0x31d   :  { %1947 = vmatpush1.bf16.msra.mxu0 %v8142_v2  ;;  %v8153_v2 = vld [vmem:[#allocation103_spill] sm:$0xff] }
 0x31e   :  { %1948 = vmatprep.subr.bf16.mxu0 %v8143_v55  ;;  %v8154_v55 = vld [vmem:[#allocation104_spill] sm:$0xff] }
 0x321   :  { %1949 = vmatpush1.bf16.msra.mxu0 %v8144_v36  ;;  %v8155_v36 = vld [vmem:[#allocation105_spill] sm:$0xff] }
 0x322   :  { %1950 = vmatprep.subr.bf16.mxu0 %v8145_v13  ;;  %v8156_v13 = vld [vmem:[#allocation106_spill] sm:$0xff] }
 0x325   :  { %1951 = vmatpush1.bf16.msra.mxu0 %v8146_v17  ;;  %v8157_v17 = vld [vmem:[#allocation107_spill] sm:$0xff] }
 0x326   :  { %1952 = vmatprep.subr.bf16.mxu0 %v8147_v19  ;;  %v8158_v19 = vld [vmem:[#allocation108_spill] sm:$0xff] }
 0x329   :  { %1953 = vmatpush1.bf16.msra.mxu0 %v8148_v15  ;;  %v8159_v15 = vld [vmem:[#allocation109_spill] sm:$0xff] }
 0x32a   :  { %1954 = vmatprep.subr.bf16.mxu0 %v8149_v61  ;;  %v8160_v61 = vld [vmem:[#allocation110_spill] sm:$0xff] }
 0x32d   :  { %1955 = vmatpush1.bf16.msra.mxu0 %v8150_v20  ;;  %v8161_v20 = vld [vmem:[#allocation111_spill] sm:$0xff] }
 0x32e   :  { %1956 = vmatprep.subr.bf16.mxu0 %v8151_v6 }
 0x331   :  { %1957 = vmatpush1.bf16.msra.mxu0 %v8152_v1 }
 0x332   :  { %1958 = vmatprep.subr.bf16.mxu0 %v8153_v2 }
 0x335   :  { %1959 = vmatpush1.bf16.msra.mxu0 %v8154_v55 }
 0x336   :  { %1960 = vmatprep.subr.bf16.mxu0 %v8155_v36 }
 0x339   :  { %1961 = vmatpush1.bf16.msra.mxu0 %v8156_v13 }
 0x33a   :  { %1962 = vmatprep.subr.bf16.mxu0 %v8157_v17 }
 0x33d   :  { %1963 = vmatpush1.bf16.msra.mxu0 %v8158_v19 }
 0x33e   :  { %1964 = vmatprep.subr.bf16.mxu0 %v8159_v15 }
 0x341   :  { %1965 = vmatpush1.bf16.msra.mxu0 %v8160_v61 }
 0x342   :  { %1966 = vmatprep.subr.bf16.mxu0 %v8161_v20 }
 0x345   :  { %1967 = vmatpush1.bf16.msra.mxu0 %v5737_v5  ;;  %v4011_v5 = vld [vmem:[%s7557_s8] ss:$0 sm:$0xff] }
 0x346   :  { %1968 = vmatprep.subr.bf16.mxu0 %v5740_v21 }
 0x349   :  { %1969 = vmatpush1.bf16.msra.mxu0 %v5749_v10 }
 0x34a   :  { %1970 = vmatprep.subr.bf16.mxu0 %v5752_v63 }
 0x34d   :  { %1971 = vmatpush1.bf16.msra.mxu0 %v5761_v9 }
 0x34e   :  { %1972 = vmatprep.subr.bf16.mxu0 %v5764_v0 }
 0x351   :  { %1973 = vmatpush1.bf16.msra.mxu0 %v5767_v12 }
 0x354   :  { %1975 = vmatmul.mubr.bf16.vlgmr.msra.gmra.mrb[16].mxu0 %v5981_v42 }
 0x3a7   :  { %v4306_v15 = vpop.f32.mrb[8].mxu0  ;;  %v6087_v61 = vpop.f32.mrb[12].mxu1 }
 0x3a8   :  { %v4307_v21 = vpop.f32.mrb[9].mxu0  ;;  %v6092_v20 = vpop.f32.mrb[13].mxu1 }
 0x3a9   :  { %v4308_v10 = vadd.f32 %v4307_v21, %v4306_v15  ;;  %v4309_v63 = vpop.f32.mrb[10].mxu0  ;;  %v1857_v19 = vpop.f32.mrb[14].mxu1 }
 0x3aa   :  { %v4310_v9 = vpop.f32.mrb[11].mxu0  ;;  %v1858_v17 = vpop.f32.mrb[15].mxu1 }
 0x3ab   :  { %v1813_v0 = vadd.f32 %v4308_v10, %v4011_v5  ;;  %v8162_v17 = vlaneseq }
 0x3ad   :  { %1818 = vst [vmem:[%s7558_s9] sm:$0xff] %v1813_v0  ;;  %1983 = vmax.xlane.f32.xlu0 %v1813_v0  ;;  %v6110_v2 = vand.u32 127, %v8162_v17 }
 0x3af   :  { %8163 = vst [vmem:[#allocation131_spill] sm:$0xff] %v6110_v2 }
 0x3e7   :  { %v6097_v42 = vpop.f32.mrb[12].mxu0  ;;  %v6099_v12 = vpop.f32.mrb[16].mxu1 }
 0x3e8   :  { %v6101_v13 = vpop.f32.mrb[13].mxu0  ;;  %v6103_v36 = vpop.f32.mrb[17].mxu1 }
 0x3e9   :  { %v1898_v55 = vpop.f32.mrb[14].mxu0  ;;  %v1939_v15 = vpop.f32.mrb[18].mxu1 }
 0x3ea   :  { %v1899_v21 = vpop.f32.mrb[15].mxu0  ;;  %v1940_v63 = vpop.f32.mrb[19].mxu1  ;;  %v655_v15 = vld [vmem:[%s7559_s6] sm:$0xff] }
 0x3eb   :  { %v659_v21 = vld [vmem:[%s7559_s6 + $0x20] sm:$0xff] }
 0x3ec   :  { %v6133_v63 = vcombine.low %v655_v15, %v659_v21 }
 0x3ee   :  { %8165 = vst [vmem:[#allocation133_spill] sm:$0xff] %v6133_v63 }
 0x427   :  { %v6105_v9 = vpop.f32.mrb[16].mxu0 }
 0x428   :  { %v6107_v5 = vpop.f32.mrb[17].mxu0 }
 0x429   :  { %v1980_v10 = vpop.f32.mrb[18].mxu0 }
 0x42a   :  { %v1981_v19 = vpop.f32.mrb[19].mxu0  ;;  %v663_v10 = vld [vmem:[%s7559_s6 + $0x40] sm:$0xff] }
 0x42b   :  { %v667_v19 = vld [vmem:[%s7559_s6 + $0x60] sm:$0xff] }
 0x42c   :  { %v6145_v7 = vcombine.high %v663_v10, %v667_v19  ;;  %v6170_v59 = vcombine.low %v663_v10, %v667_v19  ;;  %v683_v10 = vld [vmem:[%s7559_s6 + $0xe0] sm:$0xff]  ;;  %v680_v19 = vld [vmem:[%s7559_s6 + $0xc8] sm:$0xff] }
 0x42e   :  { %8168 = vst [vmem:[#allocation136_spill] sm:$0xff] %v6145_v7  ;;  %8170 = vst [vmem:[#allocation138_spill] sm:$0xff] %v6170_v59 }
 0x43a   :  { %v1984_v1 = vpop.xlane.xlu0 %1983 }
 0x43b   :  { %vm1985_vm0 = vcmp.eq.f32.partialorder %v1813_v0, %v1984_v1  ;;  %v656_v0 = vld [vmem:[%s7559_s6 + $0x8] sm:$0xff]  ;;  %v6128_v1 = vcombine.high %v655_v15, %v659_v21  ;;  %v671_v21 = vld [vmem:[%s7559_s6 + $0x80] sm:$0xff] }
 0x43c   :  { %v6113_v6 = vsel %vm1985_vm0, %v6110_v2, 128  ;;  %v668_v15 = vld [vmem:[%s7559_s6 + $0x68] sm:$0xff] }
 0x43d   :  { %v1988_v62 = vshra.s32 %v6113_v6, 16  ;;  %8164 = vst [vmem:[#allocation132_spill] sm:$0xff] %v6128_v1  ;;  %2325 = vmatprep.subr.bf16.mxu1 %v6128_v1  ;;  %v6157_v35 = vcombine.high %v664_v8, %v668_v15  ;;  %v6174_v1 = vcombine.low %v664_v8, %v668_v15  ;;  %v684_v8 = vld [vmem:[%s7559_s6 + $0xe8] sm:$0xff] }
 0x43e   :  { %2326 = vmatpush1.bf16.msra.mxu1 %v6133_v63  ;;  %v687_v63 = vld [vmem:[%s7559_s6 + $0x100] sm:$0xff] }
 0x43f   :  { %v6116_v55 = vcvt.s32.f32 %v1988_v62  ;;  %v660_v62 = vld [vmem:[%s7559_s6 + $0x28] sm:$0xff]  ;;  %8169 = vst [vmem:[#allocation137_spill] sm:$0xff] %v6157_v35  ;;  %2327 = vmatprep.subr.bf16.mxu1 %v6145_v7  ;;  %8171 = vst [vmem:[#allocation139_spill] sm:$0xff] %v6174_v1  ;;  %v6203_v7 = vcombine.high %v680_v19, %v684_v8 }
 0x440   :  { %v6141_v17 = vcombine.high %v656_v0, %v660_v62  ;;  %v6143_v4 = vcombine.low %v656_v0, %v660_v62  ;;  %v675_v0 = vld [vmem:[%s7559_s6 + $0xa0] sm:$0xff]  ;;  %v672_v62 = vld [vmem:[%s7559_s6 + $0x88] sm:$0xff] }
 0x441   :  { %1991 = vmin.xlane.f32.xlu0 %v6116_v55  ;;  %v6176_v50 = vcombine.high %v671_v21, %v675_v0  ;;  %v6179_v57 = vcombine.high %v672_v62, %v676_v41  ;;  %v6194_v15 = vcombine.low %v671_v21, %v675_v0  ;;  %8177 = vst [vmem:[#allocation145_spill] sm:$0xff] %v6203_v7  ;;  %v691_v21 = vld [vmem:[%s7559_s6 + $0x120] sm:$0xff]  ;;  %v688_v0 = vld [vmem:[%s7559_s6 + $0x108] sm:$0xff] }
 0x442   :  { %8166 = vst [vmem:[#allocation134_spill] sm:$0xff] %v6141_v17  ;;  %8167 = vst [vmem:[#allocation135_spill] sm:$0xff] %v6143_v4  ;;  %2366 = vmatprep.subr.bf16.mxu0 %v6141_v17  ;;  %v679_v17 = vld [vmem:[%s7559_s6 + $0xc0] sm:$0xff]  ;;  %2328 = vmatpush1.bf16.msra.mxu1 %v6170_v59 }
 0x443   :  { %2367 = vmatpush1.bf16.msra.mxu0 %v6143_v4  ;;  %8172 = vst [vmem:[#allocation140_spill] sm:$0xff] %v6176_v50  ;;  %8173 = vst [vmem:[#allocation141_spill] sm:$0xff] %v6179_v57  ;;  %2329 = vmatprep.subr.bf16.mxu1 %v6176_v50  ;;  %v6200_v4 = vcombine.high %v679_v17, %v683_v10  ;;  %v695_v59 = vld [vmem:[%s7559_s6 + $0x140] sm:$0xff] }
 0x444   :  { %2368 = vmatprep.subr.bf16.mxu0 %v6157_v35  ;;  %8174 = vst [vmem:[#allocation142_spill] sm:$0xff] %v6194_v15  ;;  %v6198_v35 = vcombine.low %v672_v62, %v676_v41  ;;  %v692_v41 = vld [vmem:[%s7559_s6 + $0x128] sm:$0xff]  ;;  %v6218_v62 = vcombine.low %v679_v17, %v683_v10  ;;  %v699_v17 = vld [vmem:[%s7559_s6 + $0x160] sm:$0xff] }
 0x445   :  { %8176 = vst [vmem:[#allocation144_spill] sm:$0xff] %v6200_v4  ;;  %v6227_v50 = vcombine.high %v688_v0, %v692_v41  ;;  %v696_v10 = vld [vmem:[%s7559_s6 + $0x148] sm:$0xff] }
 0x446   :  { %8175 = vst [vmem:[#allocation143_spill] sm:$0xff] %v6198_v35  ;;  %2330 = vmatpush1.bf16.msra.mxu1 %v6194_v15  ;;  %8178 = vst [vmem:[#allocation146_spill] sm:$0xff] %v6218_v62  ;;  %v703_v15 = vld [vmem:[%s7559_s6 + $0x180] sm:$0xff] }
 0x447   :  { %2369 = vmatpush1.bf16.msra.mxu0 %v6174_v1  ;;  %2331 = vmatprep.subr.bf16.mxu1 %v6200_v4  ;;  %v6224_v1 = vcombine.high %v687_v63, %v691_v21  ;;  %8181 = vst [vmem:[#allocation149_spill] sm:$0xff] %v6227_v50 }
 0x448   :  { %2370 = vmatprep.subr.bf16.mxu0 %v6179_v57  ;;  %v6222_v57 = vcombine.low %v680_v19, %v684_v8  ;;  %v700_v19 = vld [vmem:[%s7559_s6 + $0x168] sm:$0xff]  ;;  %v6242_v8 = vcombine.low %v687_v63, %v691_v21  ;;  %v707_v63 = vld [vmem:[%s7559_s6 + $0x1a0] sm:$0xff] }
 0x449   :  { %8180 = vst [vmem:[#allocation148_spill] sm:$0xff] %v6224_v1  ;;  %v6251_v4 = vcombine.high %v696_v10, %v700_v19  ;;  %v704_v21 = vld [vmem:[%s7559_s6 + $0x188] sm:$0xff] }
 0x44a   :  { %8179 = vst [vmem:[#allocation147_spill] sm:$0xff] %v6222_v57  ;;  %2332 = vmatpush1.bf16.msra.mxu1 %v6218_v62  ;;  %8182 = vst [vmem:[#allocation150_spill] sm:$0xff] %v6242_v8  ;;  %v6278_v62 = vcombine.low %v703_v15, %v707_v63 }
 0x44b   :  { %2371 = vmatpush1.bf16.msra.mxu0 %v6198_v35  ;;  %2333 = vmatprep.subr.bf16.mxu1 %v6224_v1  ;;  %v6248_v35 = vcombine.high %v695_v59, %v699_v17  ;;  %8185 = vst [vmem:[#allocation153_spill] sm:$0xff] %v6251_v4 }
 0x44c   :  { %2372 = vmatprep.subr.bf16.mxu0 %v6203_v7  ;;  %v6246_v7 = vcombine.low %v688_v0, %v692_v41  ;;  %v708_v0 = vld [vmem:[%s7559_s6 + $0x1a8] sm:$0xff]  ;;  %v6266_v41 = vcombine.low %v695_v59, %v699_v17  ;;  %8190 = vst [vmem:[#allocation158_spill] sm:$0xff] %v6278_v62  ;;  %v1987_v17 = vand.u32 65535, %v6113_v6 }
 0x44d   :  { %8184 = vst [vmem:[#allocation152_spill] sm:$0xff] %v6248_v35  ;;  %v6275_v1 = vcombine.high %v704_v21, %v708_v0  ;;  %v6282_v59 = vcombine.low %v704_v21, %v708_v0  ;;  %v715_v21 = vld [vmem:[%s7559_s6 + $0x1e0] sm:$0xff]  ;;  %v712_v0 = vld [vmem:[%s7559_s6 + $0x1c8] sm:$0xff] }
 0x44e   :  { %8183 = vst [vmem:[#allocation151_spill] sm:$0xff] %v6246_v7  ;;  %2334 = vmatpush1.bf16.msra.mxu1 %v6242_v8  ;;  %8186 = vst [vmem:[#allocation154_spill] sm:$0xff] %v6266_v41  ;;  %v716_v6 = vld [vmem:[%s7559_s6 + $0x1e8] sm:$0xff] }
 0x44f   :  { %2373 = vmatpush1.bf16.msra.mxu0 %v6222_v57  ;;  %2335 = vmatprep.subr.bf16.mxu1 %v6248_v35  ;;  %v6272_v57 = vcombine.high %v703_v15, %v707_v63  ;;  %8189 = vst [vmem:[#allocation157_spill] sm:$0xff] %v6275_v1  ;;  %8191 = vst [vmem:[#allocation159_spill] sm:$0xff] %v6282_v59  ;;  %v711_v63 = vld [vmem:[%s7559_s6 + $0x1c0] sm:$0xff]  ;;  %v689_v35 = vld [vmem:[%s7559_s6 + $0x110] sm:$0xff] }
 0x450   :  { %2374 = vmatprep.subr.bf16.mxu0 %v6227_v50  ;;  %v6270_v50 = vcombine.low %v696_v10, %v700_v19  ;;  %v1989_v19 = vcvt.s32.f32 %v1987_v17  ;;  %v6305_v17 = vcombine.low %v711_v63, %v715_v21 }
 0x451   :  { %8188 = vst [vmem:[#allocation156_spill] sm:$0xff] %v6272_v57 }
 0x452   :  { %8187 = vst [vmem:[#allocation155_spill] sm:$0xff] %v6270_v50  ;;  %2336 = vmatpush1.bf16.msra.mxu1 %v6266_v41  ;;  %8194 = vst [vmem:[#allocation162_spill] sm:$0xff] %v6305_v17 }
 0x453   :  { %2375 = vmatpush1.bf16.msra.mxu0 %v6246_v7  ;;  %2337 = vmatprep.subr.bf16.mxu1 %v6272_v57 }
 0x454   :  { %2376 = vmatprep.subr.bf16.mxu0 %v6251_v4 }
 0x456   :  { %2338 = vmatpush1.bf16.msra.mxu1 %v6278_v62 }
 0x457   :  { %2377 = vmatpush1.bf16.msra.mxu0 %v6270_v50  ;;  %v7845_v50 = vmov 0  }
 0x458   :  { %2378 = vmatprep.subr.bf16.mxu0 %v6275_v1  ;;  %v661_v1 = vld [vmem:[%s7559_s6 + $0x30] sm:$0xff]  ;;  %2357 = vmatprep.mubr.bf16.mxu1 %v7845_v50 }
 0x459   :  { %2398 = vmatprep.mubr.bf16.mxu0 %v7845_v50  ;;  %v673_v50 = vld [vmem:[%s7559_s6 + $0x90] sm:$0xff] }
 0x45b   :  { %2379 = vmatpush1.bf16.msra.mxu0 %v6282_v59  ;;  %v6298_v59 = vcombine.high %v711_v63, %v715_v21  ;;  %v658_v63 = vld [vmem:[%s7559_s6 + $0x18] sm:$0xff] }
 0x45d   :  { %8192 = vst [vmem:[#allocation160_spill] sm:$0xff] %v6298_v59  ;;  %2339 = vmatprep.subr.bf16.mxu1 %v6298_v59 }
 0x45e   :  { %2340 = vmatpush1.bf16.msra.mxu1 %v6305_v17 }
 0x4ce   :  { %v1992_v10 = vpop.xlane.xlu0 %1991 }
 0x4cf   :  { %vm1993_vm1 = vcmp.eq.f32.partialorder %v6116_v55, %v1992_v10  ;;  %v6303_v55 = vcombine.high %v712_v0, %v716_v6 }
 0x4d0   :  { %v1994_v15 = vsel %vm1993_vm1, %v1989_v19, inf  ;;  %v6307_v19 = vcombine.low %v712_v0, %v716_v6  ;;  %v662_v0 = vld [vmem:[%s7559_s6 + $0x38] sm:$0xff] }
 0x4d1   :  { %1995 = vmin.xlane.f32.xlu1 %v1994_v15  ;;  %8193 = vst [vmem:[#allocation161_spill] sm:$0xff] %v6303_v55  ;;  %2380 = vmatprep.subr.bf16.mxu0 %v6303_v55  ;;  %v657_v15 = vld [vmem:[%s7559_s6 + $0x10] sm:$0xff]  ;;  %v6327_v6 = vcombine.high %v658_v63, %v662_v0  ;;  %v6333_v4 = vcombine.low %v658_v63, %v662_v0  ;;  %v666_v63 = vld [vmem:[%s7559_s6 + $0x58] sm:$0xff] }
 0x4d2   :  { %8195 = vst [vmem:[#allocation163_spill] sm:$0xff] %v6307_v19  ;;  %2381 = vmatpush1.bf16.msra.mxu0 %v6307_v19  ;;  %v6322_v21 = vcombine.high %v657_v15, %v661_v1  ;;  %v6329_v55 = vcombine.low %v657_v15, %v661_v1  ;;  %v1998_v19 = vcvt.f32.s32 %v1992_v10  ;;  %v665_v1 = vld [vmem:[%s7559_s6 + $0x50] sm:$0xff]  ;;  %v670_v0 = vld [vmem:[%s7559_s6 + $0x78] sm:$0xff] }
 0x4d3   :  { %8197 = vst [vmem:[#allocation165_spill] sm:$0xff] %v6327_v6  ;;  %8199 = vst [vmem:[#allocation167_spill] sm:$0xff] %v6333_v4  ;;  %2448 = vmatprep.subr.bf16.mxu0 %v6327_v6  ;;  %v669_v15 = vld [vmem:[%s7559_s6 + $0x70] sm:$0xff]  ;;  %v6380_v62 = vcombine.low %v666_v63, %v670_v0 }
 0x4d4   :  { %8196 = vst [vmem:[#allocation164_spill] sm:$0xff] %v6322_v21  ;;  %8198 = vst [vmem:[#allocation166_spill] sm:$0xff] %v6329_v55  ;;  %2407 = vmatprep.subr.bf16.mxu1 %v6322_v21  ;;  %v1999_v17 = vshll.u32 %v1998_v19, 16  ;;  %v6352_v19 = vcombine.high %v666_v63, %v670_v0  ;;  %v677_v6 = vld [vmem:[%s7559_s6 + $0xb0] sm:$0xff]  ;;  %v8208_v63 = vmov 0   ;;  %v8238_v21 = vld [vmem:[#allocation126_spill] sm:$0xff] }
 0x4d5   :  { %8205 = vst [vmem:[#allocation171_spill] sm:$0xff] %v6380_v62  ;;  %v6384_v57 = vcombine.high %v673_v50, %v677_v6  ;;  %v6404_v0 = vcombine.low %v673_v50, %v677_v6  ;;  %v690_v50 = vld [vmem:[%s7559_s6 + $0x118] sm:$0xff] }
 0x4d6   :  { %8201 = vst [vmem:[#allocation169_spill] sm:$0xff] %v6352_v19  ;;  %v694_v6 = vld [vmem:[%s7559_s6 + $0x138] sm:$0xff] }
 0x4d7   :  { %8206 = vst [vmem:[#allocation172_spill] sm:$0xff] %v6384_v57  ;;  %8209 = vst [vmem:[#allocation174_spill] sm:$0xff] %v6404_v0 }
 0x55e   :  { %v1996_v7 = vpop.xlane.xlu1 %1995 }
 0x55f   :  { %v1997_v59 = vcvt.f32.s32 %v1996_v7  ;;  %v6350_v7 = vcombine.high %v665_v1, %v669_v15 }
 0x561   :  { %v2000_v10 = vadd.s32 %v1999_v17, %v1997_v59  ;;  %8200 = vst [vmem:[#allocation168_spill] sm:$0xff] %v6350_v7  ;;  %v674_v59 = vld [vmem:[%s7559_s6 + $0x98] sm:$0xff] }
 0x562   :  { %v678_v17 = vld [vmem:[%s7559_s6 + $0xb8] sm:$0xff] }
 0x563   :  { %vm2001_vm2 = vcmp.eq.s32.totalorder %v6110_v2, %v2000_v10  ;;  %v7859_v10 = vmov 1.0|1.0   ;;  %v6378_v2 = vcombine.low %v665_v1, %v669_v15  ;;  %v6386_v41 = vcombine.high %v674_v59, %v678_v17  ;;  %v682_v1 = vld [vmem:[%s7559_s6 + $0xd8] sm:$0xff] }
 0x564   :  { %vm6360_vm3 = vmpackc.low %vm2001_vm2, %vm2001_vm2  ;;  %v686_v15 = vld [vmem:[%s7559_s6 + $0xf8] sm:$0xff] }
 0x565   :  { %4228 = vmatmul.mubr.msk.bf16.vlgmr.msra.gmra.mrb[20].mxu1 %vm6360_vm3, %v7859_v10  ;;  %4230 = vmatmul.mubr.msk.bf16.vlgmr.msra.gmra.mrb[20].mxu0 %vm6360_vm3, %v7859_v10  ;;  %8204 = vst [vmem:[#allocation170_spill] sm:$0xff] %v6378_v2  ;;  %8207 = vst [vmem:[#allocation173_spill] sm:$0xff] %v6386_v41  ;;  %v681_v10 = vld [vmem:[%s7559_s6 + $0xd0] sm:$0xff] }
 0x566   :  { %2408 = vmatpush1.bf16.msra.mxu1 %v6329_v55  ;;  %2449 = vmatpush1.bf16.msra.mxu0 %v6333_v4  ;;  %v685_v4 = vld [vmem:[%s7559_s6 + $0xf0] sm:$0xff]  ;;  %v6412_v55 = vcombine.high %v682_v1, %v686_v15 }
 0x567   :  { %2409 = vmatprep.subr.bf16.mxu1 %v6350_v7  ;;  %2450 = vmatprep.subr.bf16.mxu0 %v6352_v19  ;;  %v6406_v19 = vcombine.low %v674_v59, %v678_v17  ;;  %v6410_v7 = vcombine.high %v681_v10, %v685_v4  ;;  %v6428_v59 = vcombine.low %v681_v10, %v685_v4  ;;  %v698_v4 = vld [vmem:[%s7559_s6 + $0x158] sm:$0xff] }
 0x568   :  { %2439 = vmatprep.mubr.bf16.mxu1 %v8208_v63  ;;  %2480 = vmatprep.mubr.bf16.mxu0 %v8208_v63  ;;  %8212 = vst [vmem:[#allocation177_spill] sm:$0xff] %v6412_v55  ;;  %v6430_v17 = vcombine.low %v682_v1, %v686_v15  ;;  %v702_v10 = vld [vmem:[%s7559_s6 + $0x178] sm:$0xff]  ;;  %v6454_v15 = vcombine.low %v690_v50, %v694_v6 }
 0x569   :  { %8210 = vst [vmem:[#allocation175_spill] sm:$0xff] %v6406_v19  ;;  %8211 = vst [vmem:[#allocation176_spill] sm:$0xff] %v6410_v7 }
 0x56a   :  { %2410 = vmatpush1.bf16.msra.mxu1 %v6378_v2  ;;  %2451 = vmatpush1.bf16.msra.mxu0 %v6380_v62  ;;  %v693_v62 = vld [vmem:[%s7559_s6 + $0x130] sm:$0xff]  ;;  %8213 = vst [vmem:[#allocation178_spill] sm:$0xff] %v6428_v59  ;;  %8214 = vst [vmem:[#allocation179_spill] sm:$0xff] %v6430_v17 }
 0x56b   :  { %2411 = vmatprep.subr.bf16.mxu1 %v6384_v57  ;;  %2452 = vmatprep.subr.bf16.mxu0 %v6386_v41  ;;  %v6434_v41 = vcombine.high %v689_v35, %v693_v62  ;;  %v6436_v57 = vcombine.high %v690_v50, %v694_v6  ;;  %v697_v2 = vld [vmem:[%s7559_s6 + $0x150] sm:$0xff]  ;;  %v6452_v1 = vcombine.low %v689_v35, %v693_v62  ;;  %v706_v35 = vld [vmem:[%s7559_s6 + $0x198] sm:$0xff] }
 0x56c   :  { %8218 = vst [vmem:[#allocation183_spill] sm:$0xff] %v6454_v15  ;;  %v710_v62 = vld [vmem:[%s7559_s6 + $0x1b8] sm:$0xff]  ;;  %v6478_v6 = vcombine.low %v698_v4, %v702_v10 }
 0x56d   :  { %8215 = vst [vmem:[#allocation180_spill] sm:$0xff] %v6434_v41  ;;  %8216 = vst [vmem:[#allocation181_spill] sm:$0xff] %v6436_v57 }
 0x56e   :  { %2412 = vmatpush1.bf16.msra.mxu1 %v6404_v0  ;;  %2453 = vmatpush1.bf16.msra.mxu0 %v6406_v19  ;;  %v701_v19 = vld [vmem:[%s7559_s6 + $0x170] sm:$0xff]  ;;  %8217 = vst [vmem:[#allocation182_spill] sm:$0xff] %v6452_v1  ;;  %8222 = vst [vmem:[#allocation187_spill] sm:$0xff] %v6478_v6 }
 0x56f   :  { %2413 = vmatprep.subr.bf16.mxu1 %v6410_v7  ;;  %2454 = vmatprep.subr.bf16.mxu0 %v6412_v55  ;;  %v6458_v55 = vcombine.high %v697_v2, %v701_v19  ;;  %v6460_v7 = vcombine.high %v698_v4, %v702_v10  ;;  %v705_v0 = vld [vmem:[%s7559_s6 + $0x190] sm:$0xff]  ;;  %v6476_v50 = vcombine.low %v697_v2, %v701_v19  ;;  %v714_v2 = vld [vmem:[%s7559_s6 + $0x1d8] sm:$0xff] }
 0x570   :  { %v718_v19 = vld [vmem:[%s7559_s6 + $0x1f8] sm:$0xff]  ;;  %v6502_v10 = vcombine.low %v706_v35, %v710_v62 }
 0x571   :  { %8219 = vst [vmem:[#allocation184_spill] sm:$0xff] %v6458_v55  ;;  %8220 = vst [vmem:[#allocation185_spill] sm:$0xff] %v6460_v7 }
 0x572   :  { %2414 = vmatpush1.bf16.msra.mxu1 %v6428_v59  ;;  %2455 = vmatpush1.bf16.msra.mxu0 %v6430_v17  ;;  %v709_v17 = vld [vmem:[%s7559_s6 + $0x1b0] sm:$0xff]  ;;  %8221 = vst [vmem:[#allocation186_spill] sm:$0xff] %v6476_v50  ;;  %8226 = vst [vmem:[#allocation191_spill] sm:$0xff] %v6502_v10 }
 0x573   :  { %2415 = vmatprep.subr.bf16.mxu1 %v6434_v41  ;;  %2456 = vmatprep.subr.bf16.mxu0 %v6436_v57  ;;  %v6482_v57 = vcombine.high %v705_v0, %v709_v17  ;;  %v6484_v41 = vcombine.high %v706_v35, %v710_v62  ;;  %v713_v59 = vld [vmem:[%s7559_s6 + $0x1d0] sm:$0xff]  ;;  %v6500_v4 = vcombine.low %v705_v0, %v709_v17  ;;  %v8231_v0 = vmov 1.0|1.0   ;;  %v8244_v35 = vld [vmem:[#allocation129_spill] sm:$0xff] }
 0x574   :  { %v8242_v17 = vld [vmem:[#allocation128_spill] sm:$0xff]  ;;  %v8245_v62 = vld [vmem:[#allocation17_spill] sm:$0xff] }
 0x575   :  { %8223 = vst [vmem:[#allocation188_spill] sm:$0xff] %v6482_v57  ;;  %8224 = vst [vmem:[#allocation189_spill] sm:$0xff] %v6484_v41 }
 0x576   :  { %2416 = vmatpush1.bf16.msra.mxu1 %v6452_v1  ;;  %2457 = vmatpush1.bf16.msra.mxu0 %v6454_v15  ;;  %v717_v15 = vld [vmem:[%s7559_s6 + $0x1f0] sm:$0xff]  ;;  %8225 = vst [vmem:[#allocation190_spill] sm:$0xff] %v6500_v4 }
 0x577   :  { %2417 = vmatprep.subr.bf16.mxu1 %v6458_v55  ;;  %2458 = vmatprep.subr.bf16.mxu0 %v6460_v7  ;;  %v6506_v7 = vcombine.high %v713_v59, %v717_v15  ;;  %v6508_v55 = vcombine.high %v714_v2, %v718_v19  ;;  %v6512_v1 = vcombine.low %v713_v59, %v717_v15  ;;  %v8240_v59 = vld [vmem:[#allocation127_spill] sm:$0xff]  ;;  %v8243_v15 = vld [vmem:[#allocation16_spill] sm:$0xff] }
 0x579   :  { %8227 = vst [vmem:[#allocation192_spill] sm:$0xff] %v6506_v7  ;;  %8228 = vst [vmem:[#allocation193_spill] sm:$0xff] %v6508_v55 }
 0x57a   :  { %2418 = vmatpush1.bf16.msra.mxu1 %v6476_v50  ;;  %2459 = vmatpush1.bf16.msra.mxu0 %v6478_v6  ;;  %8229 = vst [vmem:[#allocation194_spill] sm:$0xff] %v6512_v1  ;;  %v6514_v50 = vcombine.low %v714_v2, %v718_v19  ;;  %v8246_v2 = vld [vmem:[#allocation130_spill] sm:$0xff] }
 0x57b   :  { %2419 = vmatprep.subr.bf16.mxu1 %v6482_v57  ;;  %2460 = vmatprep.subr.bf16.mxu0 %v6484_v41  ;;  %v8247_v19 = vld [vmem:[#allocation18_spill] sm:$0xff] }
 0x57c   :  { %8230 = vst [vmem:[#allocation195_spill] sm:$0xff] %v6514_v50 }
 0x57e   :  { %2420 = vmatpush1.bf16.msra.mxu1 %v6500_v4  ;;  %2461 = vmatpush1.bf16.msra.mxu0 %v6502_v10 }
 0x57f   :  { %2421 = vmatprep.subr.bf16.mxu1 %v6506_v7  ;;  %2462 = vmatprep.subr.bf16.mxu0 %v6508_v55 }
 0x582   :  { %2422 = vmatpush1.bf16.msra.mxu1 %v6512_v1  ;;  %2463 = vmatpush1.bf16.msra.mxu0 %v6514_v50 }
 0x583   :  { %2589 = vmatprep.subr.bf16.mxu0 %v4858_v29  ;;  %4312 = vmatprep.subr.bf16.mxu1 %v5831_v25  ;;  %v8232_v25 = vld [vmem:[#allocation123_spill] sm:$0xff] }
 0x585   :  { %4232 = vmatmul.mubr.msk.bf16.vlgmr.msra.gmra.mrb[24].mxu1 %vm6360_vm3, %v8231_v0  ;;  %4234 = vmatmul.mubr.msk.bf16.vlgmr.msra.gmra.mrb[24].mxu0 %vm6360_vm3, %v8231_v0 }
 0x586   :  { %2590 = vmatpush1.bf16.msra.mxu0 %v4860_v30  ;;  %4313 = vmatpush3.bf16.msra.mxu1 %v5836_v23  ;;  %v8233_v23 = vld [vmem:[#allocation11_spill] sm:$0xff] }
 0x587   :  { %2591 = vmatprep.subr.bf16.mxu0 %v4869_v33  ;;  %4314 = vmatprep.subr.bf16.mxu1 %v5850_v53  ;;  %v8234_v53 = vld [vmem:[#allocation124_spill] sm:$0xff] }
 0x58a   :  { %2592 = vmatpush1.bf16.msra.mxu0 %v4881_v37  ;;  %4315 = vmatpush3.bf16.msra.mxu1 %v5856_v44  ;;  %v8235_v44 = vld [vmem:[#allocation12_spill] sm:$0xff] }
 0x58b   :  { %2593 = vmatprep.subr.bf16.mxu0 %v4887_v39  ;;  %4316 = vmatprep.subr.bf16.mxu1 %v5866_v38  ;;  %v8236_v38 = vld [vmem:[#allocation125_spill] sm:$0xff] }
 0x58e   :  { %2594 = vmatpush1.bf16.msra.mxu0 %v4899_v43  ;;  %4317 = vmatpush3.bf16.msra.mxu1 %v5874_v26  ;;  %v8237_v26 = vld [vmem:[#allocation13_spill] sm:$0xff] }
 0x58f   :  { %2595 = vmatprep.subr.bf16.mxu0 %v4905_v45  ;;  %4318 = vmatprep.subr.bf16.mxu1 %v5882_v3  ;;  %v8239_v3 = vld [vmem:[#allocation14_spill] sm:$0xff] }
 0x592   :  { %2596 = vmatpush1.bf16.msra.mxu0 %v4917_v49  ;;  %4319 = vmatpush3.bf16.msra.mxu1 %v5888_v52  ;;  %v8241_v52 = vld [vmem:[#allocation15_spill] sm:$0xff] }
 0x593   :  { %2597 = vmatprep.subr.bf16.mxu0 %v4923_v51  ;;  %4320 = vmatprep.subr.bf16.mxu1 %v8232_v25  ;;  %v8248_v25 = vld [vmem:[#allocation61_spill] sm:$0xff] }
 0x596   :  { %2598 = vmatpush1.bf16.msra.mxu0 %v8233_v23  ;;  %4321 = vmatpush3.bf16.msra.mxu1 %v8234_v53  ;;  %v8249_v53 = vld [vmem:[#allocation19_spill] sm:$0xff]  ;;  %v8266_v23 = vld [vmem:[#allocation120_spill] sm:$0xff] }
 0x597   :  { %2599 = vmatprep.subr.bf16.mxu0 %v8235_v44  ;;  %4322 = vmatprep.subr.bf16.mxu1 %v8236_v38  ;;  %v8250_v38 = vld [vmem:[#allocation20_spill] sm:$0xff]  ;;  %v8265_v44 = vld [vmem:[#allocation119_spill] sm:$0xff] }
 0x59a   :  { %2600 = vmatpush1.bf16.msra.mxu0 %v8237_v26  ;;  %4323 = vmatpush3.bf16.msra.mxu1 %v8238_v21  ;;  %v8251_v21 = vld [vmem:[#allocation21_spill] sm:$0xff] }
 0x59b   :  { %2601 = vmatprep.subr.bf16.mxu0 %v8239_v3  ;;  %4324 = vmatprep.subr.bf16.mxu1 %v8240_v59  ;;  %v8252_v59 = vld [vmem:[#allocation22_spill] sm:$0xff] }
 0x59e   :  { %2602 = vmatpush1.bf16.msra.mxu0 %v8241_v52  ;;  %4325 = vmatpush3.bf16.msra.mxu1 %v8242_v17  ;;  %v8253_v17 = vld [vmem:[#allocation23_spill] sm:$0xff] }
 0x59f   :  { %2603 = vmatprep.subr.bf16.mxu0 %v8243_v15  ;;  %4326 = vmatprep.subr.bf16.mxu1 %v8244_v35  ;;  %v8254_v15 = vld [vmem:[#allocation24_spill] sm:$0xff]  ;;  %v8255_v35 = vld [vmem:[#allocation25_spill] sm:$0xff] }
 0x5a2   :  { %2604 = vmatpush1.bf16.msra.mxu0 %v8245_v62  ;;  %4327 = vmatpush3.bf16.msra.mxu1 %v8246_v2  ;;  %v8256_v62 = vld [vmem:[#allocation26_spill] sm:$0xff]  ;;  %v8257_v2 = vld [vmem:[#allocation27_spill] sm:$0xff] }
 0x5a3   :  { %2605 = vmatprep.subr.bf16.mxu0 %v8247_v19  ;;  %2630 = vmatprep.subr.bf16.mxu1 %v8248_v25  ;;  %v8258_v19 = vld [vmem:[#allocation28_spill] sm:$0xff]  ;;  %v8259_v25 = vld [vmem:[#allocation29_spill] sm:$0xff] }
 0x5a6   :  { %2606 = vmatpush1.bf16.msra.mxu0 %v8249_v53  ;;  %v8260_v53 = vld [vmem:[#allocation30_spill] sm:$0xff] }
 0x5a7   :  { %2607 = vmatprep.subr.bf16.mxu0 %v8250_v38  ;;  %v8261_v38 = vld [vmem:[#allocation31_spill] sm:$0xff] }
 0x5aa   :  { %2608 = vmatpush1.bf16.msra.mxu0 %v8251_v21  ;;  %v8262_v21 = vld [vmem:[#allocation57_spill] sm:$0xff] }
 0x5ab   :  { %2609 = vmatprep.subr.bf16.mxu0 %v8252_v59  ;;  %v8263_v59 = vld [vmem:[#allocation58_spill] sm:$0xff] }
 0x5ae   :  { %2610 = vmatpush1.bf16.msra.mxu0 %v8253_v17  ;;  %v8264_v17 = vld [vmem:[#allocation32_spill] sm:$0xff] }
 0x5af   :  { %2611 = vmatprep.subr.bf16.mxu0 %v8254_v15 }
 0x5b2   :  { %2612 = vmatpush1.bf16.msra.mxu0 %v8255_v35 }
 0x5b3   :  { %2613 = vmatprep.subr.bf16.mxu0 %v8256_v62 }
 0x5b6   :  { %2614 = vmatpush1.bf16.msra.mxu0 %v8257_v2 }
 0x5b7   :  { %2615 = vmatprep.subr.bf16.mxu0 %v8258_v19 }
 0x5ba   :  { %2616 = vmatpush1.bf16.msra.mxu0 %v8259_v25 }
 0x5bb   :  { %2617 = vmatprep.subr.bf16.mxu0 %v8260_v53 }
 0x5be   :  { %2618 = vmatpush1.bf16.msra.mxu0 %v8261_v38 }
 0x5bf   :  { %2619 = vmatprep.subr.bf16.mxu0 %v8262_v21 }
 0x5c2   :  { %2620 = vmatpush1.bf16.msra.mxu0 %v8263_v59 }
 0x5c3   :  { %2671 = vmatprep.subr.bf16.mxu0 %v8264_v17 }
 0x638   :  { %v2359_v15 = vpop.f32.mrb[20].mxu1  ;;  %v2400_v35 = vpop.f32.mrb[20].mxu0 }
 0x639   :  { %v2360_v62 = vadd.f32 %v2359_v15, %v6087_v61  ;;  %v2401_v2 = vadd.f32 %v2400_v35, %v6097_v42  ;;  %v2361_v52 = vpop.f32.mrb[21].mxu1  ;;  %v2402_v19 = vpop.f32.mrb[21].mxu0 }
 0x63a   :  { %v2362_v25 = vadd.f32 %v2361_v52, %v6092_v20  ;;  %v2403_v53 = vadd.f32 %v2402_v19, %v6101_v13  ;;  %v2363_v3 = vpop.f32.mrb[22].mxu1  ;;  %v2404_v38 = vpop.f32.mrb[22].mxu0 }
 0x63b   :  { %v2364_v26 = vpop.f32.mrb[23].mxu1  ;;  %v2405_v21 = vpop.f32.mrb[23].mxu0  ;;  %v2489_v59 = vadd.f32 %v2360_v62, %v8265_v44  ;;  %v2491_v17 = vadd.f32 %v2401_v2, %v5947_v54 }
 0x63c   :  { %v2490_v51 = vadd.f32 %v2362_v25, %v8266_v23  ;;  %v2492_v61 = vadd.f32 %v2403_v53, %v5953_v18 }
 0x63d   :  { %v4235_v15 = vmul.f32 -1.442695, %v2489_v59  ;;  %v4237_v42 = vmul.f32 -1.442695, %v2491_v17 }
 0x63e   :  { %v4236_v35 = vmul.f32 -1.442695, %v2490_v51  ;;  %v4238_v49 = vmul.f32 -1.442695, %v2492_v61 }
 0x63f   :  { %4556 = vpow2.f32 %v4235_v15 }
 0x640   :  { %4558 = vpow2.f32 %v4237_v42  ;;  %v8267_v42 = vld [vmem:[#allocation121_spill] sm:$0xff] }
 0x641   :  { %4560 = vpow2.f32 %v4236_v35 }
 0x642   :  { %4562 = vpow2.f32 %v4238_v49 }
 0x649   :  { %v4557_v20 = vpop.eup %4556 }
 0x64a   :  { %v4559_v13 = vpop.eup %4558  ;;  %v2503_v52 = vadd.f32 1.0, %v4557_v20 }
 0x64b   :  { %v4561_v26 = vpop.eup %4560  ;;  %v2515_v62 = vadd.f32 1.0, %v4559_v13 }
 0x64c   :  { %v4563_v3 = vpop.eup %4562  ;;  %v2504_v19 = vadd.f32 1.0, %v4561_v26  ;;  %4564 = vrcp.f32 %v2503_v52 }
 0x64d   :  { %v2516_v38 = vadd.f32 1.0, %v4563_v3  ;;  %4566 = vrcp.f32 %v2515_v62 }
 0x64e   :  { %4568 = vrcp.f32 %v2504_v19 }
 0x64f   :  { %4570 = vrcp.f32 %v2516_v38 }
 0x658   :  { %v2441_v21 = vpop.f32.mrb[24].mxu1  ;;  %v2482_v25 = vpop.f32.mrb[24].mxu0 }
 0x659   :  { %v2442_v53 = vadd.f32 %v2441_v21, %v6099_v12  ;;  %v2483_v51 = vadd.f32 %v2482_v25, %v6105_v9  ;;  %v2443_v59 = vpop.f32.mrb[25].mxu1  ;;  %v2484_v17 = vpop.f32.mrb[25].mxu0  ;;  %v8268_v12 = vld [vmem:[#allocation122_spill] sm:$0xff] }
 0x65a   :  { %v2444_v49 = vadd.f32 %v2443_v59, %v6103_v36  ;;  %v2485_v2 = vadd.f32 %v2484_v17, %v6107_v5  ;;  %v2445_v61 = vpop.f32.mrb[26].mxu1  ;;  %v2486_v15 = vpop.f32.mrb[26].mxu0 }
 0x65b   :  { %v2493_v35 = vadd.f32 %v2442_v53, %v8267_v42  ;;  %v2495_v20 = vadd.f32 %v2483_v51, %v5967_v58  ;;  %v2446_v13 = vpop.f32.mrb[27].mxu1  ;;  %v2487_v26 = vpop.f32.mrb[27].mxu0 }
 0x65c   :  { %v2494_v3 = vadd.f32 %v2444_v49, %v8268_v12  ;;  %v2496_v9 = vadd.f32 %v2485_v2, %v5973_v14  ;;  %v4565_v5 = vpop.eup %4564 }
 0x65d   :  { %4572 = vtanh.f32 %v2493_v35  ;;  %v4239_v52 = vmul.f32 -1.442695, %v2495_v20  ;;  %v4567_v62 = vpop.eup %4566 }
 0x65e   :  { %4574 = vtanh.f32 %v2494_v3  ;;  %v4240_v36 = vmul.f32 -1.442695, %v2496_v9  ;;  %v4569_v19 = vpop.eup %4568  ;;  %v2535_v51 = vmul.f32 %v4567_v62, %v5957_v34  ;;  %v8270_v62 = vld [vmem:[#allocation63_spill] sm:$0xff] }
 0x65f   :  { %4576 = vpow2.f32 %v4239_v52  ;;  %v4571_v21 = vpop.eup %4570 }
 0x660   :  { %4578 = vpow2.f32 %v4240_v36  ;;  %v2536_v17 = vmul.f32 %v4571_v21, %v5959_v60  ;;  %v8272_v21 = vld [vmem:[#allocation64_spill] sm:$0xff] }
 0x667   :  { %v4573_v25 = vpop.eup %4572 }
 0x668   :  { %v4575_v53 = vpop.eup %4574  ;;  %v2537_v59 = vmul.f32 %v4573_v25, %v4565_v5  ;;  %v8269_v5 = vld [vmem:[#allocation34_spill] sm:$0xff]  ;;  %v8273_v25 = vld [vmem:[#allocation36_spill] sm:$0xff] }
 0x669   :  { %v4577_v38 = vpop.eup %4576  ;;  %v2538_v49 = vmul.f32 %v4575_v53, %v4569_v19  ;;  %v8271_v19 = vld [vmem:[#allocation35_spill] sm:$0xff]  ;;  %v8274_v53 = vld [vmem:[#allocation65_spill] sm:$0xff] }
 0x66a   :  { %v4579_v2 = vpop.eup %4578  ;;  %v6594_v61 = vadd.f32 %v2537_v59, %v2535_v51  ;;  %v2529_v15 = vadd.f32 1.0, %v4577_v38  ;;  %v8275_v51 = vld [vmem:[#allocation37_spill] sm:$0xff]  ;;  %v8276_v59 = vld [vmem:[#allocation66_spill] sm:$0xff] }
 0x66b   :  { %v6596_v35 = vadd.f32 %v2538_v49, %v2536_v17  ;;  %v2530_v20 = vadd.f32 1.0, %v4579_v2  ;;  %v8277_v38 = vld [vmem:[#allocation38_spill] sm:$0xff]  ;;  %v8278_v17 = vld [vmem:[#allocation67_spill] sm:$0xff]  ;;  %v8280_v2 = vld [vmem:[#allocation68_spill] sm:$0xff] }
 0x66c   :  { %4580 = vtanh.f32 %v6594_v61  ;;  %v8279_v49 = vld [vmem:[#allocation39_spill] sm:$0xff] }
 0x66d   :  { %4582 = vrcp.f32 %v2529_v15  ;;  %v8281_v15 = vld [vmem:[#allocation40_spill] sm:$0xff] }
 0x66e   :  { %4584 = vtanh.f32 %v6596_v35 }
 0x66f   :  { %4586 = vrcp.f32 %v2530_v20  ;;  %v8282_v20 = vld [vmem:[#allocation69_spill] sm:$0xff] }
 0x676   :  { %v4581_v13 = vpop.eup %4580 }
 0x677   :  { %v4583_v34 = vpop.eup %4582 }
 0x678   :  { %v4585_v26 = vpop.eup %4584  ;;  %v2543_v9 = vmul.f32 %v4583_v34, %v4581_v13  ;;  %v8283_v13 = vld [vmem:[#allocation41_spill] sm:$0xff]  ;;  %v8284_v34 = vld [vmem:[#allocation70_spill] sm:$0xff] }
 0x679   :  { %v4587_v3 = vpop.eup %4586 }
 0x67a   :  { %v2544_v60 = vmul.f32 %v4587_v3, %v4585_v26  ;;  %v6602_v36 = vpack.c.bf16 %v2543_v9, %v2543_v9  ;;  %v8285_v26 = vld [vmem:[#allocation42_spill] sm:$0xff]  ;;  %v8286_v3 = vld [vmem:[#allocation71_spill] sm:$0xff] }
 0x67b   :  { %v8287_v9 = vld [vmem:[#allocation43_spill] sm:$0xff] }
 0x67c   :  { %v6600_v52 = vpack.c.bf16 %v2544_v60, %v2544_v60  ;;  %v8288_v60 = vld [vmem:[#allocation72_spill] sm:$0xff] }
 0x67e   :  { %2579 = vmatprep.mubr.bf16.mxu1 %v6600_v52  ;;  %2621 = vmatprep.mubr.bf16.mxu0 %v6600_v52 }
 0x67f   :  { %2580 = vmatmul.mubr.bf16.vlgmr.msra.gmra.mrb[28].mxu1 %v6602_v36  ;;  %2622 = vmatmul.mubr.bf16.vlgmr.msra.gmra.mrb[28].mxu0 %v6602_v36 }
 0x680   :  { %2631 = vmatpush1.bf16.msra.mxu1 %v5372_v27  ;;  %2672 = vmatpush1.bf16.msra.mxu0 %v5174_v31 }
 0x681   :  { %2662 = vmatprep.mubr.bf16.mxu1 %v6600_v52  ;;  %2703 = vmatprep.mubr.bf16.mxu0 %v6600_v52 }
 0x682   :  { %2632 = vmatprep.subr.bf16.mxu1 %v5397_v16  ;;  %2673 = vmatprep.subr.bf16.mxu0 %v5177_v32 }
 0x684   :  { %2633 = vmatpush1.bf16.msra.mxu1 %v5411_v22  ;;  %2674 = vmatpush1.bf16.msra.mxu0 %v5186_v40 }
 0x685   :  { %2634 = vmatprep.subr.bf16.mxu1 %v5414_v46  ;;  %2675 = vmatprep.subr.bf16.mxu0 %v5189_v56 }
 0x688   :  { %2635 = vmatpush1.bf16.msra.mxu1 %v5423_v24  ;;  %2676 = vmatpush1.bf16.msra.mxu0 %v5198_v47 }
 0x689   :  { %2636 = vmatprep.subr.bf16.mxu1 %v5426_v28  ;;  %2677 = vmatprep.subr.bf16.mxu0 %v5201_v48 }
 0x68c   :  { %2637 = vmatpush1.bf16.msra.mxu1 %v5435_v11  ;;  %2678 = vmatpush1.bf16.msra.mxu0 %v8269_v5 }
 0x68d   :  { %2638 = vmatprep.subr.bf16.mxu1 %v8270_v62  ;;  %2679 = vmatprep.subr.bf16.mxu0 %v8271_v19 }
 0x690   :  { %2639 = vmatpush1.bf16.msra.mxu1 %v8272_v21  ;;  %2680 = vmatpush1.bf16.msra.mxu0 %v8273_v25 }
 0x691   :  { %2640 = vmatprep.subr.bf16.mxu1 %v8274_v53  ;;  %2681 = vmatprep.subr.bf16.mxu0 %v8275_v51  ;;  %v8384_v51 = vld [vmem:[#allocation131_spill] sm:$0xff] }
 0x694   :  { %2641 = vmatpush1.bf16.msra.mxu1 %v8276_v59  ;;  %2682 = vmatpush1.bf16.msra.mxu0 %v8277_v38 }
 0x695   :  { %2642 = vmatprep.subr.bf16.mxu1 %v8278_v17  ;;  %2683 = vmatprep.subr.bf16.mxu0 %v8279_v49  ;;  %v8289_v17 = vld [vmem:[#allocation44_spill] sm:$0xff]  ;;  %v8290_v49 = vld [vmem:[#allocation73_spill] sm:$0xff] }
 0x698   :  { %2643 = vmatpush1.bf16.msra.mxu1 %v8280_v2  ;;  %2684 = vmatpush1.bf16.msra.mxu0 %v8281_v15  ;;  %v8291_v2 = vld [vmem:[#allocation45_spill] sm:$0xff]  ;;  %v8292_v15 = vld [vmem:[#allocation74_spill] sm:$0xff] }
 0x699   :  { %2644 = vmatprep.subr.bf16.mxu1 %v8282_v20  ;;  %2685 = vmatprep.subr.bf16.mxu0 %v8283_v13  ;;  %v8293_v20 = vld [vmem:[#allocation46_spill] sm:$0xff]  ;;  %v8294_v13 = vld [vmem:[#allocation75_spill] sm:$0xff] }
 0x69c   :  { %2645 = vmatpush1.bf16.msra.mxu1 %v8284_v34  ;;  %2686 = vmatpush1.bf16.msra.mxu0 %v8285_v26  ;;  %v8295_v34 = vld [vmem:[#allocation47_spill] sm:$0xff]  ;;  %v8296_v26 = vld [vmem:[#allocation76_spill] sm:$0xff] }
 0x69d   :  { %2646 = vmatprep.subr.bf16.mxu1 %v8286_v3  ;;  %2687 = vmatprep.subr.bf16.mxu0 %v8287_v9  ;;  %v8297_v3 = vld [vmem:[#allocation48_spill] sm:$0xff]  ;;  %v8298_v9 = vld [vmem:[#allocation77_spill] sm:$0xff] }
 0x6a0   :  { %2647 = vmatpush1.bf16.msra.mxu1 %v8288_v60  ;;  %2688 = vmatpush1.bf16.msra.mxu0 %v8289_v17  ;;  %v8299_v60 = vld [vmem:[#allocation49_spill] sm:$0xff]  ;;  %v8300_v17 = vld [vmem:[#allocation78_spill] sm:$0xff] }
 0x6a1   :  { %2648 = vmatprep.subr.bf16.mxu1 %v8290_v49  ;;  %2689 = vmatprep.subr.bf16.mxu0 %v8291_v2  ;;  %v8301_v49 = vld [vmem:[#allocation50_spill] sm:$0xff]  ;;  %v8302_v2 = vld [vmem:[#allocation79_spill] sm:$0xff] }
 0x6a4   :  { %2649 = vmatpush1.bf16.msra.mxu1 %v8292_v15  ;;  %2690 = vmatpush1.bf16.msra.mxu0 %v8293_v20  ;;  %v8303_v15 = vld [vmem:[#allocation51_spill] sm:$0xff]  ;;  %v8304_v20 = vld [vmem:[#allocation80_spill] sm:$0xff] }
 0x6a5   :  { %2650 = vmatprep.subr.bf16.mxu1 %v8294_v13  ;;  %2691 = vmatprep.subr.bf16.mxu0 %v8295_v34  ;;  %v8305_v13 = vld [vmem:[#allocation52_spill] sm:$0xff]  ;;  %v8306_v34 = vld [vmem:[#allocation81_spill] sm:$0xff] }
 0x6a8   :  { %2651 = vmatpush1.bf16.msra.mxu1 %v8296_v26  ;;  %2692 = vmatpush1.bf16.msra.mxu0 %v8297_v3  ;;  %v8307_v26 = vld [vmem:[#allocation53_spill] sm:$0xff]  ;;  %v8308_v3 = vld [vmem:[#allocation82_spill] sm:$0xff] }
 0x6a9   :  { %2652 = vmatprep.subr.bf16.mxu1 %v8298_v9  ;;  %2693 = vmatprep.subr.bf16.mxu0 %v8299_v60  ;;  %v8309_v9 = vld [vmem:[#allocation54_spill] sm:$0xff]  ;;  %v8310_v60 = vld [vmem:[#allocation83_spill] sm:$0xff] }
 0x6ac   :  { %2653 = vmatpush1.bf16.msra.mxu1 %v8300_v17  ;;  %2694 = vmatpush1.bf16.msra.mxu0 %v8301_v49  ;;  %v8311_v17 = vld [vmem:[#allocation55_spill] sm:$0xff]  ;;  %v8312_v49 = vld [vmem:[#allocation84_spill] sm:$0xff] }
 0x6ad   :  { %2654 = vmatprep.subr.bf16.mxu1 %v8302_v2  ;;  %2695 = vmatprep.subr.bf16.mxu0 %v8303_v15  ;;  %v8313_v2 = vld [vmem:[#allocation56_spill] sm:$0xff]  ;;  %v8314_v15 = vld [vmem:[#allocation85_spill] sm:$0xff] }
 0x6b0   :  { %2655 = vmatpush1.bf16.msra.mxu1 %v8304_v20  ;;  %2696 = vmatpush1.bf16.msra.mxu0 %v8305_v13  ;;  %v8315_v20 = vld [vmem:[#allocation59_spill] sm:$0xff]  ;;  %v8316_v13 = vld [vmem:[#allocation86_spill] sm:$0xff] }
 0x6b1   :  { %2656 = vmatprep.subr.bf16.mxu1 %v8306_v34  ;;  %2697 = vmatprep.subr.bf16.mxu0 %v8307_v26  ;;  %v8317_v34 = vld [vmem:[#allocation60_spill] sm:$0xff]  ;;  %v8318_v26 = vld [vmem:[#allocation87_spill] sm:$0xff] }
 0x6b4   :  { %2657 = vmatpush1.bf16.msra.mxu1 %v8308_v3  ;;  %2698 = vmatpush1.bf16.msra.mxu0 %v8309_v9  ;;  %v8319_v3 = vld [vmem:[#allocation132_spill] sm:$0xff] }
 0x6b5   :  { %2658 = vmatprep.subr.bf16.mxu1 %v8310_v60  ;;  %2699 = vmatprep.subr.bf16.mxu0 %v8311_v17  ;;  %v8320_v17 = vld [vmem:[#allocation88_spill] sm:$0xff]  ;;  %v8334_v60 = vld [vmem:[#allocation146_spill] sm:$0xff] }
 0x6b8   :  { %2659 = vmatpush1.bf16.msra.mxu1 %v8312_v49  ;;  %2700 = vmatpush1.bf16.msra.mxu0 %v8313_v2  ;;  %v8321_v2 = vld [vmem:[#allocation89_spill] sm:$0xff]  ;;  %v8328_v49 = vld [vmem:[#allocation92_spill] sm:$0xff] }
 0x6b9   :  { %2660 = vmatprep.subr.bf16.mxu1 %v8314_v15  ;;  %2701 = vmatprep.subr.bf16.mxu0 %v8315_v20  ;;  %v8322_v15 = vld [vmem:[#allocation133_spill] sm:$0xff]  ;;  %v8323_v20 = vld [vmem:[#allocation136_spill] sm:$0xff] }
 0x6bc   :  { %2661 = vmatpush1.bf16.msra.mxu1 %v8316_v13  ;;  %2702 = vmatpush1.bf16.msra.mxu0 %v8317_v34  ;;  %v8324_v34 = vld [vmem:[#allocation90_spill] sm:$0xff]  ;;  %v8327_v13 = vld [vmem:[#allocation140_spill] sm:$0xff] }
 0x6bd   :  { %2712 = vmatprep.subr.bf16.mxu1 %v8318_v26  ;;  %2775 = vmatprep.subr.bf16.mxu0 %v8319_v3  ;;  %v8325_v26 = vld [vmem:[#allocation91_spill] sm:$0xff]  ;;  %v8326_v3 = vld [vmem:[#allocation138_spill] sm:$0xff] }
 0x6bf   :  { %2663 = vmatmul.mubr.bf16.vlgmr.msra.gmra.mrb[32].mxu1 %v6602_v36  ;;  %2704 = vmatmul.mubr.bf16.vlgmr.msra.gmra.mrb[32].mxu0 %v6602_v36 }
 0x6c0   :  { %2713 = vmatpush1.bf16.msra.mxu1 %v8320_v17  ;;  %2744 = vmatprep.mubr.bf16.mxu1 %v6600_v52  ;;  %v8329_v17 = vld [vmem:[#allocation93_spill] sm:$0xff]  ;;  %v8330_v52 = vld [vmem:[#allocation142_spill] sm:$0xff] }
 0x6c1   :  { %2714 = vmatprep.subr.bf16.mxu1 %v8321_v2  ;;  %2776 = vmatpush1.bf16.msra.mxu0 %v8322_v15  ;;  %v8331_v2 = vld [vmem:[#allocation144_spill] sm:$0xff]  ;;  %v8332_v15 = vld [vmem:[#allocation94_spill] sm:$0xff] }
 0x6c2   :  { %2777 = vmatprep.subr.bf16.mxu0 %v8323_v20  ;;  %2807 = vmatprep.mubr.bf16.mxu0 %v8208_v63  ;;  %v8333_v20 = vld [vmem:[#allocation95_spill] sm:$0xff] }
 0x6c4   :  { %2715 = vmatpush1.bf16.msra.mxu1 %v8324_v34  ;;  %v8335_v34 = vld [vmem:[#allocation148_spill] sm:$0xff] }
 0x6c5   :  { %2716 = vmatprep.subr.bf16.mxu1 %v8325_v26  ;;  %2778 = vmatpush1.bf16.msra.mxu0 %v8326_v3  ;;  %v8336_v26 = vld [vmem:[#allocation96_spill] sm:$0xff]  ;;  %v8337_v3 = vld [vmem:[#allocation97_spill] sm:$0xff] }
 0x6c6   :  { %2779 = vmatprep.subr.bf16.mxu0 %v8327_v13 }
 0x6c8   :  { %2717 = vmatpush1.bf16.msra.mxu1 %v8328_v49  ;;  %v8338_v49 = vld [vmem:[#allocation152_spill] sm:$0xff] }
 0x6c9   :  { %2718 = vmatprep.subr.bf16.mxu1 %v8329_v17  ;;  %2780 = vmatpush1.bf16.msra.mxu0 %v8330_v52  ;;  %v8339_v17 = vld [vmem:[#allocation98_spill] sm:$0xff]  ;;  %v8340_v52 = vld [vmem:[#allocation99_spill] sm:$0xff] }
 0x6ca   :  { %2781 = vmatprep.subr.bf16.mxu0 %v8331_v2  ;;  %v8341_v2 = vld [vmem:[#allocation154_spill] sm:$0xff] }
 0x6cc   :  { %2719 = vmatpush1.bf16.msra.mxu1 %v8332_v15  ;;  %v8342_v15 = vld [vmem:[#allocation156_spill] sm:$0xff] }
 0x6cd   :  { %2720 = vmatprep.subr.bf16.mxu1 %v8333_v20  ;;  %2782 = vmatpush1.bf16.msra.mxu0 %v8334_v60  ;;  %v8343_v20 = vld [vmem:[#allocation100_spill] sm:$0xff]  ;;  %v8344_v60 = vld [vmem:[#allocation101_spill] sm:$0xff] }
 0x6ce   :  { %2783 = vmatprep.subr.bf16.mxu0 %v8335_v34  ;;  %v8345_v34 = vld [vmem:[#allocation158_spill] sm:$0xff] }
 0x6d0   :  { %2721 = vmatpush1.bf16.msra.mxu1 %v8336_v26  ;;  %v8346_v26 = vld [vmem:[#allocation160_spill] sm:$0xff] }
 0x6d1   :  { %2722 = vmatprep.subr.bf16.mxu1 %v8337_v3  ;;  %2784 = vmatpush1.bf16.msra.mxu0 %v6242_v8  ;;  %v8347_v3 = vld [vmem:[#allocation102_spill] sm:$0xff]  ;;  %v8348_v8 = vld [vmem:[#allocation103_spill] sm:$0xff] }
 0x6d2   :  { %2785 = vmatprep.subr.bf16.mxu0 %v8338_v49  ;;  %v8349_v49 = vld [vmem:[#allocation162_spill] sm:$0xff] }
 0x6d4   :  { %2723 = vmatpush1.bf16.msra.mxu1 %v8339_v17  ;;  %v8350_v17 = vld [vmem:[#allocation164_spill] sm:$0xff] }
 0x6d5   :  { %2724 = vmatprep.subr.bf16.mxu1 %v8340_v52  ;;  %2786 = vmatpush1.bf16.msra.mxu0 %v8341_v2  ;;  %v8351_v52 = vld [vmem:[#allocation104_spill] sm:$0xff]  ;;  %v8352_v2 = vld [vmem:[#allocation105_spill] sm:$0xff] }
 0x6d6   :  { %2787 = vmatprep.subr.bf16.mxu0 %v8342_v15  ;;  %v8353_v15 = vld [vmem:[#allocation106_spill] sm:$0xff] }
 0x6d8   :  { %2725 = vmatpush1.bf16.msra.mxu1 %v8343_v20  ;;  %v8354_v20 = vld [vmem:[#allocation107_spill] sm:$0xff] }
 0x6d9   :  { %2726 = vmatprep.subr.bf16.mxu1 %v8344_v60  ;;  %2788 = vmatpush1.bf16.msra.mxu0 %v8345_v34  ;;  %v8355_v60 = vld [vmem:[#allocation108_spill] sm:$0xff]  ;;  %v8356_v34 = vld [vmem:[#allocation109_spill] sm:$0xff] }
 0x6da   :  { %2789 = vmatprep.subr.bf16.mxu0 %v8346_v26  ;;  %v8357_v26 = vld [vmem:[#allocation110_spill] sm:$0xff] }
 0x6dc   :  { %2727 = vmatpush1.bf16.msra.mxu1 %v8347_v3  ;;  %v8358_v3 = vld [vmem:[#allocation111_spill] sm:$0xff] }
 0x6dd   :  { %2728 = vmatprep.subr.bf16.mxu1 %v8348_v8  ;;  %2790 = vmatpush1.bf16.msra.mxu0 %v8349_v49  ;;  %v8359_v8 = vld [vmem:[#allocation112_spill] sm:$0xff]  ;;  %v8360_v49 = vld [vmem:[#allocation113_spill] sm:$0xff] }
 0x6de   :  { %2857 = vmatprep.subr.bf16.mxu0 %v8350_v17  ;;  %v8361_v17 = vld [vmem:[#allocation114_spill] sm:$0xff] }
 0x6e0   :  { %2729 = vmatpush1.bf16.msra.mxu1 %v8351_v52  ;;  %v8362_v52 = vld [vmem:[#allocation115_spill] sm:$0xff] }
 0x6e1   :  { %2730 = vmatprep.subr.bf16.mxu1 %v8352_v2  ;;  %v8363_v2 = vld [vmem:[#allocation116_spill] sm:$0xff] }
 0x6e4   :  { %2731 = vmatpush1.bf16.msra.mxu1 %v8353_v15  ;;  %v8364_v15 = vld [vmem:[#allocation117_spill] sm:$0xff] }
 0x6e5   :  { %2732 = vmatprep.subr.bf16.mxu1 %v8354_v20  ;;  %v8365_v20 = vld [vmem:[#allocation118_spill] sm:$0xff] }
 0x6e8   :  { %2733 = vmatpush1.bf16.msra.mxu1 %v8355_v60  ;;  %v8366_v60 = vld [vmem:[#allocation134_spill] sm:$0xff] }
 0x6e9   :  { %2734 = vmatprep.subr.bf16.mxu1 %v8356_v34 }
 0x6ec   :  { %2735 = vmatpush1.bf16.msra.mxu1 %v8357_v26  ;;  %v8367_v26 = vld [vmem:[#allocation135_spill] sm:$0xff] }
 0x6ed   :  { %2736 = vmatprep.subr.bf16.mxu1 %v8358_v3  ;;  %v8378_v3 = vld [vmem:[#allocation157_spill] sm:$0xff] }
 0x6f0   :  { %2737 = vmatpush1.bf16.msra.mxu1 %v8359_v8  ;;  %v8368_v8 = vld [vmem:[#allocation137_spill] sm:$0xff] }
 0x6f1   :  { %2738 = vmatprep.subr.bf16.mxu1 %v8360_v49  ;;  %v8369_v49 = vld [vmem:[#allocation139_spill] sm:$0xff] }
 0x6f4   :  { %2739 = vmatpush1.bf16.msra.mxu1 %v8361_v17  ;;  %v8370_v17 = vld [vmem:[#allocation141_spill] sm:$0xff] }
 0x6f5   :  { %2740 = vmatprep.subr.bf16.mxu1 %v8362_v52  ;;  %v8371_v52 = vld [vmem:[#allocation143_spill] sm:$0xff] }
 0x6f8   :  { %2741 = vmatpush1.bf16.msra.mxu1 %v8363_v2  ;;  %v8372_v2 = vld [vmem:[#allocation145_spill] sm:$0xff] }
 0x6f9   :  { %2742 = vmatprep.subr.bf16.mxu1 %v8364_v15  ;;  %v8373_v15 = vld [vmem:[#allocation147_spill] sm:$0xff] }
 0x6fc   :  { %2743 = vmatpush1.bf16.msra.mxu1 %v8365_v20  ;;  %v8374_v20 = vld [vmem:[#allocation149_spill] sm:$0xff] }
 0x6fd   :  { %2816 = vmatprep.subr.bf16.mxu1 %v8366_v60  ;;  %v8375_v60 = vld [vmem:[#allocation151_spill] sm:$0xff] }
 0x6ff   :  { %2745 = vmatmul.mubr.bf16.vlgmr.msra.gmra.mrb[36].mxu1 %v6602_v36  ;;  %v8376_v36 = vld [vmem:[#allocation153_spill] sm:$0xff] }
 0x700   :  { %2817 = vmatpush1.bf16.msra.mxu1 %v8367_v26  ;;  %2848 = vmatprep.mubr.bf16.mxu1 %v8208_v63  ;;  %v8377_v26 = vld [vmem:[#allocation155_spill] sm:$0xff] }
 0x701   :  { %2818 = vmatprep.subr.bf16.mxu1 %v8368_v8  ;;  %v8379_v8 = vld [vmem:[#allocation159_spill] sm:$0xff] }
 0x704   :  { %2819 = vmatpush1.bf16.msra.mxu1 %v8369_v49  ;;  %v8380_v49 = vld [vmem:[#allocation161_spill] sm:$0xff] }
 0x705   :  { %2820 = vmatprep.subr.bf16.mxu1 %v8370_v17  ;;  %v8381_v17 = vld [vmem:[#allocation163_spill] sm:$0xff] }
 0x708   :  { %2821 = vmatpush1.bf16.msra.mxu1 %v8371_v52  ;;  %v8382_v52 = vld [vmem:[#allocation165_spill] sm:$0xff] }
 0x709   :  { %2822 = vmatprep.subr.bf16.mxu1 %v8372_v2 }
 0x70c   :  { %2823 = vmatpush1.bf16.msra.mxu1 %v8373_v15 }
 0x70d   :  { %2824 = vmatprep.subr.bf16.mxu1 %v8374_v20 }
 0x710   :  { %2825 = vmatpush1.bf16.msra.mxu1 %v8375_v60 }
 0x711   :  { %2826 = vmatprep.subr.bf16.mxu1 %v8376_v36 }
 0x714   :  { %2827 = vmatpush1.bf16.msra.mxu1 %v8377_v26 }
 0x715   :  { %2828 = vmatprep.subr.bf16.mxu1 %v8378_v3 }
 0x718   :  { %2829 = vmatpush1.bf16.msra.mxu1 %v8379_v8  ;;  %v6751_v8 = vld [vmem:[%s7557_s8] ss:$0 sm:$0xff] }
 0x719   :  { %2830 = vmatprep.subr.bf16.mxu1 %v8380_v49  ;;  %8383 = vst [vmem:[#allocation123_spill] sm:$0xff] %v6751_v8 }
 0x71c   :  { %2831 = vmatpush1.bf16.msra.mxu1 %v8381_v17 }
 0x71d   :  { %2898 = vmatprep.subr.bf16.mxu1 %v8382_v52 }
 0x752   :  { %v4328_v2 = vpop.f32.mrb[28].mxu1  ;;  %v6744_v15 = vpop.f32.mrb[28].mxu0 }
 0x753   :  { %v4329_v20 = vpop.f32.mrb[29].mxu1  ;;  %v6746_v34 = vpop.f32.mrb[29].mxu0 }
 0x754   :  { %v4330_v60 = vadd.f32 %v4329_v20, %v4328_v2  ;;  %v4331_v36 = vpop.f32.mrb[30].mxu1  ;;  %v2627_v13 = vpop.f32.mrb[30].mxu0 }
 0x755   :  { %v4332_v26 = vpop.f32.mrb[31].mxu1  ;;  %v2628_v9 = vpop.f32.mrb[31].mxu0 }
 0x756   :  { %v2582_v17 = vadd.f32 %v6751_v8, %v4330_v60 }
 0x758   :  { %4241 = vst [vmem:[%s7558_s9 + $0x8] sm:$0xff] %v2582_v17  ;;  %2753 = vmax.xlane.f32.xlu1 %v2582_v17 }
 0x792   :  { %v6757_v52 = vpop.f32.mrb[32].mxu1  ;;  %v6759_v49 = vpop.f32.mrb[32].mxu0 }
 0x793   :  { %v6761_v2 = vpop.f32.mrb[33].mxu1  ;;  %v6763_v20 = vpop.f32.mrb[33].mxu0 }
 0x794   :  { %v2668_v13 = vpop.f32.mrb[34].mxu1  ;;  %v2709_v26 = vpop.f32.mrb[34].mxu0 }
 0x795   :  { %v2669_v9 = vpop.f32.mrb[35].mxu1  ;;  %v2710_v36 = vpop.f32.mrb[35].mxu0 }
 0x7d2   :  { %v6765_v3 = vpop.f32.mrb[36].mxu1 }
 0x7d3   :  { %v6767_v60 = vpop.f32.mrb[37].mxu1 }
 0x7d4   :  { %v2750_v8 = vpop.f32.mrb[38].mxu1 }
 0x7d5   :  { %v2751_v38 = vpop.f32.mrb[39].mxu1  ;;  %v6844_v8 = vld [vmem:[%s7556_s7 + $0x8] sm:$0xff]  }
 0x7d6   :  { %v8396_v38 = vld [vmem:[#allocation175_spill] sm:$0xff]  ;;  %8411 = vst [vmem:[#allocation127_spill] sm:$0xff] %v6844_v8 }
 0x7e5   :  { %v2754_v59 = vpop.xlane.xlu1 %2753 }
 0x7e6   :  { %vm2755_vm4 = vcmp.eq.f32.partialorder %v2582_v17, %v2754_v59  ;;  %v8395_v59 = vld [vmem:[#allocation174_spill] sm:$0xff]  ;;  %v8397_v17 = vld [vmem:[#allocation176_spill] sm:$0xff] }
 0x7e7   :  { %v2756_v53 = vsel %vm2755_vm4, %v8384_v51, 128 }
 0x7e8   :  { %v2758_v25 = vshra.s32 %v2756_v53, 16  ;;  %v2757_v19 = vand.u32 65535, %v2756_v53  ;;  %v8394_v53 = vld [vmem:[#allocation173_spill] sm:$0xff] }
 0x7ea   :  { %v2760_v21 = vcvt.s32.f32 %v2758_v25  ;;  %v2759_v5 = vcvt.s32.f32 %v2757_v19  ;;  %v8389_v19 = vld [vmem:[#allocation168_spill] sm:$0xff] }
 0x7eb   :  { %v8393_v25 = vld [vmem:[#allocation172_spill] sm:$0xff] }
 0x7ec   :  { %2761 = vmin.xlane.f32.xlu0 %v2760_v21 }
 0x879   :  { %v2762_v62 = vpop.xlane.xlu0 %2761 }
 0x87a   :  { %vm2763_vm5 = vcmp.eq.f32.partialorder %v2760_v21, %v2762_v62  ;;  %v2768_v26 = vcvt.f32.s32 %v2762_v62  ;;  %v8388_v62 = vld [vmem:[#allocation167_spill] sm:$0xff] }
 0x87b   :  { %v2764_v13 = vsel %vm2763_vm5, %v2759_v5, inf  ;;  %v8387_v5 = vld [vmem:[#allocation166_spill] sm:$0xff]  ;;  %v8392_v21 = vld [vmem:[#allocation171_spill] sm:$0xff] }
 0x87c   :  { %2765 = vmin.xlane.f32.xlu1 %v2764_v13  ;;  %v2769_v36 = vshll.u32 %v2768_v26, 16  ;;  %v8398_v13 = vld [vmem:[#allocation177_spill] sm:$0xff]  ;;  %v8399_v26 = vld [vmem:[#allocation178_spill] sm:$0xff] }
 0x909   :  { %v2766_v9 = vpop.xlane.xlu1 %2765 }
 0x90a   :  { %v2767_v11 = vcvt.f32.s32 %v2766_v9  ;;  %v8400_v9 = vld [vmem:[#allocation179_spill] sm:$0xff] }
 0x90c   :  { %v2770_v48 = vadd.s32 %v2769_v36, %v2767_v11  ;;  %v8390_v11 = vld [vmem:[#allocation169_spill] sm:$0xff]  ;;  %v8401_v36 = vld [vmem:[#allocation180_spill] sm:$0xff] }
 0x90e   :  { %vm2771_vm6 = vcmp.eq.s32.totalorder %v8384_v51, %v2770_v48  ;;  %v8391_v48 = vld [vmem:[#allocation170_spill] sm:$0xff] }
 0x90f   :  { %vm6771_vm7 = vmpackc.low %vm2771_vm6, %vm2771_vm6 }
 0x910   :  { %4244 = vmatmul.mubr.msk.bf16.vlgmr.msra.gmra.mrb[36].mxu0 %vm6771_vm7, %v8231_v0  ;;  %4246 = vmatmul.mubr.msk.bf16.vlgmr.msra.gmra.mrb[40].mxu1 %vm6771_vm7, %v8231_v0 }
 0x911   :  { %2858 = vmatpush1.bf16.msra.mxu0 %v8387_v5  ;;  %2899 = vmatpush1.bf16.msra.mxu1 %v8388_v62 }
 0x912   :  { %2859 = vmatprep.subr.bf16.mxu0 %v8389_v19  ;;  %2900 = vmatprep.subr.bf16.mxu1 %v8390_v11 }
 0x913   :  { %2889 = vmatprep.mubr.bf16.mxu0 %v8208_v63  ;;  %2930 = vmatprep.mubr.bf16.mxu1 %v8208_v63 }
 0x915   :  { %2860 = vmatpush1.bf16.msra.mxu0 %v8391_v48  ;;  %2901 = vmatpush1.bf16.msra.mxu1 %v8392_v21  ;;  %v8402_v48 = vld [vmem:[#allocation181_spill] sm:$0xff]  ;;  %v8403_v21 = vld [vmem:[#allocation182_spill] sm:$0xff] }
 0x916   :  { %2861 = vmatprep.subr.bf16.mxu0 %v8393_v25  ;;  %2902 = vmatprep.subr.bf16.mxu1 %v8394_v53  ;;  %v8404_v25 = vld [vmem:[#allocation183_spill] sm:$0xff]  ;;  %v8405_v53 = vld [vmem:[#allocation184_spill] sm:$0xff] }
 0x919   :  { %2862 = vmatpush1.bf16.msra.mxu0 %v8395_v59  ;;  %2903 = vmatpush1.bf16.msra.mxu1 %v8396_v38  ;;  %v8406_v59 = vld [vmem:[#allocation185_spill] sm:$0xff]  ;;  %v8407_v38 = vld [vmem:[#allocation186_spill] sm:$0xff] }
 0x91a   :  { %2863 = vmatprep.subr.bf16.mxu0 %v8397_v17  ;;  %2904 = vmatprep.subr.bf16.mxu1 %v8398_v13 }
 0x91d   :  { %2864 = vmatpush1.bf16.msra.mxu0 %v8399_v26  ;;  %2905 = vmatpush1.bf16.msra.mxu1 %v8400_v9 }
 0x91e   :  { %2865 = vmatprep.subr.bf16.mxu0 %v8401_v36  ;;  %2906 = vmatprep.subr.bf16.mxu1 %v8402_v48 }
 0x921   :  { %2866 = vmatpush1.bf16.msra.mxu0 %v8403_v21  ;;  %2907 = vmatpush1.bf16.msra.mxu1 %v8404_v25 }
 0x922   :  { %2867 = vmatprep.subr.bf16.mxu0 %v8405_v53  ;;  %2908 = vmatprep.subr.bf16.mxu1 %v8406_v59 }
 0x925   :  { %2868 = vmatpush1.bf16.msra.mxu0 %v8407_v38  ;;  %2909 = vmatpush1.bf16.msra.mxu1 %v6478_v6 }
 0x926   :  { %2869 = vmatprep.subr.bf16.mxu0 %v6482_v57  ;;  %2910 = vmatprep.subr.bf16.mxu1 %v6484_v41  ;;  %v6817_v57 = vld [vmem:[%s7556_s7 + $0x40] sm:$0xff]  }
 0x927   :  { %8408 = vst [vmem:[#allocation124_spill] sm:$0xff] %v6817_v57 }
 0x929   :  { %2870 = vmatpush1.bf16.msra.mxu0 %v6500_v4  ;;  %2911 = vmatpush1.bf16.msra.mxu1 %v6502_v10 }
 0x92a   :  { %2871 = vmatprep.subr.bf16.mxu0 %v6506_v7  ;;  %2912 = vmatprep.subr.bf16.mxu1 %v6508_v55 }
 0x92d   :  { %2872 = vmatpush1.bf16.msra.mxu0 %v6512_v1  ;;  %2913 = vmatpush1.bf16.msra.mxu1 %v6514_v50  ;;  %v8441_v50 = vld [vmem:[#allocation25_spill] sm:$0xff]  ;;  %v8442_v1 = vld [vmem:[#allocation26_spill] sm:$0xff] }
 0x92e   :  { %3039 = vmatprep.subr.bf16.mxu1 %v4858_v29  ;;  %4334 = vmatprep.subr.bf16.mxu0 %v6817_v57  ;;  %v6830_v29 = vld [vmem:[%s7556_s7] sm:$0xff]   ;;  %v6837_v57 = vld [vmem:[%s7556_s7 + $0x48] sm:$0xff]  }
 0x92f   :  { %8409 = vst [vmem:[#allocation125_spill] sm:$0xff] %v6830_v29  ;;  %8410 = vst [vmem:[#allocation126_spill] sm:$0xff] %v6837_v57 }
 0x930   :  { %4248 = vmatmul.mubr.msk.bf16.vlgmr.msra.gmra.mrb[40].mxu0 %vm6771_vm7, %v8231_v0  ;;  %4250 = vmatmul.mubr.msk.bf16.vlgmr.msra.gmra.mrb[44].mxu1 %vm6771_vm7, %v8231_v0 }
 0x931   :  { %3040 = vmatpush1.bf16.msra.mxu1 %v4860_v30  ;;  %4335 = vmatpush3.bf16.msra.mxu0 %v6830_v29  ;;  %v8437_v29 = vld [vmem:[#allocation21_spill] sm:$0xff]  ;;  %v8440_v30 = vld [vmem:[#allocation24_spill] sm:$0xff] }
 0x932   :  { %3041 = vmatprep.subr.bf16.mxu1 %v4869_v33  ;;  %4336 = vmatprep.subr.bf16.mxu0 %v6837_v57  ;;  %v6851_v33 = vld [vmem:[%s7556_s7 + $0x50] sm:$0xff]  }
 0x933   :  { %8412 = vst [vmem:[#allocation128_spill] sm:$0xff] %v6851_v33  ;;  %v8436_v57 = vld [vmem:[#allocation20_spill] sm:$0xff] }
 0x935   :  { %3042 = vmatpush1.bf16.msra.mxu1 %v4881_v37  ;;  %4337 = vmatpush3.bf16.msra.mxu0 %v6844_v8  ;;  %v6858_v37 = vld [vmem:[%s7556_s7 + $0x10] sm:$0xff]   ;;  %v8415_v8 = vld [vmem:[#allocation9_spill] sm:$0xff] }
 0x936   :  { %3043 = vmatprep.subr.bf16.mxu1 %v4887_v39  ;;  %4338 = vmatprep.subr.bf16.mxu0 %v6851_v33  ;;  %8413 = vst [vmem:[#allocation129_spill] sm:$0xff] %v6858_v37  ;;  %v6865_v39 = vld [vmem:[%s7556_s7 + $0x58] sm:$0xff]   ;;  %v8417_v33 = vld [vmem:[#allocation10_spill] sm:$0xff] }
 0x937   :  { %8414 = vst [vmem:[#allocation130_spill] sm:$0xff] %v6865_v39 }
 0x939   :  { %3044 = vmatpush1.bf16.msra.mxu1 %v4899_v43  ;;  %4339 = vmatpush3.bf16.msra.mxu0 %v6858_v37  ;;  %v6872_v43 = vld [vmem:[%s7556_s7 + $0x18] sm:$0xff]   ;;  %v8419_v37 = vld [vmem:[#allocation11_spill] sm:$0xff] }
 0x93a   :  { %3045 = vmatprep.subr.bf16.mxu1 %v4905_v45  ;;  %4340 = vmatprep.subr.bf16.mxu0 %v6865_v39  ;;  %8416 = vst [vmem:[#allocation119_spill] sm:$0xff] %v6872_v43  ;;  %v6879_v45 = vld [vmem:[%s7556_s7 + $0x60] sm:$0xff]   ;;  %v8421_v39 = vld [vmem:[#allocation12_spill] sm:$0xff] }
 0x93b   :  { %8418 = vst [vmem:[#allocation120_spill] sm:$0xff] %v6879_v45 }
 0x93d   :  { %3046 = vmatpush1.bf16.msra.mxu1 %v8415_v8  ;;  %4341 = vmatpush3.bf16.msra.mxu0 %v6872_v43  ;;  %v6886_v8 = vld [vmem:[%s7556_s7 + $0x20] sm:$0xff]   ;;  %v8423_v43 = vld [vmem:[#allocation13_spill] sm:$0xff] }
 0x93e   :  { %3047 = vmatprep.subr.bf16.mxu1 %v8417_v33  ;;  %4342 = vmatprep.subr.bf16.mxu0 %v6879_v45  ;;  %8420 = vst [vmem:[#allocation121_spill] sm:$0xff] %v6886_v8  ;;  %v6893_v33 = vld [vmem:[%s7556_s7 + $0x68] sm:$0xff]   ;;  %v8425_v45 = vld [vmem:[#allocation14_spill] sm:$0xff] }
 0x93f   :  { %8422 = vst [vmem:[#allocation122_spill] sm:$0xff] %v6893_v33 }
 0x941   :  { %3048 = vmatpush1.bf16.msra.mxu1 %v8419_v37  ;;  %4343 = vmatpush3.bf16.msra.mxu0 %v6886_v8  ;;  %v6900_v37 = vld [vmem:[%s7556_s7 + $0x28] sm:$0xff]  }
 0x942   :  { %3049 = vmatprep.subr.bf16.mxu1 %v8421_v39  ;;  %4344 = vmatprep.subr.bf16.mxu0 %v6893_v33  ;;  %8424 = vst [vmem:[#allocation131_spill] sm:$0xff] %v6900_v37  ;;  %v6907_v39 = vld [vmem:[%s7556_s7 + $0x70] sm:$0xff]   ;;  %v8427_v8 = vld [vmem:[#allocation15_spill] sm:$0xff] }
 0x943   :  { %8426 = vst [vmem:[#allocation166_spill] sm:$0xff] %v6907_v39  ;;  %v8429_v33 = vld [vmem:[#allocation16_spill] sm:$0xff] }
 0x945   :  { %3050 = vmatpush1.bf16.msra.mxu1 %v8423_v43  ;;  %4345 = vmatpush3.bf16.msra.mxu0 %v6900_v37  ;;  %v6914_v43 = vld [vmem:[%s7556_s7 + $0x30] sm:$0xff]   ;;  %v8431_v37 = vld [vmem:[#allocation17_spill] sm:$0xff] }
 0x946   :  { %3051 = vmatprep.subr.bf16.mxu1 %v8425_v45  ;;  %4346 = vmatprep.subr.bf16.mxu0 %v6907_v39  ;;  %8428 = vst [vmem:[#allocation167_spill] sm:$0xff] %v6914_v43  ;;  %v6921_v45 = vld [vmem:[%s7556_s7 + $0x78] sm:$0xff]   ;;  %v8433_v39 = vld [vmem:[#allocation18_spill] sm:$0xff] }
 0x947   :  { %8430 = vst [vmem:[#allocation168_spill] sm:$0xff] %v6921_v45 }
 0x949   :  { %3052 = vmatpush1.bf16.msra.mxu1 %v8427_v8  ;;  %4347 = vmatpush3.bf16.msra.mxu0 %v6914_v43  ;;  %v6928_v8 = vld [vmem:[%s7556_s7 + $0x38] sm:$0xff]  }
 0x94a   :  { %3053 = vmatprep.subr.bf16.mxu1 %v8429_v33  ;;  %4348 = vmatprep.subr.bf16.mxu0 %v6921_v45  ;;  %8432 = vst [vmem:[#allocation169_spill] sm:$0xff] %v6928_v8  ;;  %v8434_v43 = vld [vmem:[#allocation61_spill] sm:$0xff]  ;;  %v8435_v33 = vld [vmem:[#allocation19_spill] sm:$0xff]  ;;  %v8438_v45 = vld [vmem:[#allocation22_spill] sm:$0xff] }
 0x94d   :  { %3054 = vmatpush1.bf16.msra.mxu1 %v8431_v37  ;;  %4349 = vmatpush3.bf16.msra.mxu0 %v6928_v8  ;;  %v8439_v37 = vld [vmem:[#allocation23_spill] sm:$0xff] }
 0x94e   :  { %3055 = vmatprep.subr.bf16.mxu1 %v8433_v39  ;;  %3080 = vmatprep.subr.bf16.mxu0 %v8434_v43  ;;  %v8443_v8 = vld [vmem:[#allocation27_spill] sm:$0xff]  ;;  %v8444_v39 = vld [vmem:[#allocation28_spill] sm:$0xff]  ;;  %v8445_v43 = vld [vmem:[#allocation29_spill] sm:$0xff] }
 0x951   :  { %3056 = vmatpush1.bf16.msra.mxu1 %v8435_v33  ;;  %v8446_v33 = vld [vmem:[#allocation30_spill] sm:$0xff] }
 0x952   :  { %3057 = vmatprep.subr.bf16.mxu1 %v8436_v57  ;;  %v8447_v57 = vld [vmem:[#allocation31_spill] sm:$0xff] }
 0x955   :  { %3058 = vmatpush1.bf16.msra.mxu1 %v8437_v29  ;;  %v8448_v29 = vld [vmem:[#allocation57_spill] sm:$0xff] }
 0x956   :  { %3059 = vmatprep.subr.bf16.mxu1 %v8438_v45  ;;  %v8449_v45 = vld [vmem:[#allocation58_spill] sm:$0xff] }
 0x959   :  { %3060 = vmatpush1.bf16.msra.mxu1 %v8439_v37  ;;  %v8450_v37 = vld [vmem:[#allocation32_spill] sm:$0xff] }
 0x95a   :  { %3061 = vmatprep.subr.bf16.mxu1 %v8440_v30 }
 0x95d   :  { %3062 = vmatpush1.bf16.msra.mxu1 %v8441_v50 }
 0x95e   :  { %3063 = vmatprep.subr.bf16.mxu1 %v8442_v1 }
 0x961   :  { %3064 = vmatpush1.bf16.msra.mxu1 %v8443_v8 }
 0x962   :  { %3065 = vmatprep.subr.bf16.mxu1 %v8444_v39 }
 0x965   :  { %3066 = vmatpush1.bf16.msra.mxu1 %v8445_v43 }
 0x966   :  { %3067 = vmatprep.subr.bf16.mxu1 %v8446_v33 }
 0x969   :  { %3068 = vmatpush1.bf16.msra.mxu1 %v8447_v57 }
 0x96a   :  { %3069 = vmatprep.subr.bf16.mxu1 %v8448_v29 }
 0x96d   :  { %3070 = vmatpush1.bf16.msra.mxu1 %v8449_v45 }
 0x96e   :  { %3121 = vmatprep.subr.bf16.mxu1 %v8450_v37 }
 0x9e3   :  { %v2809_v30 = vpop.f32.mrb[36].mxu0  ;;  %v2850_v50 = vpop.f32.mrb[40].mxu1 }
 0x9e4   :  { %v2810_v1 = vadd.f32 %v2809_v30, %v6744_v15  ;;  %v2851_v8 = vadd.f32 %v2850_v50, %v6757_v52  ;;  %v2811_v55 = vpop.f32.mrb[37].mxu0  ;;  %v2852_v39 = vpop.f32.mrb[41].mxu1 }
 0x9e5   :  { %v2812_v43 = vadd.f32 %v2811_v55, %v6746_v34  ;;  %v2853_v33 = vadd.f32 %v2852_v39, %v6761_v2  ;;  %v2813_v7 = vpop.f32.mrb[38].mxu0  ;;  %v2854_v57 = vpop.f32.mrb[42].mxu1 }
 0x9e6   :  { %v2814_v10 = vpop.f32.mrb[39].mxu0  ;;  %v2855_v29 = vpop.f32.mrb[43].mxu1  ;;  %v2939_v45 = vadd.f32 %v2810_v1, %v8265_v44  ;;  %v2941_v37 = vadd.f32 %v2851_v8, %v5947_v54 }
 0x9e7   :  { %v2940_v4 = vadd.f32 %v2812_v43, %v8266_v23  ;;  %v2942_v30 = vadd.f32 %v2853_v33, %v5953_v18 }
 0x9e8   :  { %v4251_v15 = vmul.f32 -1.442695, %v2939_v45  ;;  %v4253_v50 = vmul.f32 -1.442695, %v2941_v37 }
 0x9e9   :  { %v4252_v52 = vmul.f32 -1.442695, %v2940_v4  ;;  %v4254_v41 = vmul.f32 -1.442695, %v2942_v30 }
 0x9ea   :  { %4588 = vpow2.f32 %v4251_v15 }
 0x9eb   :  { %4590 = vpow2.f32 %v4253_v50 }
 0x9ec   :  { %4592 = vpow2.f32 %v4252_v52 }
 0x9ed   :  { %4594 = vpow2.f32 %v4254_v41 }
 0x9f4   :  { %v4589_v39 = vpop.eup %4588 }
 0x9f5   :  { %v4591_v57 = vpop.eup %4590  ;;  %v2953_v7 = vadd.f32 1.0, %v4589_v39 }
 0x9f6   :  { %v4593_v55 = vpop.eup %4592  ;;  %v2965_v1 = vadd.f32 1.0, %v4591_v57 }
 0x9f7   :  { %v4595_v29 = vpop.eup %4594  ;;  %v2954_v10 = vadd.f32 1.0, %v4593_v55  ;;  %4596 = vrcp.f32 %v2953_v7 }
 0x9f8   :  { %v2966_v34 = vadd.f32 1.0, %v4595_v29  ;;  %4598 = vrcp.f32 %v2965_v1 }
 0x9f9   :  { %4600 = vrcp.f32 %v2954_v10 }
 0x9fa   :  { %4602 = vrcp.f32 %v2966_v34 }
 0xa03   :  { %v2891_v2 = vpop.f32.mrb[40].mxu0  ;;  %v2932_v43 = vpop.f32.mrb[44].mxu1 }
 0xa04   :  { %v2892_v33 = vadd.f32 %v2891_v2, %v6759_v49  ;;  %v2933_v37 = vadd.f32 %v2932_v43, %v6765_v3  ;;  %v2893_v45 = vpop.f32.mrb[41].mxu0  ;;  %v2934_v4 = vpop.f32.mrb[45].mxu1 }
 0xa05   :  { %v2894_v41 = vadd.f32 %v2893_v45, %v6763_v20  ;;  %v2935_v8 = vadd.f32 %v2934_v4, %v6767_v60  ;;  %v2895_v30 = vpop.f32.mrb[42].mxu0  ;;  %v2936_v15 = vpop.f32.mrb[46].mxu1 }
 0xa06   :  { %v2943_v50 = vadd.f32 %v2892_v33, %v8267_v42  ;;  %v2945_v52 = vadd.f32 %v2933_v37, %v5967_v58  ;;  %v2896_v39 = vpop.f32.mrb[43].mxu0  ;;  %v2937_v57 = vpop.f32.mrb[47].mxu1 }
 0xa07   :  { %v2944_v49 = vadd.f32 %v2894_v41, %v8268_v12  ;;  %v2946_v3 = vadd.f32 %v2935_v8, %v5973_v14  ;;  %v4597_v60 = vpop.eup %4596 }
 0xa08   :  { %4604 = vtanh.f32 %v2943_v50  ;;  %v4255_v55 = vmul.f32 -1.442695, %v2945_v52  ;;  %v4599_v29 = vpop.eup %4598 }
 0xa09   :  { %4606 = vtanh.f32 %v2944_v49  ;;  %v4256_v20 = vmul.f32 -1.442695, %v2946_v3  ;;  %v4601_v7 = vpop.eup %4600  ;;  %v2985_v43 = vmul.f32 %v4599_v29, %v6594_v61  ;;  %v8454_v29 = vld [vmem:[#allocation63_spill] sm:$0xff] }
 0xa0a   :  { %4608 = vpow2.f32 %v4255_v55  ;;  %v4603_v1 = vpop.eup %4602  ;;  %v8451_v55 = vld [vmem:[#allocation33_spill] sm:$0xff] }
 0xa0b   :  { %4610 = vpow2.f32 %v4256_v20  ;;  %v2986_v37 = vmul.f32 %v4603_v1, %v6596_v35  ;;  %v8452_v20 = vld [vmem:[#allocation62_spill] sm:$0xff]  ;;  %v8456_v1 = vld [vmem:[#allocation64_spill] sm:$0xff] }
 0xa12   :  { %v4605_v10 = vpop.eup %4604 }
 0xa13   :  { %v4607_v2 = vpop.eup %4606  ;;  %v2987_v33 = vmul.f32 %v4605_v10, %v4597_v60  ;;  %v8453_v60 = vld [vmem:[#allocation34_spill] sm:$0xff]  ;;  %v8457_v10 = vld [vmem:[#allocation36_spill] sm:$0xff] }
 0xa14   :  { %v4609_v34 = vpop.eup %4608  ;;  %v2988_v45 = vmul.f32 %v4607_v2, %v4601_v7  ;;  %v8455_v7 = vld [vmem:[#allocation35_spill] sm:$0xff]  ;;  %v8458_v2 = vld [vmem:[#allocation65_spill] sm:$0xff] }
 0xa15   :  { %v4611_v4 = vpop.eup %4610  ;;  %v6967_v41 = vadd.f32 %v2987_v33, %v2985_v43  ;;  %v2979_v8 = vadd.f32 1.0, %v4609_v34  ;;  %v8459_v43 = vld [vmem:[#allocation37_spill] sm:$0xff]  ;;  %v8460_v33 = vld [vmem:[#allocation66_spill] sm:$0xff] }
 0xa16   :  { %v6969_v30 = vadd.f32 %v2988_v45, %v2986_v37  ;;  %v2980_v15 = vadd.f32 1.0, %v4611_v4  ;;  %v8461_v34 = vld [vmem:[#allocation38_spill] sm:$0xff]  ;;  %v8462_v37 = vld [vmem:[#allocation67_spill] sm:$0xff]  ;;  %v8464_v4 = vld [vmem:[#allocation68_spill] sm:$0xff] }
 0xa17   :  { %4612 = vtanh.f32 %v6967_v41  ;;  %v8463_v45 = vld [vmem:[#allocation39_spill] sm:$0xff] }
 0xa18   :  { %4614 = vrcp.f32 %v2979_v8  ;;  %v8465_v8 = vld [vmem:[#allocation40_spill] sm:$0xff] }
 0xa19   :  { %4616 = vtanh.f32 %v6969_v30 }
 0xa1a   :  { %4618 = vrcp.f32 %v2980_v15  ;;  %v8466_v15 = vld [vmem:[#allocation69_spill] sm:$0xff] }
 0xa21   :  { %v4613_v50 = vpop.eup %4612 }
 0xa22   :  { %v4615_v61 = vpop.eup %4614 }
 0xa23   :  { %v4617_v52 = vpop.eup %4616  ;;  %v2993_v57 = vmul.f32 %v4615_v61, %v4613_v50  ;;  %v8467_v50 = vld [vmem:[#allocation41_spill] sm:$0xff]  ;;  %v8468_v61 = vld [vmem:[#allocation70_spill] sm:$0xff] }
 0xa24   :  { %v4619_v39 = vpop.eup %4618 }
 0xa25   :  { %v2994_v35 = vmul.f32 %v4619_v39, %v4617_v52  ;;  %v6975_v3 = vpack.c.bf16 %v2993_v57, %v2993_v57  ;;  %v8469_v52 = vld [vmem:[#allocation42_spill] sm:$0xff]  ;;  %v8470_v39 = vld [vmem:[#allocation71_spill] sm:$0xff] }
 0xa26   :  { %v8471_v57 = vld [vmem:[#allocation43_spill] sm:$0xff] }
 0xa27   :  { %v6973_v49 = vpack.c.bf16 %v2994_v35, %v2994_v35  ;;  %v8472_v35 = vld [vmem:[#allocation72_spill] sm:$0xff] }
 0xa29   :  { %3029 = vmatprep.mubr.bf16.mxu0 %v6973_v49  ;;  %3071 = vmatprep.mubr.bf16.mxu1 %v6973_v49 }
 0xa2a   :  { %3030 = vmatmul.mubr.bf16.vlgmr.msra.gmra.mrb[44].mxu0 %v6975_v3  ;;  %3072 = vmatmul.mubr.bf16.vlgmr.msra.gmra.mrb[48].mxu1 %v6975_v3 }
 0xa2b   :  { %3081 = vmatpush1.bf16.msra.mxu0 %v5372_v27  ;;  %3122 = vmatpush1.bf16.msra.mxu1 %v5174_v31 }
 0xa2c   :  { %3112 = vmatprep.mubr.bf16.mxu0 %v6973_v49  ;;  %3153 = vmatprep.mubr.bf16.mxu1 %v6973_v49 }
 0xa2d   :  { %3082 = vmatprep.subr.bf16.mxu0 %v5397_v16  ;;  %3123 = vmatprep.subr.bf16.mxu1 %v5177_v32 }
 0xa2f   :  { %3083 = vmatpush1.bf16.msra.mxu0 %v5411_v22  ;;  %3124 = vmatpush1.bf16.msra.mxu1 %v5186_v40 }
 0xa30   :  { %3084 = vmatprep.subr.bf16.mxu0 %v5414_v46  ;;  %3125 = vmatprep.subr.bf16.mxu1 %v5189_v56 }
 0xa33   :  { %3085 = vmatpush1.bf16.msra.mxu0 %v5423_v24  ;;  %3126 = vmatpush1.bf16.msra.mxu1 %v5198_v47 }
 0xa34   :  { %3086 = vmatprep.subr.bf16.mxu0 %v5426_v28  ;;  %3127 = vmatprep.subr.bf16.mxu1 %v8451_v55 }
 0xa37   :  { %3087 = vmatpush1.bf16.msra.mxu0 %v8452_v20  ;;  %3128 = vmatpush1.bf16.msra.mxu1 %v8453_v60 }
 0xa38   :  { %3088 = vmatprep.subr.bf16.mxu0 %v8454_v29  ;;  %3129 = vmatprep.subr.bf16.mxu1 %v8455_v7 }
 0xa3b   :  { %3089 = vmatpush1.bf16.msra.mxu0 %v8456_v1  ;;  %3130 = vmatpush1.bf16.msra.mxu1 %v8457_v10 }
 0xa3c   :  { %3090 = vmatprep.subr.bf16.mxu0 %v8458_v2  ;;  %3131 = vmatprep.subr.bf16.mxu1 %v8459_v43 }
 0xa3f   :  { %3091 = vmatpush1.bf16.msra.mxu0 %v8460_v33  ;;  %3132 = vmatpush1.bf16.msra.mxu1 %v8461_v34 }
 0xa40   :  { %3092 = vmatprep.subr.bf16.mxu0 %v8462_v37  ;;  %3133 = vmatprep.subr.bf16.mxu1 %v8463_v45  ;;  %v8473_v37 = vld [vmem:[#allocation44_spill] sm:$0xff]  ;;  %v8474_v45 = vld [vmem:[#allocation73_spill] sm:$0xff] }
 0xa43   :  { %3093 = vmatpush1.bf16.msra.mxu0 %v8464_v4  ;;  %3134 = vmatpush1.bf16.msra.mxu1 %v8465_v8  ;;  %v8475_v4 = vld [vmem:[#allocation45_spill] sm:$0xff]  ;;  %v8476_v8 = vld [vmem:[#allocation74_spill] sm:$0xff] }
 0xa44   :  { %3094 = vmatprep.subr.bf16.mxu0 %v8466_v15  ;;  %3135 = vmatprep.subr.bf16.mxu1 %v8467_v50  ;;  %v8477_v15 = vld [vmem:[#allocation46_spill] sm:$0xff]  ;;  %v8478_v50 = vld [vmem:[#allocation75_spill] sm:$0xff] }
 0xa47   :  { %3095 = vmatpush1.bf16.msra.mxu0 %v8468_v61  ;;  %3136 = vmatpush1.bf16.msra.mxu1 %v8469_v52  ;;  %v8479_v61 = vld [vmem:[#allocation47_spill] sm:$0xff]  ;;  %v8480_v52 = vld [vmem:[#allocation76_spill] sm:$0xff] }
 0xa48   :  { %3096 = vmatprep.subr.bf16.mxu0 %v8470_v39  ;;  %3137 = vmatprep.subr.bf16.mxu1 %v8471_v57  ;;  %v8481_v39 = vld [vmem:[#allocation48_spill] sm:$0xff]  ;;  %v8482_v57 = vld [vmem:[#allocation77_spill] sm:$0xff] }
 0xa4b   :  { %3097 = vmatpush1.bf16.msra.mxu0 %v8472_v35  ;;  %3138 = vmatpush1.bf16.msra.mxu1 %v8473_v37  ;;  %v8483_v35 = vld [vmem:[#allocation49_spill] sm:$0xff]  ;;  %v8484_v37 = vld [vmem:[#allocation78_spill] sm:$0xff] }
 0xa4c   :  { %3098 = vmatprep.subr.bf16.mxu0 %v8474_v45  ;;  %3139 = vmatprep.subr.bf16.mxu1 %v8475_v4  ;;  %v8485_v45 = vld [vmem:[#allocation50_spill] sm:$0xff]  ;;  %v8486_v4 = vld [vmem:[#allocation79_spill] sm:$0xff] }
 0xa4f   :  { %3099 = vmatpush1.bf16.msra.mxu0 %v8476_v8  ;;  %3140 = vmatpush1.bf16.msra.mxu1 %v8477_v15  ;;  %v8487_v8 = vld [vmem:[#allocation51_spill] sm:$0xff]  ;;  %v8488_v15 = vld [vmem:[#allocation80_spill] sm:$0xff] }
 0xa50   :  { %3100 = vmatprep.subr.bf16.mxu0 %v8478_v50  ;;  %3141 = vmatprep.subr.bf16.mxu1 %v8479_v61  ;;  %v8489_v50 = vld [vmem:[#allocation52_spill] sm:$0xff]  ;;  %v8490_v61 = vld [vmem:[#allocation81_spill] sm:$0xff] }
 0xa53   :  { %3101 = vmatpush1.bf16.msra.mxu0 %v8480_v52  ;;  %3142 = vmatpush1.bf16.msra.mxu1 %v8481_v39  ;;  %v8491_v52 = vld [vmem:[#allocation53_spill] sm:$0xff]  ;;  %v8492_v39 = vld [vmem:[#allocation82_spill] sm:$0xff] }
 0xa54   :  { %3102 = vmatprep.subr.bf16.mxu0 %v8482_v57  ;;  %3143 = vmatprep.subr.bf16.mxu1 %v8483_v35  ;;  %v8493_v57 = vld [vmem:[#allocation54_spill] sm:$0xff]  ;;  %v8494_v35 = vld [vmem:[#allocation83_spill] sm:$0xff] }
 0xa57   :  { %3103 = vmatpush1.bf16.msra.mxu0 %v8484_v37  ;;  %3144 = vmatpush1.bf16.msra.mxu1 %v8485_v45  ;;  %v8495_v37 = vld [vmem:[#allocation55_spill] sm:$0xff]  ;;  %v8496_v45 = vld [vmem:[#allocation84_spill] sm:$0xff] }
 0xa58   :  { %3104 = vmatprep.subr.bf16.mxu0 %v8486_v4  ;;  %3145 = vmatprep.subr.bf16.mxu1 %v8487_v8  ;;  %v8497_v4 = vld [vmem:[#allocation56_spill] sm:$0xff]  ;;  %v8498_v8 = vld [vmem:[#allocation85_spill] sm:$0xff] }
 0xa5b   :  { %3105 = vmatpush1.bf16.msra.mxu0 %v8488_v15  ;;  %3146 = vmatpush1.bf16.msra.mxu1 %v8489_v50  ;;  %v8499_v15 = vld [vmem:[#allocation59_spill] sm:$0xff]  ;;  %v8500_v50 = vld [vmem:[#allocation86_spill] sm:$0xff] }
 0xa5c   :  { %3106 = vmatprep.subr.bf16.mxu0 %v8490_v61  ;;  %3147 = vmatprep.subr.bf16.mxu1 %v8491_v52  ;;  %v8501_v61 = vld [vmem:[#allocation60_spill] sm:$0xff]  ;;  %v8502_v52 = vld [vmem:[#allocation87_spill] sm:$0xff] }
 0xa5f   :  { %3107 = vmatpush1.bf16.msra.mxu0 %v8492_v39  ;;  %3148 = vmatpush1.bf16.msra.mxu1 %v8493_v57  ;;  %v8503_v39 = vld [vmem:[#allocation132_spill] sm:$0xff] }
 0xa60   :  { %3108 = vmatprep.subr.bf16.mxu0 %v8494_v35  ;;  %3149 = vmatprep.subr.bf16.mxu1 %v8495_v37  ;;  %v8504_v37 = vld [vmem:[#allocation88_spill] sm:$0xff]  ;;  %v8518_v35 = vld [vmem:[#allocation146_spill] sm:$0xff] }
 0xa63   :  { %3109 = vmatpush1.bf16.msra.mxu0 %v8496_v45  ;;  %3150 = vmatpush1.bf16.msra.mxu1 %v8497_v4  ;;  %v8505_v4 = vld [vmem:[#allocation89_spill] sm:$0xff]  ;;  %v8512_v45 = vld [vmem:[#allocation92_spill] sm:$0xff] }
 0xa64   :  { %3110 = vmatprep.subr.bf16.mxu0 %v8498_v8  ;;  %3151 = vmatprep.subr.bf16.mxu1 %v8499_v15  ;;  %v8506_v8 = vld [vmem:[#allocation133_spill] sm:$0xff]  ;;  %v8507_v15 = vld [vmem:[#allocation136_spill] sm:$0xff] }
 0xa67   :  { %3111 = vmatpush1.bf16.msra.mxu0 %v8500_v50  ;;  %3152 = vmatpush1.bf16.msra.mxu1 %v8501_v61  ;;  %v8508_v61 = vld [vmem:[#allocation90_spill] sm:$0xff]  ;;  %v8511_v50 = vld [vmem:[#allocation140_spill] sm:$0xff] }
 0xa68   :  { %3162 = vmatprep.subr.bf16.mxu0 %v8502_v52  ;;  %3225 = vmatprep.subr.bf16.mxu1 %v8503_v39  ;;  %v8509_v52 = vld [vmem:[#allocation91_spill] sm:$0xff]  ;;  %v8510_v39 = vld [vmem:[#allocation138_spill] sm:$0xff] }
 0xa6a   :  { %3113 = vmatmul.mubr.bf16.vlgmr.msra.gmra.mrb[48].mxu0 %v6975_v3  ;;  %3154 = vmatmul.mubr.bf16.vlgmr.msra.gmra.mrb[52].mxu1 %v6975_v3 }
 0xa6b   :  { %3163 = vmatpush1.bf16.msra.mxu0 %v8504_v37  ;;  %3194 = vmatprep.mubr.bf16.mxu0 %v6973_v49  ;;  %v8513_v37 = vld [vmem:[#allocation93_spill] sm:$0xff]  ;;  %v8514_v49 = vld [vmem:[#allocation142_spill] sm:$0xff] }
 0xa6c   :  { %3164 = vmatprep.subr.bf16.mxu0 %v8505_v4  ;;  %3226 = vmatpush1.bf16.msra.mxu1 %v8506_v8  ;;  %v8515_v4 = vld [vmem:[#allocation144_spill] sm:$0xff]  ;;  %v8516_v8 = vld [vmem:[#allocation94_spill] sm:$0xff] }
 0xa6d   :  { %3227 = vmatprep.subr.bf16.mxu1 %v8507_v15  ;;  %3257 = vmatprep.mubr.bf16.mxu1 %v8208_v63  ;;  %v8517_v15 = vld [vmem:[#allocation95_spill] sm:$0xff] }
 0xa6f   :  { %3165 = vmatpush1.bf16.msra.mxu0 %v8508_v61  ;;  %v8519_v61 = vld [vmem:[#allocation148_spill] sm:$0xff] }
 0xa70   :  { %3166 = vmatprep.subr.bf16.mxu0 %v8509_v52  ;;  %3228 = vmatpush1.bf16.msra.mxu1 %v8510_v39  ;;  %v8520_v52 = vld [vmem:[#allocation96_spill] sm:$0xff]  ;;  %v8521_v39 = vld [vmem:[#allocation97_spill] sm:$0xff] }
 0xa71   :  { %3229 = vmatprep.subr.bf16.mxu1 %v8511_v50  ;;  %v8522_v50 = vld [vmem:[#allocation150_spill] sm:$0xff] }
 0xa73   :  { %3167 = vmatpush1.bf16.msra.mxu0 %v8512_v45  ;;  %v8523_v45 = vld [vmem:[#allocation152_spill] sm:$0xff] }
 0xa74   :  { %3168 = vmatprep.subr.bf16.mxu0 %v8513_v37  ;;  %3230 = vmatpush1.bf16.msra.mxu1 %v8514_v49  ;;  %v8524_v37 = vld [vmem:[#allocation98_spill] sm:$0xff]  ;;  %v8525_v49 = vld [vmem:[#allocation99_spill] sm:$0xff] }
 0xa75   :  { %3231 = vmatprep.subr.bf16.mxu1 %v8515_v4  ;;  %v8526_v4 = vld [vmem:[#allocation154_spill] sm:$0xff] }
 0xa77   :  { %3169 = vmatpush1.bf16.msra.mxu0 %v8516_v8  ;;  %v8527_v8 = vld [vmem:[#allocation156_spill] sm:$0xff] }
 0xa78   :  { %3170 = vmatprep.subr.bf16.mxu0 %v8517_v15  ;;  %3232 = vmatpush1.bf16.msra.mxu1 %v8518_v35  ;;  %v8528_v15 = vld [vmem:[#allocation100_spill] sm:$0xff]  ;;  %v8529_v35 = vld [vmem:[#allocation101_spill] sm:$0xff] }
 0xa79   :  { %3233 = vmatprep.subr.bf16.mxu1 %v8519_v61  ;;  %v8530_v61 = vld [vmem:[#allocation158_spill] sm:$0xff] }
 0xa7b   :  { %3171 = vmatpush1.bf16.msra.mxu0 %v8520_v52  ;;  %v8531_v52 = vld [vmem:[#allocation160_spill] sm:$0xff] }
 0xa7c   :  { %3172 = vmatprep.subr.bf16.mxu0 %v8521_v39  ;;  %3234 = vmatpush1.bf16.msra.mxu1 %v8522_v50  ;;  %v8532_v39 = vld [vmem:[#allocation102_spill] sm:$0xff]  ;;  %v8533_v50 = vld [vmem:[#allocation103_spill] sm:$0xff] }
 0xa7d   :  { %3235 = vmatprep.subr.bf16.mxu1 %v8523_v45  ;;  %v8534_v45 = vld [vmem:[#allocation162_spill] sm:$0xff] }
 0xa7f   :  { %3173 = vmatpush1.bf16.msra.mxu0 %v8524_v37  ;;  %v8535_v37 = vld [vmem:[#allocation164_spill] sm:$0xff] }
 0xa80   :  { %3174 = vmatprep.subr.bf16.mxu0 %v8525_v49  ;;  %3236 = vmatpush1.bf16.msra.mxu1 %v8526_v4  ;;  %v8536_v49 = vld [vmem:[#allocation104_spill] sm:$0xff]  ;;  %v8537_v4 = vld [vmem:[#allocation105_spill] sm:$0xff] }
 0xa81   :  { %3237 = vmatprep.subr.bf16.mxu1 %v8527_v8  ;;  %v8538_v8 = vld [vmem:[#allocation106_spill] sm:$0xff] }
 0xa83   :  { %3175 = vmatpush1.bf16.msra.mxu0 %v8528_v15  ;;  %v8539_v15 = vld [vmem:[#allocation107_spill] sm:$0xff] }
 0xa84   :  { %3176 = vmatprep.subr.bf16.mxu0 %v8529_v35  ;;  %3238 = vmatpush1.bf16.msra.mxu1 %v8530_v61  ;;  %v8540_v35 = vld [vmem:[#allocation108_spill] sm:$0xff]  ;;  %v8541_v61 = vld [vmem:[#allocation109_spill] sm:$0xff] }
 0xa85   :  { %3239 = vmatprep.subr.bf16.mxu1 %v8531_v52  ;;  %v8542_v52 = vld [vmem:[#allocation110_spill] sm:$0xff] }
 0xa87   :  { %3177 = vmatpush1.bf16.msra.mxu0 %v8532_v39  ;;  %v8543_v39 = vld [vmem:[#allocation111_spill] sm:$0xff] }
 0xa88   :  { %3178 = vmatprep.subr.bf16.mxu0 %v8533_v50  ;;  %3240 = vmatpush1.bf16.msra.mxu1 %v8534_v45  ;;  %v8544_v50 = vld [vmem:[#allocation112_spill] sm:$0xff]  ;;  %v8545_v45 = vld [vmem:[#allocation113_spill] sm:$0xff] }
 0xa89   :  { %3307 = vmatprep.subr.bf16.mxu1 %v8535_v37  ;;  %v8546_v37 = vld [vmem:[#allocation114_spill] sm:$0xff] }
 0xa8b   :  { %3179 = vmatpush1.bf16.msra.mxu0 %v8536_v49  ;;  %v8547_v49 = vld [vmem:[#allocation115_spill] sm:$0xff] }
 0xa8c   :  { %3180 = vmatprep.subr.bf16.mxu0 %v8537_v4  ;;  %v8548_v4 = vld [vmem:[#allocation116_spill] sm:$0xff] }
 0xa8f   :  { %3181 = vmatpush1.bf16.msra.mxu0 %v8538_v8  ;;  %v8549_v8 = vld [vmem:[#allocation117_spill] sm:$0xff] }
 0xa90   :  { %3182 = vmatprep.subr.bf16.mxu0 %v8539_v15  ;;  %v8550_v15 = vld [vmem:[#allocation118_spill] sm:$0xff] }
 0xa93   :  { %3183 = vmatpush1.bf16.msra.mxu0 %v8540_v35  ;;  %v8551_v35 = vld [vmem:[#allocation134_spill] sm:$0xff] }
 0xa94   :  { %3184 = vmatprep.subr.bf16.mxu0 %v8541_v61 }
 0xa97   :  { %3185 = vmatpush1.bf16.msra.mxu0 %v8542_v52  ;;  %v8552_v52 = vld [vmem:[#allocation135_spill] sm:$0xff] }
 0xa98   :  { %3186 = vmatprep.subr.bf16.mxu0 %v8543_v39  ;;  %v8563_v39 = vld [vmem:[#allocation157_spill] sm:$0xff] }
 0xa9b   :  { %3187 = vmatpush1.bf16.msra.mxu0 %v8544_v50  ;;  %v8553_v50 = vld [vmem:[#allocation137_spill] sm:$0xff] }
 0xa9c   :  { %3188 = vmatprep.subr.bf16.mxu0 %v8545_v45  ;;  %v8554_v45 = vld [vmem:[#allocation139_spill] sm:$0xff] }
 0xa9f   :  { %3189 = vmatpush1.bf16.msra.mxu0 %v8546_v37  ;;  %v8555_v37 = vld [vmem:[#allocation141_spill] sm:$0xff] }
 0xaa0   :  { %3190 = vmatprep.subr.bf16.mxu0 %v8547_v49  ;;  %v8556_v49 = vld [vmem:[#allocation143_spill] sm:$0xff] }
 0xaa3   :  { %3191 = vmatpush1.bf16.msra.mxu0 %v8548_v4  ;;  %v8557_v4 = vld [vmem:[#allocation145_spill] sm:$0xff] }
 0xaa4   :  { %3192 = vmatprep.subr.bf16.mxu0 %v8549_v8  ;;  %v8558_v8 = vld [vmem:[#allocation147_spill] sm:$0xff] }
 0xaa7   :  { %3193 = vmatpush1.bf16.msra.mxu0 %v8550_v15  ;;  %v8559_v15 = vld [vmem:[#allocation149_spill] sm:$0xff] }
 0xaa8   :  { %3266 = vmatprep.subr.bf16.mxu0 %v8551_v35  ;;  %v8560_v35 = vld [vmem:[#allocation151_spill] sm:$0xff] }
 0xaaa   :  { %3195 = vmatmul.mubr.bf16.vlgmr.msra.gmra.mrb[52].mxu0 %v6975_v3  ;;  %v8561_v3 = vld [vmem:[#allocation153_spill] sm:$0xff] }
 0xaab   :  { %3267 = vmatpush1.bf16.msra.mxu0 %v8552_v52  ;;  %3298 = vmatprep.mubr.bf16.mxu0 %v8208_v63  ;;  %v8562_v52 = vld [vmem:[#allocation155_spill] sm:$0xff] }
 0xaac   :  { %3268 = vmatprep.subr.bf16.mxu0 %v8553_v50  ;;  %v8564_v50 = vld [vmem:[#allocation159_spill] sm:$0xff] }
 0xaaf   :  { %3269 = vmatpush1.bf16.msra.mxu0 %v8554_v45  ;;  %v8565_v45 = vld [vmem:[#allocation161_spill] sm:$0xff] }
 0xab0   :  { %3270 = vmatprep.subr.bf16.mxu0 %v8555_v37  ;;  %v8566_v37 = vld [vmem:[#allocation163_spill] sm:$0xff] }
 0xab3   :  { %3271 = vmatpush1.bf16.msra.mxu0 %v8556_v49  ;;  %v8567_v49 = vld [vmem:[#allocation165_spill] sm:$0xff] }
 0xab4   :  { %3272 = vmatprep.subr.bf16.mxu0 %v8557_v4 }
 0xab7   :  { %3273 = vmatpush1.bf16.msra.mxu0 %v8558_v8 }
 0xab8   :  { %3274 = vmatprep.subr.bf16.mxu0 %v8559_v15 }
 0xabb   :  { %3275 = vmatpush1.bf16.msra.mxu0 %v8560_v35 }
 0xabc   :  { %3276 = vmatprep.subr.bf16.mxu0 %v8561_v3 }
 0xabf   :  { %3277 = vmatpush1.bf16.msra.mxu0 %v8562_v52 }
 0xac0   :  { %3278 = vmatprep.subr.bf16.mxu0 %v8563_v39  ;;  %v8568_v39 = vld [vmem:[#allocation123_spill] sm:$0xff] }
 0xac3   :  { %3279 = vmatpush1.bf16.msra.mxu0 %v8564_v50 }
 0xac4   :  { %3280 = vmatprep.subr.bf16.mxu0 %v8565_v45 }
 0xac7   :  { %3281 = vmatpush1.bf16.msra.mxu0 %v8566_v37 }
 0xac8   :  { %3348 = vmatprep.subr.bf16.mxu0 %v8567_v49 }
 0xafd   :  { %v4350_v4 = vpop.f32.mrb[44].mxu0  ;;  %v7117_v8 = vpop.f32.mrb[48].mxu1 }
 0xafe   :  { %v4351_v15 = vpop.f32.mrb[45].mxu0  ;;  %v7119_v61 = vpop.f32.mrb[49].mxu1 }
 0xaff   :  { %v4352_v35 = vadd.f32 %v4351_v15, %v4350_v4  ;;  %v4353_v3 = vpop.f32.mrb[46].mxu0  ;;  %v3077_v57 = vpop.f32.mrb[50].mxu1 }
 0xb00   :  { %v4354_v52 = vpop.f32.mrb[47].mxu0  ;;  %v3078_v34 = vpop.f32.mrb[51].mxu1 }
 0xb01   :  { %v3032_v33 = vadd.f32 %v8568_v39, %v4352_v35 }
 0xb03   :  { %4257 = vst [vmem:[%s7558_s9 + $0x10] sm:$0xff] %v3032_v33  ;;  %3203 = vmax.xlane.f32.xlu0 %v3032_v33 }
 0xb3d   :  { %v7125_v37 = vpop.f32.mrb[48].mxu0  ;;  %v7127_v49 = vpop.f32.mrb[52].mxu1 }
 0xb3e   :  { %v7129_v45 = vpop.f32.mrb[49].mxu0  ;;  %v7131_v50 = vpop.f32.mrb[53].mxu1 }
 0xb3f   :  { %v3118_v4 = vpop.f32.mrb[50].mxu0  ;;  %v3159_v15 = vpop.f32.mrb[54].mxu1 }
 0xb40   :  { %v3119_v57 = vpop.f32.mrb[51].mxu0  ;;  %v3160_v52 = vpop.f32.mrb[55].mxu1 }
 0xb7d   :  { %v7133_v34 = vpop.f32.mrb[52].mxu0 }
 0xb7e   :  { %v7135_v39 = vpop.f32.mrb[53].mxu0 }
 0xb7f   :  { %v3200_v35 = vpop.f32.mrb[54].mxu0 }
 0xb80   :  { %v3201_v3 = vpop.f32.mrb[55].mxu0  ;;  %v8580_v35 = vld [vmem:[#allocation191_spill] sm:$0xff] }
 0xb81   :  { %v8581_v3 = vld [vmem:[#allocation192_spill] sm:$0xff] }
 0xb90   :  { %v3204_v43 = vpop.xlane.xlu0 %3203 }
 0xb91   :  { %vm3205_vm8 = vcmp.eq.f32.partialorder %v3032_v33, %v3204_v43  ;;  %v8579_v33 = vld [vmem:[#allocation190_spill] sm:$0xff]  ;;  %v8596_v43 = vld [vmem:[#allocation129_spill] sm:$0xff] }
 0xb92   :  { %v3206_v2 = vsel %vm3205_vm8, %v8384_v51, 128 }
 0xb93   :  { %v3208_v10 = vshra.s32 %v3206_v2, 16  ;;  %v3207_v7 = vand.u32 65535, %v3206_v2  ;;  %v8578_v2 = vld [vmem:[#allocation189_spill] sm:$0xff] }
 0xb95   :  { %v3210_v1 = vcvt.s32.f32 %v3208_v10  ;;  %v3209_v60 = vcvt.s32.f32 %v3207_v7  ;;  %v8575_v7 = vld [vmem:[#allocation174_spill] sm:$0xff]  ;;  %v8577_v10 = vld [vmem:[#allocation188_spill] sm:$0xff] }
 0xb97   :  { %3211 = vmin.xlane.f32.xlu1 %v3210_v1 }
 0xc24   :  { %v3212_v29 = vpop.xlane.xlu1 %3211 }
 0xc25   :  { %vm3213_vm9 = vcmp.eq.f32.partialorder %v3210_v1, %v3212_v29  ;;  %v3218_v15 = vcvt.f32.s32 %v3212_v29  ;;  %v8574_v29 = vld [vmem:[#allocation173_spill] sm:$0xff]  ;;  %v8576_v1 = vld [vmem:[#allocation175_spill] sm:$0xff] }
 0xc26   :  { %v3214_v4 = vsel %vm3213_vm9, %v3209_v60, inf  ;;  %v8573_v60 = vld [vmem:[#allocation172_spill] sm:$0xff] }
 0xc27   :  { %3215 = vmin.xlane.f32.xlu0 %v3214_v4  ;;  %v3219_v52 = vshll.u32 %v3218_v15, 16  ;;  %v8582_v4 = vld [vmem:[#allocation193_spill] sm:$0xff]  ;;  %v8583_v15 = vld [vmem:[#allocation194_spill] sm:$0xff] }
 0xcb4   :  { %v3216_v57 = vpop.xlane.xlu0 %3215 }
 0xcb5   :  { %v3217_v20 = vcvt.f32.s32 %v3216_v57  ;;  %v8584_v57 = vld [vmem:[#allocation195_spill] sm:$0xff] }
 0xcb7   :  { %v3220_v55 = vadd.s32 %v3219_v52, %v3217_v20  ;;  %v8572_v20 = vld [vmem:[#allocation171_spill] sm:$0xff]  ;;  %v8585_v52 = vld [vmem:[#allocation2_spill] sm:$0xff] }
 0xcb9   :  { %vm3221_vm10 = vcmp.eq.s32.totalorder %v8384_v51, %v3220_v55  ;;  %v8571_v55 = vld [vmem:[#allocation170_spill] sm:$0xff] }
 0xcba   :  { %vm7139_vm11 = vmpackc.low %vm3221_vm10, %vm3221_vm10 }
 0xcbb   :  { %4260 = vmatmul.mubr.msk.bf16.vlgmr.msra.gmra.mrb[56].mxu1 %vm7139_vm11, %v8231_v0  ;;  %4262 = vmatmul.mubr.msk.bf16.vlgmr.msra.gmra.mrb[56].mxu0 %vm7139_vm11, %v8231_v0 }
 0xcbc   :  { %3308 = vmatpush1.bf16.msra.mxu1 %v8387_v5  ;;  %3349 = vmatpush1.bf16.msra.mxu0 %v8388_v62 }
 0xcbd   :  { %3309 = vmatprep.subr.bf16.mxu1 %v8389_v19  ;;  %3350 = vmatprep.subr.bf16.mxu0 %v8390_v11 }
 0xcbe   :  { %3339 = vmatprep.mubr.bf16.mxu1 %v8208_v63  ;;  %3380 = vmatprep.mubr.bf16.mxu0 %v8208_v63 }
 0xcc0   :  { %3310 = vmatpush1.bf16.msra.mxu1 %v8571_v55  ;;  %3351 = vmatpush1.bf16.msra.mxu0 %v8572_v20 }
 0xcc1   :  { %3311 = vmatprep.subr.bf16.mxu1 %v8573_v60  ;;  %3352 = vmatprep.subr.bf16.mxu0 %v8574_v29 }
 0xcc4   :  { %3312 = vmatpush1.bf16.msra.mxu1 %v8575_v7  ;;  %3353 = vmatpush1.bf16.msra.mxu0 %v8576_v1 }
 0xcc5   :  { %3313 = vmatprep.subr.bf16.mxu1 %v8397_v17  ;;  %3354 = vmatprep.subr.bf16.mxu0 %v8398_v13 }
 0xcc8   :  { %3314 = vmatpush1.bf16.msra.mxu1 %v8399_v26  ;;  %3355 = vmatpush1.bf16.msra.mxu0 %v8400_v9 }
 0xcc9   :  { %3315 = vmatprep.subr.bf16.mxu1 %v8401_v36  ;;  %3356 = vmatprep.subr.bf16.mxu0 %v8402_v48 }
 0xccc   :  { %3316 = vmatpush1.bf16.msra.mxu1 %v8403_v21  ;;  %3357 = vmatpush1.bf16.msra.mxu0 %v8404_v25 }
 0xccd   :  { %3317 = vmatprep.subr.bf16.mxu1 %v8405_v53  ;;  %3358 = vmatprep.subr.bf16.mxu0 %v8406_v59 }
 0xcd0   :  { %3318 = vmatpush1.bf16.msra.mxu1 %v8407_v38  ;;  %3359 = vmatpush1.bf16.msra.mxu0 %v6478_v6  ;;  %v8586_v38 = vld [vmem:[#allocation124_spill] sm:$0xff] }
 0xcd1   :  { %3319 = vmatprep.subr.bf16.mxu1 %v8577_v10  ;;  %3360 = vmatprep.subr.bf16.mxu0 %v8578_v2  ;;  %v8595_v2 = vld [vmem:[#allocation7_spill] sm:$0xff]  ;;  %v8597_v10 = vld [vmem:[#allocation8_spill] sm:$0xff] }
 0xcd4   :  { %3320 = vmatpush1.bf16.msra.mxu1 %v8579_v33  ;;  %3361 = vmatpush1.bf16.msra.mxu0 %v8580_v35  ;;  %v8587_v35 = vld [vmem:[#allocation3_spill] sm:$0xff]  ;;  %v8594_v33 = vld [vmem:[#allocation128_spill] sm:$0xff] }
 0xcd5   :  { %3321 = vmatprep.subr.bf16.mxu1 %v8581_v3  ;;  %3362 = vmatprep.subr.bf16.mxu0 %v8582_v4  ;;  %v8588_v3 = vld [vmem:[#allocation125_spill] sm:$0xff]  ;;  %v8589_v4 = vld [vmem:[#allocation4_spill] sm:$0xff] }
 0xcd8   :  { %3322 = vmatpush1.bf16.msra.mxu1 %v8583_v15  ;;  %3363 = vmatpush1.bf16.msra.mxu0 %v8584_v57  ;;  %v8590_v15 = vld [vmem:[#allocation126_spill] sm:$0xff]  ;;  %v8591_v57 = vld [vmem:[#allocation5_spill] sm:$0xff] }
 0xcd9   :  { %3489 = vmatprep.subr.bf16.mxu0 %v8585_v52  ;;  %4356 = vmatprep.subr.bf16.mxu1 %v8586_v38  ;;  %v8592_v52 = vld [vmem:[#allocation127_spill] sm:$0xff]  ;;  %v8593_v38 = vld [vmem:[#allocation6_spill] sm:$0xff] }
 0xcdb   :  { %4264 = vmatmul.mubr.msk.bf16.vlgmr.msra.gmra.mrb[60].mxu1 %vm7139_vm11, %v8231_v0  ;;  %4266 = vmatmul.mubr.msk.bf16.vlgmr.msra.gmra.mrb[60].mxu0 %vm7139_vm11, %v8231_v0 }
 0xcdc   :  { %3490 = vmatpush1.bf16.msra.mxu0 %v8587_v35  ;;  %4357 = vmatpush3.bf16.msra.mxu1 %v8588_v3  ;;  %v8598_v35 = vld [vmem:[#allocation130_spill] sm:$0xff]  ;;  %v8599_v3 = vld [vmem:[#allocation9_spill] sm:$0xff] }
 0xcdd   :  { %3491 = vmatprep.subr.bf16.mxu0 %v8589_v4  ;;  %4358 = vmatprep.subr.bf16.mxu1 %v8590_v15  ;;  %v8600_v4 = vld [vmem:[#allocation119_spill] sm:$0xff]  ;;  %v8601_v15 = vld [vmem:[#allocation10_spill] sm:$0xff] }
 0xce0   :  { %3492 = vmatpush1.bf16.msra.mxu0 %v8591_v57  ;;  %4359 = vmatpush3.bf16.msra.mxu1 %v8592_v52  ;;  %v8602_v57 = vld [vmem:[#allocation120_spill] sm:$0xff]  ;;  %v8603_v52 = vld [vmem:[#allocation11_spill] sm:$0xff] }
 0xce1   :  { %3493 = vmatprep.subr.bf16.mxu0 %v8593_v38  ;;  %4360 = vmatprep.subr.bf16.mxu1 %v8594_v33  ;;  %v8604_v38 = vld [vmem:[#allocation121_spill] sm:$0xff]  ;;  %v8605_v33 = vld [vmem:[#allocation12_spill] sm:$0xff] }
 0xce4   :  { %3494 = vmatpush1.bf16.msra.mxu0 %v8595_v2  ;;  %4361 = vmatpush3.bf16.msra.mxu1 %v8596_v43  ;;  %v8606_v2 = vld [vmem:[#allocation122_spill] sm:$0xff]  ;;  %v8607_v43 = vld [vmem:[#allocation13_spill] sm:$0xff] }
 0xce5   :  { %3495 = vmatprep.subr.bf16.mxu0 %v8597_v10  ;;  %4362 = vmatprep.subr.bf16.mxu1 %v8598_v35  ;;  %v8608_v10 = vld [vmem:[#allocation131_spill] sm:$0xff]  ;;  %v8609_v35 = vld [vmem:[#allocation14_spill] sm:$0xff] }
 0xce8   :  { %3496 = vmatpush1.bf16.msra.mxu0 %v8599_v3  ;;  %4363 = vmatpush3.bf16.msra.mxu1 %v8600_v4  ;;  %v8610_v3 = vld [vmem:[#allocation166_spill] sm:$0xff]  ;;  %v8611_v4 = vld [vmem:[#allocation15_spill] sm:$0xff] }
 0xce9   :  { %3497 = vmatprep.subr.bf16.mxu0 %v8601_v15  ;;  %4364 = vmatprep.subr.bf16.mxu1 %v8602_v57  ;;  %v8612_v15 = vld [vmem:[#allocation167_spill] sm:$0xff]  ;;  %v8613_v57 = vld [vmem:[#allocation16_spill] sm:$0xff] }
 0xcec   :  { %3498 = vmatpush1.bf16.msra.mxu0 %v8603_v52  ;;  %4365 = vmatpush3.bf16.msra.mxu1 %v8604_v38  ;;  %v8614_v52 = vld [vmem:[#allocation168_spill] sm:$0xff]  ;;  %v8615_v38 = vld [vmem:[#allocation17_spill] sm:$0xff] }
 0xced   :  { %3499 = vmatprep.subr.bf16.mxu0 %v8605_v33  ;;  %4366 = vmatprep.subr.bf16.mxu1 %v8606_v2  ;;  %v8616_v33 = vld [vmem:[#allocation169_spill] sm:$0xff]  ;;  %v8617_v2 = vld [vmem:[#allocation18_spill] sm:$0xff] }
 0xcf0   :  { %3500 = vmatpush1.bf16.msra.mxu0 %v8607_v43  ;;  %4367 = vmatpush3.bf16.msra.mxu1 %v8608_v10  ;;  %v8618_v43 = vld [vmem:[#allocation61_spill] sm:$0xff]  ;;  %v8619_v10 = vld [vmem:[#allocation19_spill] sm:$0xff] }
 0xcf1   :  { %3501 = vmatprep.subr.bf16.mxu0 %v8609_v35  ;;  %4368 = vmatprep.subr.bf16.mxu1 %v8610_v3  ;;  %v8620_v35 = vld [vmem:[#allocation20_spill] sm:$0xff]  ;;  %v8621_v3 = vld [vmem:[#allocation21_spill] sm:$0xff] }
 0xcf4   :  { %3502 = vmatpush1.bf16.msra.mxu0 %v8611_v4  ;;  %4369 = vmatpush3.bf16.msra.mxu1 %v8612_v15  ;;  %v8622_v4 = vld [vmem:[#allocation22_spill] sm:$0xff]  ;;  %v8623_v15 = vld [vmem:[#allocation23_spill] sm:$0xff] }
 0xcf5   :  { %3503 = vmatprep.subr.bf16.mxu0 %v8613_v57  ;;  %4370 = vmatprep.subr.bf16.mxu1 %v8614_v52  ;;  %v8624_v57 = vld [vmem:[#allocation24_spill] sm:$0xff]  ;;  %v8625_v52 = vld [vmem:[#allocation25_spill] sm:$0xff] }
 0xcf8   :  { %3504 = vmatpush1.bf16.msra.mxu0 %v8615_v38  ;;  %4371 = vmatpush3.bf16.msra.mxu1 %v8616_v33  ;;  %v8626_v38 = vld [vmem:[#allocation26_spill] sm:$0xff]  ;;  %v8627_v33 = vld [vmem:[#allocation27_spill] sm:$0xff] }
 0xcf9   :  { %3505 = vmatprep.subr.bf16.mxu0 %v8617_v2  ;;  %3530 = vmatprep.subr.bf16.mxu1 %v8618_v43  ;;  %v8628_v2 = vld [vmem:[#allocation28_spill] sm:$0xff]  ;;  %v8629_v43 = vld [vmem:[#allocation29_spill] sm:$0xff] }
 0xcfc   :  { %3506 = vmatpush1.bf16.msra.mxu0 %v8619_v10  ;;  %v8630_v10 = vld [vmem:[#allocation30_spill] sm:$0xff] }
 0xcfd   :  { %3507 = vmatprep.subr.bf16.mxu0 %v8620_v35  ;;  %v8631_v35 = vld [vmem:[#allocation31_spill] sm:$0xff] }
 0xd00   :  { %3508 = vmatpush1.bf16.msra.mxu0 %v8621_v3  ;;  %v8632_v3 = vld [vmem:[#allocation57_spill] sm:$0xff] }
 0xd01   :  { %3509 = vmatprep.subr.bf16.mxu0 %v8622_v4  ;;  %v8633_v4 = vld [vmem:[#allocation58_spill] sm:$0xff] }
 0xd04   :  { %3510 = vmatpush1.bf16.msra.mxu0 %v8623_v15  ;;  %v8634_v15 = vld [vmem:[#allocation32_spill] sm:$0xff] }
 0xd05   :  { %3511 = vmatprep.subr.bf16.mxu0 %v8624_v57 }
 0xd08   :  { %3512 = vmatpush1.bf16.msra.mxu0 %v8625_v52 }
 0xd09   :  { %3513 = vmatprep.subr.bf16.mxu0 %v8626_v38 }
 0xd0c   :  { %3514 = vmatpush1.bf16.msra.mxu0 %v8627_v33 }
 0xd0d   :  { %3515 = vmatprep.subr.bf16.mxu0 %v8628_v2 }
 0xd10   :  { %3516 = vmatpush1.bf16.msra.mxu0 %v8629_v43 }
 0xd11   :  { %3517 = vmatprep.subr.bf16.mxu0 %v8630_v10 }
 0xd14   :  { %3518 = vmatpush1.bf16.msra.mxu0 %v8631_v35 }
 0xd15   :  { %3519 = vmatprep.subr.bf16.mxu0 %v8632_v3 }
 0xd18   :  { %3520 = vmatpush1.bf16.msra.mxu0 %v8633_v4 }
 0xd19   :  { %3571 = vmatprep.subr.bf16.mxu0 %v8634_v15 }
 0xd8e   :  { %v3259_v57 = vpop.f32.mrb[56].mxu1  ;;  %v3300_v52 = vpop.f32.mrb[56].mxu0 }
 0xd8f   :  { %v3260_v38 = vadd.f32 %v3259_v57, %v7117_v8  ;;  %v3301_v33 = vadd.f32 %v3300_v52, %v7125_v37  ;;  %v3261_v6 = vpop.f32.mrb[57].mxu1  ;;  %v3302_v2 = vpop.f32.mrb[57].mxu0 }
 0xd90   :  { %v3262_v43 = vadd.f32 %v3261_v6, %v7119_v61  ;;  %v3303_v10 = vadd.f32 %v3302_v2, %v7129_v45  ;;  %v3263_v59 = vpop.f32.mrb[58].mxu1  ;;  %v3304_v35 = vpop.f32.mrb[58].mxu0 }
 0xd91   :  { %v3264_v53 = vpop.f32.mrb[59].mxu1  ;;  %v3305_v3 = vpop.f32.mrb[59].mxu0  ;;  %v3389_v4 = vadd.f32 %v3260_v38, %v8265_v44  ;;  %v3391_v15 = vadd.f32 %v3301_v33, %v5947_v54 }
 0xd92   :  { %v3390_v25 = vadd.f32 %v3262_v43, %v8266_v23  ;;  %v3392_v8 = vadd.f32 %v3303_v10, %v5953_v18 }
 0xd93   :  { %v4267_v57 = vmul.f32 -1.442695, %v3389_v4  ;;  %v4269_v37 = vmul.f32 -1.442695, %v3391_v15 }
 0xd94   :  { %v4268_v52 = vmul.f32 -1.442695, %v3390_v25  ;;  %v4270_v21 = vmul.f32 -1.442695, %v3392_v8 }
 0xd95   :  { %4620 = vpow2.f32 %v4267_v57 }
 0xd96   :  { %4622 = vpow2.f32 %v4269_v37 }
 0xd97   :  { %4624 = vpow2.f32 %v4268_v52 }
 0xd98   :  { %4626 = vpow2.f32 %v4270_v21 }
 0xd9f   :  { %v4621_v6 = vpop.eup %4620 }
 0xda0   :  { %v4623_v59 = vpop.eup %4622  ;;  %v3403_v61 = vadd.f32 1.0, %v4621_v6 }
 0xda1   :  { %v4625_v53 = vpop.eup %4624  ;;  %v3415_v38 = vadd.f32 1.0, %v4623_v59 }
 0xda2   :  { %v4627_v45 = vpop.eup %4626  ;;  %v3404_v2 = vadd.f32 1.0, %v4625_v53  ;;  %4628 = vrcp.f32 %v3403_v61 }
 0xda3   :  { %v3416_v33 = vadd.f32 1.0, %v4627_v45  ;;  %4630 = vrcp.f32 %v3415_v38 }
 0xda4   :  { %4632 = vrcp.f32 %v3404_v2 }
 0xda5   :  { %4634 = vrcp.f32 %v3416_v33 }
 0xdae   :  { %v3341_v35 = vpop.f32.mrb[60].mxu1  ;;  %v3382_v43 = vpop.f32.mrb[60].mxu0 }
 0xdaf   :  { %v3342_v10 = vadd.f32 %v3341_v35, %v7127_v49  ;;  %v3383_v25 = vadd.f32 %v3382_v43, %v7133_v34  ;;  %v3343_v3 = vpop.f32.mrb[61].mxu1  ;;  %v3384_v4 = vpop.f32.mrb[61].mxu0 }
 0xdb0   :  { %v3344_v21 = vadd.f32 %v3343_v3, %v7131_v50  ;;  %v3385_v15 = vadd.f32 %v3384_v4, %v7135_v39  ;;  %v3345_v8 = vpop.f32.mrb[62].mxu1  ;;  %v3386_v57 = vpop.f32.mrb[62].mxu0 }
 0xdb1   :  { %v3393_v37 = vadd.f32 %v3342_v10, %v8267_v42  ;;  %v3395_v52 = vadd.f32 %v3383_v25, %v5967_v58  ;;  %v3346_v6 = vpop.f32.mrb[63].mxu1  ;;  %v3387_v59 = vpop.f32.mrb[63].mxu0 }
 0xdb2   :  { %v3394_v49 = vadd.f32 %v3344_v21, %v8268_v12  ;;  %v3396_v34 = vadd.f32 %v3385_v15, %v5973_v14  ;;  %v4629_v39 = vpop.eup %4628 }
 0xdb3   :  { %4636 = vtanh.f32 %v3393_v37  ;;  %v4271_v53 = vmul.f32 -1.442695, %v3395_v52  ;;  %v4631_v45 = vpop.eup %4630 }
 0xdb4   :  { %4638 = vtanh.f32 %v3394_v49  ;;  %v4272_v50 = vmul.f32 -1.442695, %v3396_v34  ;;  %v4633_v61 = vpop.eup %4632  ;;  %v3435_v43 = vmul.f32 %v4631_v45, %v6967_v41  ;;  %v8649_v45 = vld [vmem:[#allocation40_spill] sm:$0xff] }
 0xdb5   :  { %4640 = vpow2.f32 %v4271_v53  ;;  %v4635_v38 = vpop.eup %4634  ;;  %v8646_v53 = vld [vmem:[#allocation67_spill] sm:$0xff] }
 0xdb6   :  { %4642 = vpow2.f32 %v4272_v50  ;;  %v3436_v25 = vmul.f32 %v4635_v38, %v6969_v30  ;;  %v8647_v50 = vld [vmem:[#allocation39_spill] sm:$0xff]  ;;  %v8651_v38 = vld [vmem:[#allocation41_spill] sm:$0xff] }
 0xdbd   :  { %v4637_v2 = vpop.eup %4636 }
 0xdbe   :  { %v4639_v35 = vpop.eup %4638  ;;  %v3437_v10 = vmul.f32 %v4637_v2, %v4629_v39  ;;  %v8648_v39 = vld [vmem:[#allocation68_spill] sm:$0xff]  ;;  %v8652_v2 = vld [vmem:[#allocation70_spill] sm:$0xff] }
 0xdbf   :  { %v4641_v33 = vpop.eup %4640  ;;  %v3438_v3 = vmul.f32 %v4639_v35, %v4633_v61  ;;  %v8650_v61 = vld [vmem:[#allocation69_spill] sm:$0xff]  ;;  %v8653_v35 = vld [vmem:[#allocation42_spill] sm:$0xff] }
 0xdc0   :  { %v4643_v4 = vpop.eup %4642  ;;  %v7255_v21 = vadd.f32 %v3437_v10, %v3435_v43  ;;  %v3429_v15 = vadd.f32 1.0, %v4641_v33  ;;  %v8654_v43 = vld [vmem:[#allocation71_spill] sm:$0xff]  ;;  %v8656_v33 = vld [vmem:[#allocation72_spill] sm:$0xff] }
 0xdc1   :  { %v7257_v8 = vadd.f32 %v3438_v3, %v3436_v25  ;;  %v3430_v57 = vadd.f32 1.0, %v4643_v4  ;;  %v8655_v10 = vld [vmem:[#allocation43_spill] sm:$0xff]  ;;  %v8657_v25 = vld [vmem:[#allocation44_spill] sm:$0xff]  ;;  %v8658_v3 = vld [vmem:[#allocation73_spill] sm:$0xff] }
 0xdc2   :  { %4644 = vtanh.f32 %v7255_v21  ;;  %v8659_v4 = vld [vmem:[#allocation45_spill] sm:$0xff] }
 0xdc3   :  { %4646 = vrcp.f32 %v3429_v15  ;;  %v8660_v15 = vld [vmem:[#allocation74_spill] sm:$0xff] }
 0xdc4   :  { %4648 = vtanh.f32 %v7257_v8 }
 0xdc5   :  { %4650 = vrcp.f32 %v3430_v57  ;;  %v8661_v57 = vld [vmem:[#allocation46_spill] sm:$0xff] }
 0xdcc   :  { %v4645_v37 = vpop.eup %4644 }
 0xdcd   :  { %v4647_v41 = vpop.eup %4646 }
 0xdce   :  { %v4649_v52 = vpop.eup %4648  ;;  %v3443_v59 = vmul.f32 %v4647_v41, %v4645_v37  ;;  %v8662_v37 = vld [vmem:[#allocation75_spill] sm:$0xff] }
 0xdcf   :  { %v4651_v6 = vpop.eup %4650  ;;  %v8663_v41 = vld [vmem:[#allocation47_spill] sm:$0xff] }
 0xdd0   :  { %v3444_v30 = vmul.f32 %v4651_v6, %v4649_v52  ;;  %v7263_v34 = vpack.c.bf16 %v3443_v59, %v3443_v59  ;;  %v8664_v52 = vld [vmem:[#allocation76_spill] sm:$0xff]  ;;  %v8666_v59 = vld [vmem:[#allocation77_spill] sm:$0xff] }
 0xdd1   :  { %v8665_v6 = vld [vmem:[#allocation48_spill] sm:$0xff] }
 0xdd2   :  { %v7261_v49 = vpack.c.bf16 %v3444_v30, %v3444_v30  ;;  %v8667_v30 = vld [vmem:[#allocation49_spill] sm:$0xff] }
 0xdd4   :  { %3479 = vmatprep.mubr.bf16.mxu1 %v7261_v49  ;;  %3521 = vmatprep.mubr.bf16.mxu0 %v7261_v49 }
 0xdd5   :  { %3480 = vmatmul.mubr.bf16.vlgmr.msra.gmra.mrb[64].mxu1 %v7263_v34  ;;  %3522 = vmatmul.mubr.bf16.vlgmr.msra.gmra.mrb[64].mxu0 %v7263_v34 }
 0xdd6   :  { %3531 = vmatpush1.bf16.msra.mxu1 %v5372_v27  ;;  %3572 = vmatpush1.bf16.msra.mxu0 %v5174_v31  ;;  %v8635_v31 = vld [vmem:[#allocation33_spill] sm:$0xff]  ;;  %v8636_v27 = vld [vmem:[#allocation62_spill] sm:$0xff] }
 0xdd7   :  { %3562 = vmatprep.mubr.bf16.mxu1 %v7261_v49  ;;  %3603 = vmatprep.mubr.bf16.mxu0 %v7261_v49 }
 0xdd8   :  { %3532 = vmatprep.subr.bf16.mxu1 %v5397_v16  ;;  %3573 = vmatprep.subr.bf16.mxu0 %v5177_v32  ;;  %v8637_v16 = vld [vmem:[#allocation34_spill] sm:$0xff]  ;;  %v8638_v32 = vld [vmem:[#allocation63_spill] sm:$0xff] }
 0xdda   :  { %3533 = vmatpush1.bf16.msra.mxu1 %v5411_v22  ;;  %3574 = vmatpush1.bf16.msra.mxu0 %v5186_v40  ;;  %v8639_v22 = vld [vmem:[#allocation35_spill] sm:$0xff]  ;;  %v8640_v40 = vld [vmem:[#allocation64_spill] sm:$0xff] }
 0xddb   :  { %3534 = vmatprep.subr.bf16.mxu1 %v5414_v46  ;;  %3575 = vmatprep.subr.bf16.mxu0 %v5189_v56  ;;  %v8641_v46 = vld [vmem:[#allocation36_spill] sm:$0xff]  ;;  %v8642_v56 = vld [vmem:[#allocation65_spill] sm:$0xff] }
 0xdde   :  { %3535 = vmatpush1.bf16.msra.mxu1 %v5423_v24  ;;  %3576 = vmatpush1.bf16.msra.mxu0 %v5198_v47  ;;  %v8643_v24 = vld [vmem:[#allocation37_spill] sm:$0xff]  ;;  %v8644_v47 = vld [vmem:[#allocation66_spill] sm:$0xff] }
 0xddf   :  { %3536 = vmatprep.subr.bf16.mxu1 %v5426_v28  ;;  %3577 = vmatprep.subr.bf16.mxu0 %v8635_v31  ;;  %v8645_v28 = vld [vmem:[#allocation38_spill] sm:$0xff] }
 0xde0   :  { %v8668_v31 = vld [vmem:[#allocation78_spill] sm:$0xff] }
 0xde2   :  { %3537 = vmatpush1.bf16.msra.mxu1 %v8636_v27  ;;  %3578 = vmatpush1.bf16.msra.mxu0 %v8637_v16  ;;  %v8669_v27 = vld [vmem:[#allocation50_spill] sm:$0xff]  ;;  %v8670_v16 = vld [vmem:[#allocation79_spill] sm:$0xff] }
 0xde3   :  { %3538 = vmatprep.subr.bf16.mxu1 %v8638_v32  ;;  %3579 = vmatprep.subr.bf16.mxu0 %v8639_v22  ;;  %v8671_v32 = vld [vmem:[#allocation51_spill] sm:$0xff]  ;;  %v8672_v22 = vld [vmem:[#allocation80_spill] sm:$0xff] }
 0xde6   :  { %3539 = vmatpush1.bf16.msra.mxu1 %v8640_v40  ;;  %3580 = vmatpush1.bf16.msra.mxu0 %v8641_v46  ;;  %v8673_v40 = vld [vmem:[#allocation52_spill] sm:$0xff]  ;;  %v8674_v46 = vld [vmem:[#allocation81_spill] sm:$0xff] }
 0xde7   :  { %3540 = vmatprep.subr.bf16.mxu1 %v8642_v56  ;;  %3581 = vmatprep.subr.bf16.mxu0 %v8643_v24  ;;  %v8675_v56 = vld [vmem:[#allocation53_spill] sm:$0xff]  ;;  %v8676_v24 = vld [vmem:[#allocation82_spill] sm:$0xff] }
 0xdea   :  { %3541 = vmatpush1.bf16.msra.mxu1 %v8644_v47  ;;  %3582 = vmatpush1.bf16.msra.mxu0 %v8645_v28  ;;  %v8677_v47 = vld [vmem:[#allocation54_spill] sm:$0xff]  ;;  %v8678_v28 = vld [vmem:[#allocation83_spill] sm:$0xff] }
 0xdeb   :  { %3542 = vmatprep.subr.bf16.mxu1 %v8646_v53  ;;  %3583 = vmatprep.subr.bf16.mxu0 %v8647_v50  ;;  %v8679_v53 = vld [vmem:[#allocation55_spill] sm:$0xff]  ;;  %v8680_v50 = vld [vmem:[#allocation84_spill] sm:$0xff] }
 0xdee   :  { %3543 = vmatpush1.bf16.msra.mxu1 %v8648_v39  ;;  %3584 = vmatpush1.bf16.msra.mxu0 %v8649_v45  ;;  %v8681_v39 = vld [vmem:[#allocation56_spill] sm:$0xff]  ;;  %v8682_v45 = vld [vmem:[#allocation85_spill] sm:$0xff] }
 0xdef   :  { %3544 = vmatprep.subr.bf16.mxu1 %v8650_v61  ;;  %3585 = vmatprep.subr.bf16.mxu0 %v8651_v38  ;;  %v8683_v61 = vld [vmem:[#allocation59_spill] sm:$0xff]  ;;  %v8684_v38 = vld [vmem:[#allocation86_spill] sm:$0xff] }
 0xdf2   :  { %3545 = vmatpush1.bf16.msra.mxu1 %v8652_v2  ;;  %3586 = vmatpush1.bf16.msra.mxu0 %v8653_v35  ;;  %v8685_v2 = vld [vmem:[#allocation60_spill] sm:$0xff]  ;;  %v8686_v35 = vld [vmem:[#allocation87_spill] sm:$0xff] }
 0xdf3   :  { %3546 = vmatprep.subr.bf16.mxu1 %v8654_v43  ;;  %3587 = vmatprep.subr.bf16.mxu0 %v8655_v10  ;;  %v8687_v43 = vld [vmem:[#allocation132_spill] sm:$0xff] }
 0xdf4   :  { %v8688_v10 = vld [vmem:[#allocation88_spill] sm:$0xff] }
 0xdf6   :  { %3547 = vmatpush1.bf16.msra.mxu1 %v8656_v33  ;;  %3588 = vmatpush1.bf16.msra.mxu0 %v8657_v25  ;;  %v8689_v33 = vld [vmem:[#allocation89_spill] sm:$0xff] }
 0xdf7   :  { %3548 = vmatprep.subr.bf16.mxu1 %v8658_v3  ;;  %3589 = vmatprep.subr.bf16.mxu0 %v8659_v4  ;;  %v8690_v25 = vld [vmem:[#allocation133_spill] sm:$0xff]  ;;  %v8691_v3 = vld [vmem:[#allocation136_spill] sm:$0xff]  ;;  %v8692_v4 = vld [vmem:[#allocation90_spill] sm:$0xff] }
 0xdfa   :  { %3549 = vmatpush1.bf16.msra.mxu1 %v8660_v15  ;;  %3590 = vmatpush1.bf16.msra.mxu0 %v8661_v57  ;;  %v8693_v15 = vld [vmem:[#allocation91_spill] sm:$0xff]  ;;  %v8694_v57 = vld [vmem:[#allocation138_spill] sm:$0xff] }
 0xdfb   :  { %3550 = vmatprep.subr.bf16.mxu1 %v8662_v37  ;;  %3591 = vmatprep.subr.bf16.mxu0 %v8663_v41  ;;  %v8695_v37 = vld [vmem:[#allocation140_spill] sm:$0xff] }
 0xdfc   :  { %v8696_v41 = vld [vmem:[#allocation92_spill] sm:$0xff] }
 0xdfe   :  { %3551 = vmatpush1.bf16.msra.mxu1 %v8664_v52  ;;  %3592 = vmatpush1.bf16.msra.mxu0 %v8665_v6  ;;  %v8697_v52 = vld [vmem:[#allocation93_spill] sm:$0xff]  ;;  %v8699_v6 = vld [vmem:[#allocation144_spill] sm:$0xff] }
 0xdff   :  { %3552 = vmatprep.subr.bf16.mxu1 %v8666_v59  ;;  %3593 = vmatprep.subr.bf16.mxu0 %v8667_v30  ;;  %v8700_v59 = vld [vmem:[#allocation94_spill] sm:$0xff]  ;;  %v8701_v30 = vld [vmem:[#allocation95_spill] sm:$0xff] }
 0xe02   :  { %3553 = vmatpush1.bf16.msra.mxu1 %v8668_v31  ;;  %3594 = vmatpush1.bf16.msra.mxu0 %v8669_v27  ;;  %v8702_v31 = vld [vmem:[#allocation146_spill] sm:$0xff]  ;;  %v8703_v27 = vld [vmem:[#allocation148_spill] sm:$0xff] }
 0xe03   :  { %3554 = vmatprep.subr.bf16.mxu1 %v8670_v16  ;;  %3595 = vmatprep.subr.bf16.mxu0 %v8671_v32  ;;  %v8704_v16 = vld [vmem:[#allocation96_spill] sm:$0xff]  ;;  %v8705_v32 = vld [vmem:[#allocation97_spill] sm:$0xff] }
 0xe06   :  { %3555 = vmatpush1.bf16.msra.mxu1 %v8672_v22  ;;  %3596 = vmatpush1.bf16.msra.mxu0 %v8673_v40  ;;  %v8706_v22 = vld [vmem:[#allocation150_spill] sm:$0xff]  ;;  %v8707_v40 = vld [vmem:[#allocation152_spill] sm:$0xff] }
 0xe07   :  { %3556 = vmatprep.subr.bf16.mxu1 %v8674_v46  ;;  %3597 = vmatprep.subr.bf16.mxu0 %v8675_v56  ;;  %v8708_v46 = vld [vmem:[#allocation98_spill] sm:$0xff]  ;;  %v8709_v56 = vld [vmem:[#allocation99_spill] sm:$0xff] }
 0xe0a   :  { %3557 = vmatpush1.bf16.msra.mxu1 %v8676_v24  ;;  %3598 = vmatpush1.bf16.msra.mxu0 %v8677_v47  ;;  %v8710_v24 = vld [vmem:[#allocation154_spill] sm:$0xff]  ;;  %v8711_v47 = vld [vmem:[#allocation156_spill] sm:$0xff] }
 0xe0b   :  { %3558 = vmatprep.subr.bf16.mxu1 %v8678_v28  ;;  %3599 = vmatprep.subr.bf16.mxu0 %v8679_v53  ;;  %v8712_v28 = vld [vmem:[#allocation100_spill] sm:$0xff]  ;;  %v8713_v53 = vld [vmem:[#allocation101_spill] sm:$0xff] }
 0xe0e   :  { %3559 = vmatpush1.bf16.msra.mxu1 %v8680_v50  ;;  %3600 = vmatpush1.bf16.msra.mxu0 %v8681_v39  ;;  %v8714_v50 = vld [vmem:[#allocation158_spill] sm:$0xff]  ;;  %v8715_v39 = vld [vmem:[#allocation160_spill] sm:$0xff] }
 0xe0f   :  { %3560 = vmatprep.subr.bf16.mxu1 %v8682_v45  ;;  %3601 = vmatprep.subr.bf16.mxu0 %v8683_v61  ;;  %v8716_v45 = vld [vmem:[#allocation102_spill] sm:$0xff]  ;;  %v8717_v61 = vld [vmem:[#allocation103_spill] sm:$0xff] }
 0xe12   :  { %3561 = vmatpush1.bf16.msra.mxu1 %v8684_v38  ;;  %3602 = vmatpush1.bf16.msra.mxu0 %v8685_v2  ;;  %v8718_v38 = vld [vmem:[#allocation162_spill] sm:$0xff]  ;;  %v8719_v2 = vld [vmem:[#allocation164_spill] sm:$0xff] }
 0xe13   :  { %3612 = vmatprep.subr.bf16.mxu1 %v8686_v35  ;;  %3675 = vmatprep.subr.bf16.mxu0 %v8687_v43  ;;  %v8720_v35 = vld [vmem:[#allocation104_spill] sm:$0xff]  ;;  %v8721_v43 = vld [vmem:[#allocation105_spill] sm:$0xff] }
 0xe15   :  { %3563 = vmatmul.mubr.bf16.vlgmr.msra.gmra.mrb[68].mxu1 %v7263_v34  ;;  %3604 = vmatmul.mubr.bf16.vlgmr.msra.gmra.mrb[68].mxu0 %v7263_v34 }
 0xe16   :  { %3613 = vmatpush1.bf16.msra.mxu1 %v8688_v10  ;;  %3644 = vmatprep.mubr.bf16.mxu1 %v7261_v49  ;;  %v8698_v49 = vld [vmem:[#allocation142_spill] sm:$0xff] }
 0xe17   :  { %3614 = vmatprep.subr.bf16.mxu1 %v8689_v33  ;;  %3676 = vmatpush1.bf16.msra.mxu0 %v8690_v25  ;;  %v8722_v10 = vld [vmem:[#allocation106_spill] sm:$0xff]  ;;  %v8723_v33 = vld [vmem:[#allocation107_spill] sm:$0xff]  ;;  %v8724_v25 = vld [vmem:[#allocation108_spill] sm:$0xff] }
 0xe18   :  { %3677 = vmatprep.subr.bf16.mxu0 %v8691_v3  ;;  %3707 = vmatprep.mubr.bf16.mxu0 %v8208_v63  ;;  %v8725_v3 = vld [vmem:[#allocation109_spill] sm:$0xff] }
 0xe1a   :  { %3615 = vmatpush1.bf16.msra.mxu1 %v8692_v4  ;;  %v8726_v4 = vld [vmem:[#allocation110_spill] sm:$0xff] }
 0xe1b   :  { %3616 = vmatprep.subr.bf16.mxu1 %v8693_v15  ;;  %3678 = vmatpush1.bf16.msra.mxu0 %v8694_v57  ;;  %v8727_v15 = vld [vmem:[#allocation111_spill] sm:$0xff]  ;;  %v8728_v57 = vld [vmem:[#allocation112_spill] sm:$0xff] }
 0xe1c   :  { %3679 = vmatprep.subr.bf16.mxu0 %v8695_v37  ;;  %v8729_v37 = vld [vmem:[#allocation113_spill] sm:$0xff] }
 0xe1e   :  { %3617 = vmatpush1.bf16.msra.mxu1 %v8696_v41  ;;  %v8730_v41 = vld [vmem:[#allocation114_spill] sm:$0xff] }
 0xe1f   :  { %3618 = vmatprep.subr.bf16.mxu1 %v8697_v52  ;;  %3680 = vmatpush1.bf16.msra.mxu0 %v8698_v49  ;;  %v8731_v52 = vld [vmem:[#allocation115_spill] sm:$0xff]  ;;  %v8732_v49 = vld [vmem:[#allocation116_spill] sm:$0xff] }
 0xe20   :  { %3681 = vmatprep.subr.bf16.mxu0 %v8699_v6  ;;  %v8733_v6 = vld [vmem:[#allocation117_spill] sm:$0xff] }
 0xe22   :  { %3619 = vmatpush1.bf16.msra.mxu1 %v8700_v59  ;;  %v8734_v59 = vld [vmem:[#allocation118_spill] sm:$0xff] }
 0xe23   :  { %3620 = vmatprep.subr.bf16.mxu1 %v8701_v30  ;;  %3682 = vmatpush1.bf16.msra.mxu0 %v8702_v31  ;;  %v8735_v30 = vld [vmem:[#allocation134_spill] sm:$0xff]  ;;  %v8736_v31 = vld [vmem:[#allocation135_spill] sm:$0xff] }
 0xe24   :  { %3683 = vmatprep.subr.bf16.mxu0 %v8703_v27  ;;  %v8737_v27 = vld [vmem:[#allocation137_spill] sm:$0xff] }
 0xe26   :  { %3621 = vmatpush1.bf16.msra.mxu1 %v8704_v16  ;;  %v8738_v16 = vld [vmem:[#allocation139_spill] sm:$0xff] }
 0xe27   :  { %3622 = vmatprep.subr.bf16.mxu1 %v8705_v32  ;;  %3684 = vmatpush1.bf16.msra.mxu0 %v8706_v22  ;;  %v8739_v32 = vld [vmem:[#allocation141_spill] sm:$0xff]  ;;  %v8740_v22 = vld [vmem:[#allocation143_spill] sm:$0xff] }
 0xe28   :  { %3685 = vmatprep.subr.bf16.mxu0 %v8707_v40  ;;  %v8741_v40 = vld [vmem:[#allocation145_spill] sm:$0xff] }
 0xe2a   :  { %3623 = vmatpush1.bf16.msra.mxu1 %v8708_v46  ;;  %v8742_v46 = vld [vmem:[#allocation147_spill] sm:$0xff] }
 0xe2b   :  { %3624 = vmatprep.subr.bf16.mxu1 %v8709_v56  ;;  %3686 = vmatpush1.bf16.msra.mxu0 %v8710_v24  ;;  %v8743_v56 = vld [vmem:[#allocation149_spill] sm:$0xff]  ;;  %v8744_v24 = vld [vmem:[#allocation151_spill] sm:$0xff] }
 0xe2c   :  { %3687 = vmatprep.subr.bf16.mxu0 %v8711_v47  ;;  %v8746_v47 = vld [vmem:[#allocation155_spill] sm:$0xff] }
 0xe2e   :  { %3625 = vmatpush1.bf16.msra.mxu1 %v8712_v28  ;;  %v8747_v28 = vld [vmem:[#allocation157_spill] sm:$0xff] }
 0xe2f   :  { %3626 = vmatprep.subr.bf16.mxu1 %v8713_v53  ;;  %3688 = vmatpush1.bf16.msra.mxu0 %v8714_v50  ;;  %v8748_v53 = vld [vmem:[#allocation159_spill] sm:$0xff]  ;;  %v8749_v50 = vld [vmem:[#allocation161_spill] sm:$0xff] }
 0xe30   :  { %3689 = vmatprep.subr.bf16.mxu0 %v8715_v39  ;;  %v8750_v39 = vld [vmem:[#allocation163_spill] sm:$0xff] }
 0xe32   :  { %3627 = vmatpush1.bf16.msra.mxu1 %v8716_v45  ;;  %v8751_v45 = vld [vmem:[#allocation165_spill] sm:$0xff] }
 0xe33   :  { %3628 = vmatprep.subr.bf16.mxu1 %v8717_v61  ;;  %3690 = vmatpush1.bf16.msra.mxu0 %v8718_v38 }
 0xe34   :  { %3757 = vmatprep.subr.bf16.mxu0 %v8719_v2 }
 0xe36   :  { %3629 = vmatpush1.bf16.msra.mxu1 %v8720_v35 }
 0xe37   :  { %3630 = vmatprep.subr.bf16.mxu1 %v8721_v43 }
 0xe3a   :  { %3631 = vmatpush1.bf16.msra.mxu1 %v8722_v10 }
 0xe3b   :  { %3632 = vmatprep.subr.bf16.mxu1 %v8723_v33 }
 0xe3e   :  { %3633 = vmatpush1.bf16.msra.mxu1 %v8724_v25 }
 0xe3f   :  { %3634 = vmatprep.subr.bf16.mxu1 %v8725_v3 }
 0xe42   :  { %3635 = vmatpush1.bf16.msra.mxu1 %v8726_v4  ;;  %v7412_v4 = vld [vmem:[%s7557_s8] ss:$0 sm:$0xff] }
 0xe43   :  { %3636 = vmatprep.subr.bf16.mxu1 %v8727_v15 }
 0xe46   :  { %3637 = vmatpush1.bf16.msra.mxu1 %v8728_v57 }
 0xe47   :  { %3638 = vmatprep.subr.bf16.mxu1 %v8729_v37 }
 0xe4a   :  { %3639 = vmatpush1.bf16.msra.mxu1 %v8730_v41 }
 0xe4b   :  { %3640 = vmatprep.subr.bf16.mxu1 %v8731_v52 }
 0xe4e   :  { %3641 = vmatpush1.bf16.msra.mxu1 %v8732_v49 }
 0xe4f   :  { %3642 = vmatprep.subr.bf16.mxu1 %v8733_v6 }
 0xe52   :  { %3643 = vmatpush1.bf16.msra.mxu1 %v8734_v59 }
 0xe53   :  { %3716 = vmatprep.subr.bf16.mxu1 %v8735_v30 }
 0xe55   :  { %3645 = vmatmul.mubr.bf16.vlgmr.msra.gmra.mrb[72].mxu1 %v7263_v34  ;;  %v8745_v34 = vld [vmem:[#allocation153_spill] sm:$0xff] }
 0xe56   :  { %3717 = vmatpush1.bf16.msra.mxu1 %v8736_v31  ;;  %3748 = vmatprep.mubr.bf16.mxu1 %v8208_v63 }
 0xe57   :  { %3718 = vmatprep.subr.bf16.mxu1 %v8737_v27 }
 0xe5a   :  { %3719 = vmatpush1.bf16.msra.mxu1 %v8738_v16 }
 0xe5b   :  { %3720 = vmatprep.subr.bf16.mxu1 %v8739_v32 }
 0xe5e   :  { %3721 = vmatpush1.bf16.msra.mxu1 %v8740_v22 }
 0xe5f   :  { %3722 = vmatprep.subr.bf16.mxu1 %v8741_v40 }
 0xe62   :  { %3723 = vmatpush1.bf16.msra.mxu1 %v8742_v46 }
 0xe63   :  { %3724 = vmatprep.subr.bf16.mxu1 %v8743_v56 }
 0xe66   :  { %3725 = vmatpush1.bf16.msra.mxu1 %v8744_v24 }
 0xe67   :  { %3726 = vmatprep.subr.bf16.mxu1 %v8745_v34 }
 0xe6a   :  { %3727 = vmatpush1.bf16.msra.mxu1 %v8746_v47 }
 0xe6b   :  { %3728 = vmatprep.subr.bf16.mxu1 %v8747_v28 }
 0xe6e   :  { %3729 = vmatpush1.bf16.msra.mxu1 %v8748_v53 }
 0xe6f   :  { %3730 = vmatprep.subr.bf16.mxu1 %v8749_v50 }
 0xe72   :  { %3731 = vmatpush1.bf16.msra.mxu1 %v8750_v39 }
 0xe73   :  { %3798 = vmatprep.subr.bf16.mxu1 %v8751_v45 }
 0xea8   :  { %v4372_v61 = vpop.f32.mrb[64].mxu1  ;;  %v7405_v38 = vpop.f32.mrb[64].mxu0 }
 0xea9   :  { %v4373_v2 = vpop.f32.mrb[65].mxu1  ;;  %v7407_v35 = vpop.f32.mrb[65].mxu0 }
 0xeaa   :  { %v4374_v43 = vadd.f32 %v4373_v2, %v4372_v61  ;;  %v4375_v10 = vpop.f32.mrb[66].mxu1  ;;  %v3527_v33 = vpop.f32.mrb[66].mxu0 }
 0xeab   :  { %v4376_v25 = vpop.f32.mrb[67].mxu1  ;;  %v3528_v3 = vpop.f32.mrb[67].mxu0  ;;  %v4708_v10 = vld [vmem:[%s7556_s7 + $0x58] sm:$0xff]  }
 0xeac   :  { %v3482_v15 = vadd.f32 %v7412_v4, %v4374_v43  ;;  %v4706_v43 = vld [vmem:[%s7556_s7 + $0x50] sm:$0xff]   ;;  %v4709_v33 = vld [vmem:[%s7556_s7 + $0x18] sm:$0xff]   ;;  %v4710_v25 = vld [vmem:[%s7556_s7 + $0x60] sm:$0xff]  }
 0xead   :  { %v4711_v3 = vld [vmem:[%s7556_s7 + $0x20] sm:$0xff]  }
 0xeae   :  { %4273 = vst [vmem:[%s7558_s9 + $0x18] sm:$0xff] %v3482_v15  ;;  %3653 = vmax.xlane.f32.xlu1 %v3482_v15 }
 0xee8   :  { %v7418_v57 = vpop.f32.mrb[68].mxu1  ;;  %v7420_v37 = vpop.f32.mrb[68].mxu0 }
 0xee9   :  { %v7422_v41 = vpop.f32.mrb[69].mxu1  ;;  %v7424_v52 = vpop.f32.mrb[69].mxu0 }
 0xeea   :  { %v3568_v49 = vpop.f32.mrb[70].mxu1  ;;  %v3609_v6 = vpop.f32.mrb[70].mxu0 }
 0xeeb   :  { %v3569_v59 = vpop.f32.mrb[71].mxu1  ;;  %v3610_v30 = vpop.f32.mrb[71].mxu0  ;;  %v4713_v49 = vld [vmem:[%s7556_s7 + $0x28] sm:$0xff]   ;;  %v4714_v6 = vld [vmem:[%s7556_s7 + $0x70] sm:$0xff]  }
 0xeec   :  { %v4715_v59 = vld [vmem:[%s7556_s7 + $0x30] sm:$0xff]   ;;  %v4716_v30 = vld [vmem:[%s7556_s7 + $0x78] sm:$0xff]  }
 0xf28   :  { %v7426_v31 = vpop.f32.mrb[72].mxu1 }
 0xf29   :  { %v7428_v27 = vpop.f32.mrb[73].mxu1 }
 0xf2a   :  { %v3650_v16 = vpop.f32.mrb[74].mxu1 }
 0xf2b   :  { %v3651_v32 = vpop.f32.mrb[75].mxu1  ;;  %v4717_v16 = vld [vmem:[%s7556_s7 + $0x38] sm:$0xff]  }
 0xf3b   :  { %v3654_v22 = vpop.xlane.xlu1 %3653 }
 0xf3c   :  { %vm3655_vm12 = vcmp.eq.f32.partialorder %v3482_v15, %v3654_v22  ;;  %v4712_v15 = vld [vmem:[%s7556_s7 + $0x68] sm:$0xff]  }
 0xf3d   :  { %v3656_v40 = vsel %vm3655_vm12, %v8384_v51, 128 }
 0xf3e   :  { %v3658_v46 = vshra.s32 %v3656_v40, 16  ;;  %v3657_v24 = vand.u32 65535, %v3656_v40 }
 0xf40   :  { %v3660_v56 = vcvt.s32.f32 %v3658_v46  ;;  %v3659_v47 = vcvt.s32.f32 %v3657_v24 }
 0xf42   :  { %3661 = vmin.xlane.f32.xlu0 %v3660_v56 }
 0xfcf   :  { %v3662_v34 = vpop.xlane.xlu0 %3661 }
 0xfd0   :  { %vm3663_vm13 = vcmp.eq.f32.partialorder %v3660_v56, %v3662_v34  ;;  %v3668_v53 = vcvt.f32.s32 %v3662_v34 }
 0xfd1   :  { %v3664_v28 = vsel %vm3663_vm13, %v3659_v47, inf }
 0xfd2   :  { %3665 = vmin.xlane.f32.xlu1 %v3664_v28  ;;  %v3669_v39 = vshll.u32 %v3668_v53, 16 }
0x105f   :  { %v3666_v50 = vpop.xlane.xlu1 %3665 }
0x1060   :  { %v3667_v45 = vcvt.f32.s32 %v3666_v50 }
0x1062   :  { %v3670_v61 = vadd.s32 %v3669_v39, %v3667_v45 }
0x1064   :  { %vm3671_vm14 = vcmp.eq.s32.totalorder %v8384_v51, %v3670_v61  ;;  %v8755_v51 = vld [vmem:[#allocation183_spill] sm:$0xff] }
0x1065   :  { %vm7432_vm15 = vmpackc.low %vm3671_vm14, %vm3671_vm14 }
0x1066   :  { %4276 = vmatmul.mubr.msk.bf16.vlgmr.msra.gmra.mrb[72].mxu0 %vm7432_vm15, %v8231_v0  ;;  %4278 = vmatmul.mubr.msk.bf16.vlgmr.msra.gmra.mrb[76].mxu1 %vm7432_vm15, %v8231_v0 }
0x1067   :  { %3758 = vmatpush1.bf16.msra.mxu0 %v8387_v5  ;;  %3799 = vmatpush1.bf16.msra.mxu1 %v8388_v62  ;;  %v8756_v5 = vld [vmem:[#allocation184_spill] sm:$0xff]  ;;  %v8757_v62 = vld [vmem:[#allocation185_spill] sm:$0xff] }
0x1068   :  { %3759 = vmatprep.subr.bf16.mxu0 %v8389_v19  ;;  %3800 = vmatprep.subr.bf16.mxu1 %v8390_v11  ;;  %v8758_v19 = vld [vmem:[#allocation186_spill] sm:$0xff]  ;;  %v8759_v11 = vld [vmem:[#allocation187_spill] sm:$0xff] }
0x1069   :  { %3789 = vmatprep.mubr.bf16.mxu0 %v8208_v63  ;;  %3830 = vmatprep.mubr.bf16.mxu1 %v8208_v63  ;;  %v8754_v63 = vld [vmem:[#allocation182_spill] sm:$0xff] }
0x106b   :  { %3760 = vmatpush1.bf16.msra.mxu0 %v8571_v55  ;;  %3801 = vmatpush1.bf16.msra.mxu1 %v8572_v20  ;;  %v8766_v55 = vld [vmem:[#allocation194_spill] sm:$0xff]  ;;  %v8767_v20 = vld [vmem:[#allocation195_spill] sm:$0xff] }
0x106c   :  { %3761 = vmatprep.subr.bf16.mxu0 %v8573_v60  ;;  %3802 = vmatprep.subr.bf16.mxu1 %v8574_v29  ;;  %v4702_v60 = vld [vmem:[%s7556_s7 + $0x40] sm:$0xff]  }
0x106d   :  { %v4703_v29 = vld [vmem:[%s7556_s7] sm:$0xff]  }
0x106f   :  { %3762 = vmatpush1.bf16.msra.mxu0 %v8575_v7  ;;  %3803 = vmatpush1.bf16.msra.mxu1 %v8576_v1  ;;  %v4704_v7 = vld [vmem:[%s7556_s7 + $0x48] sm:$0xff]  }
0x1070   :  { %3763 = vmatprep.subr.bf16.mxu0 %v8397_v17  ;;  %3804 = vmatprep.subr.bf16.mxu1 %v8398_v13  ;;  %v8760_v17 = vld [vmem:[#allocation188_spill] sm:$0xff]  ;;  %v8761_v13 = vld [vmem:[#allocation189_spill] sm:$0xff]  ;;  %v4705_v1 = vld [vmem:[%s7556_s7 + $0x8] sm:$0xff]  }
0x1073   :  { %3764 = vmatpush1.bf16.msra.mxu0 %v8399_v26  ;;  %3805 = vmatpush1.bf16.msra.mxu1 %v8400_v9  ;;  %v8762_v26 = vld [vmem:[#allocation190_spill] sm:$0xff]  ;;  %v8763_v9 = vld [vmem:[#allocation191_spill] sm:$0xff] }
0x1074   :  { %3765 = vmatprep.subr.bf16.mxu0 %v8401_v36  ;;  %3806 = vmatprep.subr.bf16.mxu1 %v8402_v48  ;;  %v8764_v48 = vld [vmem:[#allocation192_spill] sm:$0xff]  ;;  %v8765_v36 = vld [vmem:[#allocation193_spill] sm:$0xff] }
0x1077   :  { %3766 = vmatpush1.bf16.msra.mxu0 %v8754_v63  ;;  %3807 = vmatpush1.bf16.msra.mxu1 %v8755_v51 }
0x1078   :  { %3767 = vmatprep.subr.bf16.mxu0 %v8756_v5  ;;  %3808 = vmatprep.subr.bf16.mxu1 %v8757_v62 }
0x107b   :  { %3768 = vmatpush1.bf16.msra.mxu0 %v8758_v19  ;;  %3809 = vmatpush1.bf16.msra.mxu1 %v8759_v11 }
0x107c   :  { %3769 = vmatprep.subr.bf16.mxu0 %v8760_v17  ;;  %3810 = vmatprep.subr.bf16.mxu1 %v8761_v13 }
0x107f   :  { %3770 = vmatpush1.bf16.msra.mxu0 %v8762_v26  ;;  %3811 = vmatpush1.bf16.msra.mxu1 %v8763_v9 }
0x1080   :  { %3771 = vmatprep.subr.bf16.mxu0 %v8764_v48  ;;  %3812 = vmatprep.subr.bf16.mxu1 %v8765_v36 }
0x1083   :  { %3772 = vmatpush1.bf16.msra.mxu0 %v8766_v55  ;;  %3813 = vmatpush1.bf16.msra.mxu1 %v8767_v20 }
0x1084   :  { %4378 = vmatprep.subr.bf16.mxu0 %v4702_v60 }
0x1086   :  { %4280 = vmatmul.mubr.msk.bf16.vlgmr.msra.gmra.mrb[76].mxu0 %vm7432_vm15, %v8231_v0  ;;  %4282 = vmatmul.mubr.msk.bf16.vlgmr.msra.gmra.mrb[80].mxu1 %vm7432_vm15, %v8231_v0  ;;  %v4707_v0 = vld [vmem:[%s7556_s7 + $0x10] sm:$0xff]  }
0x1087   :  { %4379 = vmatpush3.bf16.msra.mxu0 %v4703_v29 }
0x1088   :  { %4380 = vmatprep.subr.bf16.mxu0 %v4704_v7 }
0x108b   :  { %4381 = vmatpush3.bf16.msra.mxu0 %v4705_v1 }
0x108c   :  { %4382 = vmatprep.subr.bf16.mxu0 %v4706_v43 }
0x108f   :  { %4383 = vmatpush3.bf16.msra.mxu0 %v4707_v0 }
0x1090   :  { %4384 = vmatprep.subr.bf16.mxu0 %v4708_v10 }
0x1093   :  { %4385 = vmatpush3.bf16.msra.mxu0 %v4709_v33 }
0x1094   :  { %4386 = vmatprep.subr.bf16.mxu0 %v4710_v25 }
0x1097   :  { %4387 = vmatpush3.bf16.msra.mxu0 %v4711_v3 }
0x1098   :  { %4388 = vmatprep.subr.bf16.mxu0 %v4712_v15 }
0x109b   :  { %4389 = vmatpush3.bf16.msra.mxu0 %v4713_v49 }
0x109c   :  { %4390 = vmatprep.subr.bf16.mxu0 %v4714_v6 }
0x109f   :  { %4391 = vmatpush3.bf16.msra.mxu0 %v4715_v59 }
0x10a0   :  { %4392 = vmatprep.subr.bf16.mxu0 %v4716_v30 }
0x10a3   :  { %4393 = vmatpush3.bf16.msra.mxu0 %v4717_v16 }
0x1139   :  { %v3709_v32 = vpop.f32.mrb[72].mxu0  ;;  %v3750_v22 = vpop.f32.mrb[76].mxu1 }
0x113a   :  { %v3710_v40 = vadd.f32 %v3709_v32, %v7405_v38  ;;  %v3751_v46 = vadd.f32 %v3750_v22, %v7418_v57  ;;  %v3711_v56 = vpop.f32.mrb[73].mxu0  ;;  %v3752_v24 = vpop.f32.mrb[77].mxu1 }
0x113b   :  { %v3712_v34 = vadd.f32 %v3711_v56, %v7407_v35  ;;  %v3753_v47 = vadd.f32 %v3752_v24, %v7422_v41  ;;  %v3713_v28 = vpop.f32.mrb[74].mxu0  ;;  %v3754_v53 = vpop.f32.mrb[78].mxu1 }
0x113c   :  { %v3714_v50 = vpop.f32.mrb[75].mxu0  ;;  %v3755_v39 = vpop.f32.mrb[79].mxu1  ;;  %v3839_v45 = vadd.f32 %v3710_v40, %v8265_v44  ;;  %v3841_v61 = vadd.f32 %v3751_v46, %v5947_v54 }
0x113d   :  { %v3840_v2 = vadd.f32 %v3712_v34, %v8266_v23  ;;  %v3842_v38 = vadd.f32 %v3753_v47, %v5953_v18 }
0x113e   :  { %v4283_v63 = vmul.f32 -1.442695, %v3839_v45  ;;  %v4285_v57 = vmul.f32 -1.442695, %v3841_v61 }
0x113f   :  { %v4284_v51 = vmul.f32 -1.442695, %v3840_v2  ;;  %v4286_v5 = vmul.f32 -1.442695, %v3842_v38 }
0x1140   :  { %4652 = vpow2.f32 %v4283_v63 }
0x1141   :  { %4654 = vpow2.f32 %v4285_v57 }
0x1142   :  { %4656 = vpow2.f32 %v4284_v51 }
0x1143   :  { %4658 = vpow2.f32 %v4286_v5 }
0x114a   :  { %v4653_v35 = vpop.eup %4652 }
0x114b   :  { %v4655_v41 = vpop.eup %4654  ;;  %v3853_v11 = vadd.f32 1.0, %v4653_v35 }
0x114c   :  { %v4657_v62 = vpop.eup %4656  ;;  %v3865_v44 = vadd.f32 1.0, %v4655_v41 }
0x114d   :  { %v4659_v19 = vpop.eup %4658  ;;  %v3854_v17 = vadd.f32 1.0, %v4657_v62  ;;  %4660 = vrcp.f32 %v3853_v11 }
0x114e   :  { %v3866_v54 = vadd.f32 1.0, %v4659_v19  ;;  %4662 = vrcp.f32 %v3865_v44 }
0x114f   :  { %4664 = vrcp.f32 %v3854_v17 }
0x1150   :  { %4666 = vrcp.f32 %v3866_v54 }
0x1159   :  { %v3791_v13 = vpop.f32.mrb[76].mxu0  ;;  %v3832_v23 = vpop.f32.mrb[80].mxu1 }
0x115a   :  { %v3792_v18 = vadd.f32 %v3791_v13, %v7420_v37  ;;  %v3833_v26 = vadd.f32 %v3832_v23, %v7426_v31  ;;  %v3793_v9 = vpop.f32.mrb[77].mxu0  ;;  %v3834_v48 = vpop.f32.mrb[81].mxu1 }
0x115b   :  { %v3794_v36 = vadd.f32 %v3793_v9, %v7424_v52  ;;  %v3835_v55 = vadd.f32 %v3834_v48, %v7428_v27  ;;  %v3795_v20 = vpop.f32.mrb[78].mxu0  ;;  %v3836_v60 = vpop.f32.mrb[82].mxu1 }
0x115c   :  { %v3843_v29 = vadd.f32 %v3792_v18, %v8267_v42  ;;  %v3845_v7 = vadd.f32 %v3833_v26, %v5967_v58  ;;  %v3796_v1 = vpop.f32.mrb[79].mxu0  ;;  %v3837_v43 = vpop.f32.mrb[83].mxu1 }
0x115d   :  { %v3844_v37 = vadd.f32 %v3794_v36, %v8268_v12  ;;  %v3846_v31 = vadd.f32 %v3835_v55, %v5973_v14  ;;  %v4661_v27 = vpop.eup %4660 }
0x115e   :  { %4668 = vtanh.f32 %v3843_v29  ;;  %v4287_v0 = vmul.f32 -1.442695, %v3845_v7  ;;  %v4663_v10 = vpop.eup %4662 }
0x115f   :  { %4670 = vtanh.f32 %v3844_v37  ;;  %v4288_v52 = vmul.f32 -1.442695, %v3846_v31  ;;  %v4665_v33 = vpop.eup %4664  ;;  %v3885_v58 = vmul.f32 %v4663_v10, %v7255_v21 }
0x1160   :  { %4672 = vpow2.f32 %v4287_v0  ;;  %v4667_v25 = vpop.eup %4666 }
0x1161   :  { %4674 = vpow2.f32 %v4288_v52  ;;  %v3886_v12 = vmul.f32 %v4667_v25, %v7257_v8 }
0x1168   :  { %v4669_v42 = vpop.eup %4668 }
0x1169   :  { %v4671_v3 = vpop.eup %4670  ;;  %v3887_v15 = vmul.f32 %v4669_v42, %v4661_v27 }
0x116a   :  { %v4673_v49 = vpop.eup %4672  ;;  %v3888_v6 = vmul.f32 %v4671_v3, %v4665_v33 }
0x116b   :  { %v4675_v14 = vpop.eup %4674  ;;  %v3889_v59 = vadd.f32 %v3887_v15, %v3885_v58  ;;  %v3879_v30 = vadd.f32 1.0, %v4673_v49 }
0x116c   :  { %v3880_v16 = vadd.f32 1.0, %v4675_v14  ;;  %v3890_v32 = vadd.f32 %v3888_v6, %v3886_v12 }
0x116d   :  { %4676 = vtanh.f32 %v3889_v59 }
0x116e   :  { %4678 = vrcp.f32 %v3879_v30 }
0x116f   :  { %4680 = vrcp.f32 %v3880_v16 }
0x1170   :  { %4682 = vtanh.f32 %v3890_v32 }
0x1177   :  { %v4677_v22 = vpop.eup %4676 }
0x1178   :  { %v4679_v40 = vpop.eup %4678 }
0x1179   :  { %v4681_v46 = vpop.eup %4680  ;;  %v3893_v56 = vmul.f32 %v4679_v40, %v4677_v22 }
0x117a   :  { %v4683_v24 = vpop.eup %4682 }
0x117b   :  { %v3894_v21 = vmul.f32 %v4683_v24, %v4681_v46  ;;  %v3895_v47 = vpack.c.bf16 %v3893_v56, %v3893_v56 }
0x117d   :  { %v3896_v34 = vpack.c.bf16 %v3894_v21, %v3894_v21 }
0x117f   :  { %3929 = vmatprep.mubr.bf16.mxu0 %v3896_v34 }
0x1180   :  { %3930 = vmatmul.mubr.bf16.vlgmr.msra.gmra.mrb[80].mxu0 %v3895_v47 }
0x1253   :  { %v4394_v8 = vpop.f32.mrb[80].mxu0 }
0x1254   :  { %v4395_v28 = vpop.f32.mrb[81].mxu0 }
0x1255   :  { %v4396_v53 = vadd.f32 %v4395_v28, %v4394_v8  ;;  %v4397_v50 = vpop.f32.mrb[82].mxu0 }
0x1256   :  { %v4398_v39 = vpop.f32.mrb[83].mxu0 }
0x1257   :  { %v3932_v45 = vadd.f32 %v7412_v4, %v4396_v53 }
0x1259   :  { %4289 = vst [vmem:[%s7558_s9 + $0x20] sm:$0xff] %v3932_v45 }

</bundles_post_ra>
